<compile_context>
chip_gen: v6e
topology: v6e:2x2x1
jax: 0.10.0
libtpu: 0.0.40
codegen_flags: <defaults>
</compile_context>

<pallas_src>
import functools
import math

import jax
import jax.numpy as jnp
import numpy as np
from jax import lax
from jax.experimental import pallas as pl
from jax.experimental.pallas import tpu as pltpu


# ----------------------------------------------------------------------------- #
# Connectivity construction (host-side glue, mirrors the PyTorch helper funcs)  #
# ----------------------------------------------------------------------------- #
def brain_region(neuron_num):
    region, start = [], 0
    for n in neuron_num:
        region.append([start, start + int(n)])
        start += int(n)
    return np.array(region, dtype=np.int64)


def syn_within_region(key, syn_num, region):
    parts = []
    for idx, (lo, hi) in enumerate(region):
        k = jax.random.fold_in(key, idx)
        parts.append(
            np.asarray(jax.random.randint(k, ((hi - lo) * syn_num, 2), lo, hi))
        )
    return np.concatenate(parts, axis=0)


def syn_cross_region(key, weight_matrix, region):
    parts, c = [], 0
    for i in range(len(weight_matrix)):
        for j in range(len(weight_matrix)):
            w = int(weight_matrix[i][j])
            if w < 10:
                continue
            kp = jax.random.fold_in(key, 2 * c)
            kq = jax.random.fold_in(key, 2 * c + 1)
            c += 1
            pre = np.asarray(jax.random.randint(kp, (w, 1), region[j][0], region[j][1]))
            post = np.asarray(jax.random.randint(kq, (w, 1), region[i][0], region[i][1]))
            parts.append(np.concatenate([post, pre], axis=1))
    return np.concatenate(parts, axis=0)


# ----------------------------------------------------------------------------- #
# Packed state layout: one (8, N) float32 tile                                  #
# ----------------------------------------------------------------------------- #
ROW_SPIKE, ROW_S, ROW_R, ROW_IBACK, ROW_SOMA, ROW_APICAL, ROW_THR, ROW_PAD = range(8)
NUM_ROWS = 8


# ----------------------------------------------------------------------------- #
# Pallas kernel: TS timesteps per grid step, T/TS grid steps                    #
# ----------------------------------------------------------------------------- #
def make_brain_kernel(*, dt, tau_I, tao_d, tao_r, tau, tau_apical, mu, sig, ts):
    dt_over_tau = dt / tau_I
    sqrt_coeff = math.sqrt(dt_over_tau / 2.0)   # == sqrt(1 / (2 * (1/dt_over_tau)))
    noise_gain = sig / sqrt_coeff               # folds `/ sqrt_coeff * sig` into one mul
    lamda_d = dt / tao_d
    lamda_r = dt / tao_r
    inv_tao_d = 1.0 / tao_d
    inv_tau = 1.0 / tau
    inv_tau_apical = 1.0 / tau_apical

    def kernel(wT_ref, state0_ref, noise_ref, i_ref, state_ref):
        tb = pl.program_id(0)

        # Initialize the resident state block from the packed input once.
        @pl.when(tb == 0)
        def _():
            state_ref[...] = state0_ref[...]

        # Read the carried state rows once per time block; thr is constant.
        spike0 = state_ref[ROW_SPIKE:ROW_SPIKE + 1, :]
        s0 = state_ref[ROW_S:ROW_S + 1, :]
        r0 = state_ref[ROW_R:ROW_R + 1, :]
        iback0 = state_ref[ROW_IBACK:ROW_IBACK + 1, :]
        soma0 = state_ref[ROW_SOMA:ROW_SOMA + 1, :]
        apical0 = state_ref[ROW_APICAL:ROW_APICAL + 1, :]
        thr = state_ref[ROW_THR:ROW_THR + 1, :]

        def step(t, carry):
            spike, s, r, iback, soma, apical = carry
            noise = noise_ref[t].astype(jnp.float32)           # (1, N)

            # ---- Syn.forward --------------------------------------------------
            iback = iback + dt_over_tau * (noise - iback)
            ieff = iback * noise_gain + mu
            s = s + lamda_r * (inv_tao_d * spike - s)
            r = r - lamda_d * r + dt * s
            # sparse.mm(W, r) -> dense matvec on MXU with pre-transposed bf16
            # weights (small exact integer counts, bf16-exact).
            I = jnp.dot(r.astype(jnp.bfloat16), wT_ref[...],
                        preferred_element_type=jnp.float32) + ieff

            # ---- MultiCompartmentaEIF.forward ---------------------------------
            apical = (apical + I) * inv_tau_apical
            soma = soma + (apical - soma) * inv_tau
            new_spike = (soma > thr).astype(jnp.float32)
            keep = 1.0 - new_spike
            soma = soma * keep
            apical = apical * keep

            i_ref[t] = I                                       # per-step output row
            return (new_spike, s, r, iback, soma, apical)

        spike, s, r, iback, soma, apical = lax.fori_loop(
            0, ts, step, (spike0, s0, r0, iback0, soma0, apical0), unroll=True)

        # Write back only the changed rows (thr / pad rows stay as initialized).
        state_ref[ROW_SPIKE:ROW_SPIKE + 1, :] = spike
        state_ref[ROW_S:ROW_S + 1, :] = s
        state_ref[ROW_R:ROW_R + 1, :] = r
        state_ref[ROW_IBACK:ROW_IBACK + 1, :] = iback
        state_ref[ROW_SOMA:ROW_SOMA + 1, :] = soma
        state_ref[ROW_APICAL:ROW_APICAL + 1, :] = apical

    return kernel


def brain_run(wT_bf16, state0, noise_seq, *, dt, ts=16):
    """Run T = noise_seq.shape[0] steps of brain.forward in one Pallas kernel.

    noise_seq: (T, 1, N) bfloat16 pre-sampled standard-normal noise.
    Returns (I_seq (T,1,N) f32, final packed state (8,N) f32).
    """
    T = noise_seq.shape[0]
    N = wT_bf16.shape[0]
    assert T % ts == 0, "T must be a multiple of the time-block size"
    kernel = make_brain_kernel(dt=dt, tau_I=3.0, tao_d=3.0, tao_r=6.0,
                               tau=2.0, tau_apical=2.0, mu=10.0, sig=12.0, ts=ts)

    w_spec = pl.BlockSpec((N, N), lambda tb: (0, 0))             # loaded once, resident
    state_spec = pl.BlockSpec((NUM_ROWS, N), lambda tb: (0, 0))  # resident accumulator
    noise_spec = pl.BlockSpec((ts, 1, N), lambda tb: (tb, 0, 0))  # one time block / step
    i_spec = pl.BlockSpec((ts, 1, N), lambda tb: (tb, 0, 0))

    # Explicit scoped-VMEM budget: resident (double-buffered) W + state + time blocks.
    needed = (2 * N * N * 2                       # bf16 W, double-buffered
              + 2 * 2 * NUM_ROWS * N * 4          # state0 in + state out
              + 2 * ts * N * 2                    # noise block (bf16)
              + 2 * ts * N * 4)                   # I block (f32)
    vmem_limit = int(min(64 * 1024 * 1024, max(2 * needed + (4 << 20), 16 << 20)))

    I_seq, state_final = pl.pallas_call(
        kernel,
        grid=(T // ts,),
        in_specs=[w_spec, state_spec, noise_spec],
        out_specs=(i_spec, state_spec),
        out_shape=(jax.ShapeDtypeStruct((T, 1, N), jnp.float32),
                   jax.ShapeDtypeStruct((NUM_ROWS, N), jnp.float32)),
        compiler_params=pltpu.CompilerParams(
            dimension_semantics=("arbitrary",),
            vmem_limit_bytes=vmem_limit),
    )(wT_bf16, state0, noise_seq)
    return I_seq, state_final


# ----------------------------------------------------------------------------- #
# Pure-JAX reference (identical math, incl. the bf16 matvec) for a sanity check #
# ----------------------------------------------------------------------------- #
def brain_reference(wT_bf16, state0, noise_seq, *, dt):
    tau_I, tao_d, tao_r = 3.0, 3.0, 6.0
    tau, tau_apical, mu, sig = 2.0, 2.0, 10.0, 12.0
    dt_over_tau = dt / tau_I
    noise_gain = sig / math.sqrt(dt_over_tau / 2.0)
    lamda_d, lamda_r = dt / tao_d, dt / tao_r
    inv_tao_d, inv_tau, inv_tau_apical = 1.0 / tao_d, 1.0 / tau, 1.0 / tau_apical

    spike, s, r, iback, soma, apical, thr = [state0[i:i + 1] for i in range(7)]
    Is = []
    for t in range(noise_seq.shape[0]):
        noise = noise_seq[t].astype(jnp.float32)
        iback = iback + dt_over_tau * (noise - iback)
        ieff = iback * noise_gain + mu
        s = s + lamda_r * (inv_tao_d * spike - s)
        r = r - lamda_d * r + dt * s
        I = jnp.dot(r.astype(jnp.bfloat16), wT_bf16,
                    preferred_element_type=jnp.float32) + ieff
        apical = (apical + I) * inv_tau_apical
        soma = soma + (apical - soma) * inv_tau
        spike = (soma > thr).astype(jnp.float32)
        soma = soma * (1.0 - spike)
        apical = apical * (1.0 - spike)
        Is.append(I)
    I_seq = jnp.stack(Is, axis=0)
    state_final = jnp.concatenate(
        [spike, s, r, iback, soma, apical, thr, state0[7:8]], axis=0)
    return I_seq, state_final


# ----------------------------------------------------------------------------- #
# Driver                                                                        #
# ----------------------------------------------------------------------------- #
if __name__ == "__main__":
    key = jax.random.PRNGKey(0)
    k_syn1, k_syn2, k_noise = jax.random.split(key, 3)

    # Small synthetic brain: 2 regions x 128 neurons => N = 256 (lane-aligned).
    neuron_num = np.array([128, 128])
    N = int(neuron_num.sum())
    assert N % 128 == 0, "pad neuron count to a multiple of 128 on the host"
    regions = brain_region(neuron_num)

    syn_1 = syn_within_region(k_syn1, 10, regions)                 # 10 synapses / neuron
    weight_matrix = np.array([[0, 2], [3, 0]], dtype=np.int64) * 10
    syn_2 = syn_cross_region(k_syn2, weight_matrix, regions)
    syn = np.concatenate([syn_1, syn_2], axis=0)
    weight = -np.ones(len(syn), dtype=np.float32)

    # Densify the COO matrix W[post, pre] (duplicates accumulate, as in sparse COO).
    W = np.zeros((N, N), dtype=np.float32)
    np.add.at(W, (syn[:, 0], syn[:, 1]), weight)
    # Strict bound so every synapse-count sum is exactly representable in bf16.
    assert np.abs(W).max() < 256.0, "synapse multiplicity too large for exact bf16"
    W_T_bf16 = jnp.asarray(W.T, dtype=jnp.bfloat16)                # bf16-exact integers

    dt = 0.1
    T = 64
    TS = 16
    v_reset = 0.0
    threshold = 2.0                                                # p[0]

    state0_np = np.zeros((NUM_ROWS, N), np.float32)
    state0_np[ROW_SOMA, :] = v_reset
    state0_np[ROW_APICAL, :] = v_reset
    state0_np[ROW_THR, :] = threshold
    state0 = jnp.asarray(state0_np)

    # torch.randn drawn inside Syn.forward -> pre-sampled deterministically here
    # (bf16 to halve the streamed bytes; kernel and reference read identical values).
    noise_seq = jax.random.normal(k_noise, (T, 1, N), jnp.float32).astype(jnp.bfloat16)

    run = jax.jit(functools.partial(brain_run, dt=dt, ts=TS))
    I_seq, state_final = run(W_T_bf16, state0, noise_seq)
    jax.block_until_ready((I_seq, state_final))

    # Sanity-check against the pure-JAX reference (same bf16 matvec math).
    I_ref, state_ref = brain_reference(W_T_bf16, state0, noise_seq, dt=dt)
    np.testing.assert_allclose(np.asarray(I_seq), np.asarray(I_ref),
                               rtol=1e-3, atol=1e-3)
    np.testing.assert_allclose(np.asarray(state_final), np.asarray(state_ref),
                               rtol=1e-3, atol=1e-3)

    print("KERNEL_OK")
</pallas_src>

<mosaic_0001>
module attributes {stable_mosaic.version = 11 : i64} {
  func.func @kernel(%arg0: i32, %arg1: memref<256x256xbf16, #tpu.memory_space<vmem>>, %arg2: memref<8x256xf32, #tpu.memory_space<vmem>>, %arg3: memref<16x1x256xbf16, #tpu.memory_space<vmem>>, %arg4: memref<16x1x256xf32, #tpu.memory_space<vmem>>, %arg5: memref<8x256xf32, #tpu.memory_space<vmem>>) attributes {dimension_semantics = [#tpu.dimension_semantics<arbitrary>], iteration_bounds = array<i64: 4>, scalar_prefetch = 0 : i64, scratch_operands = 0 : i64, tpu.core_type = #tpu.core_type<tc>, window_params = [{pipeline_mode = #tpu.pipeline_mode<synchronous>, transform_indices = @transform_0, window_bounds = array<i64: 256, 256>}, {pipeline_mode = #tpu.pipeline_mode<synchronous>, transform_indices = @transform_1, window_bounds = array<i64: 8, 256>}, {transform_indices = @transform_2, window_bounds = array<i64: 16, 1, 256>}, {transform_indices = @transform_3, window_bounds = array<i64: 16, 1, 256>}, {pipeline_mode = #tpu.pipeline_mode<synchronous>, transform_indices = @transform_4, window_bounds = array<i64: 8, 256>}]} {
    %c0_i32 = arith.constant 0 : i32
    %0 = arith.cmpi eq, %arg0, %c0_i32 : i32
    %1 = arith.extui %0 : i1 to i32
    %c0_i32_0 = arith.constant 0 : i32
    %2 = arith.cmpi ne, %1, %c0_i32_0 : i32
    scf.if %2 {
      %c0_292 = arith.constant 0 : index
      %c0_293 = arith.constant 0 : index
      %752 = vector.load %arg2[%c0_292, %c0_293] : memref<8x256xf32, #tpu.memory_space<vmem>>, vector<8x256xf32>
      %c0_294 = arith.constant 0 : index
      %c0_295 = arith.constant 0 : index
      %753 = vector.load %arg5[%c0_294, %c0_295] : memref<8x256xf32, #tpu.memory_space<vmem>>, vector<8x256xf32>
      tpu.vector_store %arg5[%c0_294, %c0_295], %752 {strides = array<i32>} : memref<8x256xf32, #tpu.memory_space<vmem>>, vector<8x256xf32>,
    } else {
    }
    %c0 = arith.constant 0 : index
    %c0_1 = arith.constant 0 : index
    %3 = vector.load %arg5[%c0, %c0_1] : memref<8x256xf32, #tpu.memory_space<vmem>>, vector<1x256xf32>
    %c1 = arith.constant 1 : index
    %c0_2 = arith.constant 0 : index
    %4 = vector.load %arg5[%c1, %c0_2] : memref<8x256xf32, #tpu.memory_space<vmem>>, vector<1x256xf32>
    %c2 = arith.constant 2 : index
    %c0_3 = arith.constant 0 : index
    %5 = vector.load %arg5[%c2, %c0_3] : memref<8x256xf32, #tpu.memory_space<vmem>>, vector<1x256xf32>
    %c3 = arith.constant 3 : index
    %c0_4 = arith.constant 0 : index
    %6 = vector.load %arg5[%c3, %c0_4] : memref<8x256xf32, #tpu.memory_space<vmem>>, vector<1x256xf32>
    %c4 = arith.constant 4 : index
    %c0_5 = arith.constant 0 : index
    %7 = vector.load %arg5[%c4, %c0_5] : memref<8x256xf32, #tpu.memory_space<vmem>>, vector<1x256xf32>
    %c5 = arith.constant 5 : index
    %c0_6 = arith.constant 0 : index
    %8 = vector.load %arg5[%c5, %c0_6] : memref<8x256xf32, #tpu.memory_space<vmem>>, vector<1x256xf32>
    %c6 = arith.constant 6 : index
    %c0_7 = arith.constant 0 : index
    %9 = vector.load %arg5[%c6, %c0_7] : memref<8x256xf32, #tpu.memory_space<vmem>>, vector<1x256xf32>
    %c0_i32_8 = arith.constant 0 : i32
    %10 = arith.index_cast %c0_i32_8 : i32 to index
    %c0_9 = arith.constant 0 : index
    %c0_10 = arith.constant 0 : index
    %11 = vector.load %arg3[%10, %c0_9, %c0_10] : memref<16x1x256xbf16, #tpu.memory_space<vmem>>, vector<1x1x256xbf16>
    %12 = vector.shape_cast %11 : vector<1x1x256xbf16> to vector<1x256xbf16>
    %13 = arith.extf %12 : vector<1x256xbf16> to vector<1x256xf32>
    %14 = arith.subf %13, %6 : vector<1x256xf32>
    %cst = arith.constant 0.0333333351 : f32
    %15 = vector.broadcast %cst : f32 to vector<1x256xf32>
    %16 = arith.mulf %15, %14 : vector<1x256xf32>
    %17 = arith.addf %6, %16 : vector<1x256xf32>
    %cst_11 = arith.constant 92.9515991 : f32
    %18 = vector.broadcast %cst_11 : f32 to vector<1x256xf32>
    %19 = arith.mulf %17, %18 : vector<1x256xf32>
    %cst_12 = arith.constant 1.000000e+01 : f32
    %20 = vector.broadcast %cst_12 : f32 to vector<1x256xf32>
    %21 = arith.addf %19, %20 : vector<1x256xf32>
    %cst_13 = arith.constant 0.333333343 : f32
    %22 = vector.broadcast %cst_13 : f32 to vector<1x256xf32>
    %23 = arith.mulf %22, %3 : vector<1x256xf32>
    %24 = arith.subf %23, %4 : vector<1x256xf32>
    %cst_14 = arith.constant 0.0166666675 : f32
    %25 = vector.broadcast %cst_14 : f32 to vector<1x256xf32>
    %26 = arith.mulf %25, %24 : vector<1x256xf32>
    %27 = arith.addf %4, %26 : vector<1x256xf32>
    %cst_15 = arith.constant 0.0333333351 : f32
    %28 = vector.broadcast %cst_15 : f32 to vector<1x256xf32>
    %29 = arith.mulf %28, %5 : vector<1x256xf32>
    %30 = arith.subf %5, %29 : vector<1x256xf32>
    %cst_16 = arith.constant 1.000000e-01 : f32
    %31 = vector.broadcast %cst_16 : f32 to vector<1x256xf32>
    %32 = arith.mulf %31, %27 : vector<1x256xf32>
    %33 = arith.addf %30, %32 : vector<1x256xf32>
    %34 = arith.truncf %33 : vector<1x256xf32> to vector<1x256xbf16>
    %c0_17 = arith.constant 0 : index
    %c0_18 = arith.constant 0 : index
    %35 = vector.load %arg1[%c0_17, %c0_18] : memref<256x256xbf16, #tpu.memory_space<vmem>>, vector<256x256xbf16>
    %cst_19 = arith.constant dense<0.000000e+00> : vector<1x256xf32>
    %36 = tpu.matmul %34, %35, %cst_19 {dimension_numbers = #tpu.dot_dimension_numbers<[1], [0], [0], [1], [0, 0, 1, 1], [], []>} : vector<1x256xbf16>, vector<256x256xbf16>, vector<1x256xf32> -> vector<1x256xf32>
    %37 = arith.addf %36, %21 : vector<1x256xf32>
    %38 = arith.addf %8, %37 : vector<1x256xf32>
    %cst_20 = arith.constant 5.000000e-01 : f32
    %39 = vector.broadcast %cst_20 : f32 to vector<1x256xf32>
    %40 = arith.mulf %38, %39 : vector<1x256xf32>
    %41 = arith.subf %40, %7 : vector<1x256xf32>
    %cst_21 = arith.constant 5.000000e-01 : f32
    %42 = vector.broadcast %cst_21 : f32 to vector<1x256xf32>
    %43 = arith.mulf %41, %42 : vector<1x256xf32>
    %44 = arith.addf %7, %43 : vector<1x256xf32>
    %45 = arith.cmpf ogt, %44, %9 : vector<1x256xf32>
    %46 = arith.extui %45 : vector<1x256xi1> to vector<1x256xi32>
    %47 = arith.sitofp %46 : vector<1x256xi32> to vector<1x256xf32>
    %cst_22 = arith.constant 1.000000e+00 : f32
    %48 = vector.broadcast %cst_22 : f32 to vector<1x256xf32>
    %49 = arith.subf %48, %47 : vector<1x256xf32>
    %50 = arith.mulf %44, %49 : vector<1x256xf32>
    %51 = arith.mulf %40, %49 : vector<1x256xf32>
    %52 = arith.index_cast %c0_i32_8 : i32 to index
    %c0_23 = arith.constant 0 : index
    %c0_24 = arith.constant 0 : index
    %53 = vector.load %arg4[%52, %c0_23, %c0_24] : memref<16x1x256xf32, #tpu.memory_space<vmem>>, vector<1x1x256xf32>
    %54 = vector.shape_cast %53 : vector<1x1x256xf32> to vector<1x256xf32>
    %55 = vector.shape_cast %37 : vector<1x256xf32> to vector<1x1x256xf32>
    tpu.vector_store %arg4[%52, %c0_23, %c0_24], %55 {strides = array<i32>} : memref<16x1x256xf32, #tpu.memory_space<vmem>>, vector<1x1x256xf32>,
    %c1_i32 = arith.constant 1 : i32
    %56 = arith.index_cast %c1_i32 : i32 to index
    %c0_25 = arith.constant 0 : index
    %c0_26 = arith.constant 0 : index
    %57 = vector.load %arg3[%56, %c0_25, %c0_26] : memref<16x1x256xbf16, #tpu.memory_space<vmem>>, vector<1x1x256xbf16>
    %58 = vector.shape_cast %57 : vector<1x1x256xbf16> to vector<1x256xbf16>
    %59 = arith.extf %58 : vector<1x256xbf16> to vector<1x256xf32>
    %60 = arith.subf %59, %17 : vector<1x256xf32>
    %cst_27 = arith.constant 0.0333333351 : f32
    %61 = vector.broadcast %cst_27 : f32 to vector<1x256xf32>
    %62 = arith.mulf %61, %60 : vector<1x256xf32>
    %63 = arith.addf %17, %62 : vector<1x256xf32>
    %cst_28 = arith.constant 92.9515991 : f32
    %64 = vector.broadcast %cst_28 : f32 to vector<1x256xf32>
    %65 = arith.mulf %63, %64 : vector<1x256xf32>
    %cst_29 = arith.constant 1.000000e+01 : f32
    %66 = vector.broadcast %cst_29 : f32 to vector<1x256xf32>
    %67 = arith.addf %65, %66 : vector<1x256xf32>
    %cst_30 = arith.constant 0.333333343 : f32
    %68 = vector.broadcast %cst_30 : f32 to vector<1x256xf32>
    %69 = arith.mulf %68, %47 : vector<1x256xf32>
    %70 = arith.subf %69, %27 : vector<1x256xf32>
    %cst_31 = arith.constant 0.0166666675 : f32
    %71 = vector.broadcast %cst_31 : f32 to vector<1x256xf32>
    %72 = arith.mulf %71, %70 : vector<1x256xf32>
    %73 = arith.addf %27, %72 : vector<1x256xf32>
    %cst_32 = arith.constant 0.0333333351 : f32
    %74 = vector.broadcast %cst_32 : f32 to vector<1x256xf32>
    %75 = arith.mulf %74, %33 : vector<1x256xf32>
    %76 = arith.subf %33, %75 : vector<1x256xf32>
    %cst_33 = arith.constant 1.000000e-01 : f32
    %77 = vector.broadcast %cst_33 : f32 to vector<1x256xf32>
    %78 = arith.mulf %77, %73 : vector<1x256xf32>
    %79 = arith.addf %76, %78 : vector<1x256xf32>
    %80 = arith.truncf %79 : vector<1x256xf32> to vector<1x256xbf16>
    %c0_34 = arith.constant 0 : index
    %c0_35 = arith.constant 0 : index
    %81 = vector.load %arg1[%c0_34, %c0_35] : memref<256x256xbf16, #tpu.memory_space<vmem>>, vector<256x256xbf16>
    %cst_36 = arith.constant dense<0.000000e+00> : vector<1x256xf32>
    %82 = tpu.matmul %80, %81, %cst_36 {dimension_numbers = #tpu.dot_dimension_numbers<[1], [0], [0], [1], [0, 0, 1, 1], [], []>} : vector<1x256xbf16>, vector<256x256xbf16>, vector<1x256xf32> -> vector<1x256xf32>
    %83 = arith.addf %82, %67 : vector<1x256xf32>
    %84 = arith.addf %51, %83 : vector<1x256xf32>
    %cst_37 = arith.constant 5.000000e-01 : f32
    %85 = vector.broadcast %cst_37 : f32 to vector<1x256xf32>
    %86 = arith.mulf %84, %85 : vector<1x256xf32>
    %87 = arith.subf %86, %50 : vector<1x256xf32>
    %cst_38 = arith.constant 5.000000e-01 : f32
    %88 = vector.broadcast %cst_38 : f32 to vector<1x256xf32>
    %89 = arith.mulf %87, %88 : vector<1x256xf32>
    %90 = arith.addf %50, %89 : vector<1x256xf32>
    %91 = arith.cmpf ogt, %90, %9 : vector<1x256xf32>
    %92 = arith.extui %91 : vector<1x256xi1> to vector<1x256xi32>
    %93 = arith.sitofp %92 : vector<1x256xi32> to vector<1x256xf32>
    %cst_39 = arith.constant 1.000000e+00 : f32
    %94 = vector.broadcast %cst_39 : f32 to vector<1x256xf32>
    %95 = arith.subf %94, %93 : vector<1x256xf32>
    %96 = arith.mulf %90, %95 : vector<1x256xf32>
    %97 = arith.mulf %86, %95 : vector<1x256xf32>
    %98 = arith.index_cast %c1_i32 : i32 to index
    %c0_40 = arith.constant 0 : index
    %c0_41 = arith.constant 0 : index
    %99 = vector.load %arg4[%98, %c0_40, %c0_41] : memref<16x1x256xf32, #tpu.memory_space<vmem>>, vector<1x1x256xf32>
    %100 = vector.shape_cast %99 : vector<1x1x256xf32> to vector<1x256xf32>
    %101 = vector.shape_cast %83 : vector<1x256xf32> to vector<1x1x256xf32>
    tpu.vector_store %arg4[%98, %c0_40, %c0_41], %101 {strides = array<i32>} : memref<16x1x256xf32, #tpu.memory_space<vmem>>, vector<1x1x256xf32>,
    %c2_i32 = arith.constant 2 : i32
    %102 = arith.index_cast %c2_i32 : i32 to index
    %c0_42 = arith.constant 0 : index
    %c0_43 = arith.constant 0 : index
    %103 = vector.load %arg3[%102, %c0_42, %c0_43] : memref<16x1x256xbf16, #tpu.memory_space<vmem>>, vector<1x1x256xbf16>
    %104 = vector.shape_cast %103 : vector<1x1x256xbf16> to vector<1x256xbf16>
    %105 = arith.extf %104 : vector<1x256xbf16> to vector<1x256xf32>
    %106 = arith.subf %105, %63 : vector<1x256xf32>
    %cst_44 = arith.constant 0.0333333351 : f32
    %107 = vector.broadcast %cst_44 : f32 to vector<1x256xf32>
    %108 = arith.mulf %107, %106 : vector<1x256xf32>
    %109 = arith.addf %63, %108 : vector<1x256xf32>
    %cst_45 = arith.constant 92.9515991 : f32
    %110 = vector.broadcast %cst_45 : f32 to vector<1x256xf32>
    %111 = arith.mulf %109, %110 : vector<1x256xf32>
    %cst_46 = arith.constant 1.000000e+01 : f32
    %112 = vector.broadcast %cst_46 : f32 to vector<1x256xf32>
    %113 = arith.addf %111, %112 : vector<1x256xf32>
    %cst_47 = arith.constant 0.333333343 : f32
    %114 = vector.broadcast %cst_47 : f32 to vector<1x256xf32>
    %115 = arith.mulf %114, %93 : vector<1x256xf32>
    %116 = arith.subf %115, %73 : vector<1x256xf32>
    %cst_48 = arith.constant 0.0166666675 : f32
    %117 = vector.broadcast %cst_48 : f32 to vector<1x256xf32>
    %118 = arith.mulf %117, %116 : vector<1x256xf32>
    %119 = arith.addf %73, %118 : vector<1x256xf32>
    %cst_49 = arith.constant 0.0333333351 : f32
    %120 = vector.broadcast %cst_49 : f32 to vector<1x256xf32>
    %121 = arith.mulf %120, %79 : vector<1x256xf32>
    %122 = arith.subf %79, %121 : vector<1x256xf32>
    %cst_50 = arith.constant 1.000000e-01 : f32
    %123 = vector.broadcast %cst_50 : f32 to vector<1x256xf32>
    %124 = arith.mulf %123, %119 : vector<1x256xf32>
    %125 = arith.addf %122, %124 : vector<1x256xf32>
    %126 = arith.truncf %125 : vector<1x256xf32> to vector<1x256xbf16>
    %c0_51 = arith.constant 0 : index
    %c0_52 = arith.constant 0 : index
    %127 = vector.load %arg1[%c0_51, %c0_52] : memref<256x256xbf16, #tpu.memory_space<vmem>>, vector<256x256xbf16>
    %cst_53 = arith.constant dense<0.000000e+00> : vector<1x256xf32>
    %128 = tpu.matmul %126, %127, %cst_53 {dimension_numbers = #tpu.dot_dimension_numbers<[1], [0], [0], [1], [0, 0, 1, 1], [], []>} : vector<1x256xbf16>, vector<256x256xbf16>, vector<1x256xf32> -> vector<1x256xf32>
    %129 = arith.addf %128, %113 : vector<1x256xf32>
    %130 = arith.addf %97, %129 : vector<1x256xf32>
    %cst_54 = arith.constant 5.000000e-01 : f32
    %131 = vector.broadcast %cst_54 : f32 to vector<1x256xf32>
    %132 = arith.mulf %130, %131 : vector<1x256xf32>
    %133 = arith.subf %132, %96 : vector<1x256xf32>
    %cst_55 = arith.constant 5.000000e-01 : f32
    %134 = vector.broadcast %cst_55 : f32 to vector<1x256xf32>
    %135 = arith.mulf %133, %134 : vector<1x256xf32>
    %136 = arith.addf %96, %135 : vector<1x256xf32>
    %137 = arith.cmpf ogt, %136, %9 : vector<1x256xf32>
    %138 = arith.extui %137 : vector<1x256xi1> to vector<1x256xi32>
    %139 = arith.sitofp %138 : vector<1x256xi32> to vector<1x256xf32>
    %cst_56 = arith.constant 1.000000e+00 : f32
    %140 = vector.broadcast %cst_56 : f32 to vector<1x256xf32>
    %141 = arith.subf %140, %139 : vector<1x256xf32>
    %142 = arith.mulf %136, %141 : vector<1x256xf32>
    %143 = arith.mulf %132, %141 : vector<1x256xf32>
    %144 = arith.index_cast %c2_i32 : i32 to index
    %c0_57 = arith.constant 0 : index
    %c0_58 = arith.constant 0 : index
    %145 = vector.load %arg4[%144, %c0_57, %c0_58] : memref<16x1x256xf32, #tpu.memory_space<vmem>>, vector<1x1x256xf32>
    %146 = vector.shape_cast %145 : vector<1x1x256xf32> to vector<1x256xf32>
    %147 = vector.shape_cast %129 : vector<1x256xf32> to vector<1x1x256xf32>
    tpu.vector_store %arg4[%144, %c0_57, %c0_58], %147 {strides = array<i32>} : memref<16x1x256xf32, #tpu.memory_space<vmem>>, vector<1x1x256xf32>,
    %c3_i32 = arith.constant 3 : i32
    %148 = arith.index_cast %c3_i32 : i32 to index
    %c0_59 = arith.constant 0 : index
    %c0_60 = arith.constant 0 : index
    %149 = vector.load %arg3[%148, %c0_59, %c0_60] : memref<16x1x256xbf16, #tpu.memory_space<vmem>>, vector<1x1x256xbf16>
    %150 = vector.shape_cast %149 : vector<1x1x256xbf16> to vector<1x256xbf16>
    %151 = arith.extf %150 : vector<1x256xbf16> to vector<1x256xf32>
    %152 = arith.subf %151, %109 : vector<1x256xf32>
    %cst_61 = arith.constant 0.0333333351 : f32
    %153 = vector.broadcast %cst_61 : f32 to vector<1x256xf32>
    %154 = arith.mulf %153, %152 : vector<1x256xf32>
    %155 = arith.addf %109, %154 : vector<1x256xf32>
    %cst_62 = arith.constant 92.9515991 : f32
    %156 = vector.broadcast %cst_62 : f32 to vector<1x256xf32>
    %157 = arith.mulf %155, %156 : vector<1x256xf32>
    %cst_63 = arith.constant 1.000000e+01 : f32
    %158 = vector.broadcast %cst_63 : f32 to vector<1x256xf32>
    %159 = arith.addf %157, %158 : vector<1x256xf32>
    %cst_64 = arith.constant 0.333333343 : f32
    %160 = vector.broadcast %cst_64 : f32 to vector<1x256xf32>
    %161 = arith.mulf %160, %139 : vector<1x256xf32>
    %162 = arith.subf %161, %119 : vector<1x256xf32>
    %cst_65 = arith.constant 0.0166666675 : f32
    %163 = vector.broadcast %cst_65 : f32 to vector<1x256xf32>
    %164 = arith.mulf %163, %162 : vector<1x256xf32>
    %165 = arith.addf %119, %164 : vector<1x256xf32>
    %cst_66 = arith.constant 0.0333333351 : f32
    %166 = vector.broadcast %cst_66 : f32 to vector<1x256xf32>
    %167 = arith.mulf %166, %125 : vector<1x256xf32>
    %168 = arith.subf %125, %167 : vector<1x256xf32>
    %cst_67 = arith.constant 1.000000e-01 : f32
    %169 = vector.broadcast %cst_67 : f32 to vector<1x256xf32>
    %170 = arith.mulf %169, %165 : vector<1x256xf32>
    %171 = arith.addf %168, %170 : vector<1x256xf32>
    %172 = arith.truncf %171 : vector<1x256xf32> to vector<1x256xbf16>
    %c0_68 = arith.constant 0 : index
    %c0_69 = arith.constant 0 : index
    %173 = vector.load %arg1[%c0_68, %c0_69] : memref<256x256xbf16, #tpu.memory_space<vmem>>, vector<256x256xbf16>
    %cst_70 = arith.constant dense<0.000000e+00> : vector<1x256xf32>
    %174 = tpu.matmul %172, %173, %cst_70 {dimension_numbers = #tpu.dot_dimension_numbers<[1], [0], [0], [1], [0, 0, 1, 1], [], []>} : vector<1x256xbf16>, vector<256x256xbf16>, vector<1x256xf32> -> vector<1x256xf32>
    %175 = arith.addf %174, %159 : vector<1x256xf32>
    %176 = arith.addf %143, %175 : vector<1x256xf32>
    %cst_71 = arith.constant 5.000000e-01 : f32
    %177 = vector.broadcast %cst_71 : f32 to vector<1x256xf32>
    %178 = arith.mulf %176, %177 : vector<1x256xf32>
    %179 = arith.subf %178, %142 : vector<1x256xf32>
    %cst_72 = arith.constant 5.000000e-01 : f32
    %180 = vector.broadcast %cst_72 : f32 to vector<1x256xf32>
    %181 = arith.mulf %179, %180 : vector<1x256xf32>
    %182 = arith.addf %142, %181 : vector<1x256xf32>
    %183 = arith.cmpf ogt, %182, %9 : vector<1x256xf32>
    %184 = arith.extui %183 : vector<1x256xi1> to vector<1x256xi32>
    %185 = arith.sitofp %184 : vector<1x256xi32> to vector<1x256xf32>
    %cst_73 = arith.constant 1.000000e+00 : f32
    %186 = vector.broadcast %cst_73 : f32 to vector<1x256xf32>
    %187 = arith.subf %186, %185 : vector<1x256xf32>
    %188 = arith.mulf %182, %187 : vector<1x256xf32>
    %189 = arith.mulf %178, %187 : vector<1x256xf32>
    %190 = arith.index_cast %c3_i32 : i32 to index
    %c0_74 = arith.constant 0 : index
    %c0_75 = arith.constant 0 : index
    %191 = vector.load %arg4[%190, %c0_74, %c0_75] : memref<16x1x256xf32, #tpu.memory_space<vmem>>, vector<1x1x256xf32>
    %192 = vector.shape_cast %191 : vector<1x1x256xf32> to vector<1x256xf32>
    %193 = vector.shape_cast %175 : vector<1x256xf32> to vector<1x1x256xf32>
    tpu.vector_store %arg4[%190, %c0_74, %c0_75], %193 {strides = array<i32>} : memref<16x1x256xf32, #tpu.memory_space<vmem>>, vector<1x1x256xf32>,
    %c4_i32 = arith.constant 4 : i32
    %194 = arith.index_cast %c4_i32 : i32 to index
    %c0_76 = arith.constant 0 : index
    %c0_77 = arith.constant 0 : index
    %195 = vector.load %arg3[%194, %c0_76, %c0_77] : memref<16x1x256xbf16, #tpu.memory_space<vmem>>, vector<1x1x256xbf16>
    %196 = vector.shape_cast %195 : vector<1x1x256xbf16> to vector<1x256xbf16>
    %197 = arith.extf %196 : vector<1x256xbf16> to vector<1x256xf32>
    %198 = arith.subf %197, %155 : vector<1x256xf32>
    %cst_78 = arith.constant 0.0333333351 : f32
    %199 = vector.broadcast %cst_78 : f32 to vector<1x256xf32>
    %200 = arith.mulf %199, %198 : vector<1x256xf32>
    %201 = arith.addf %155, %200 : vector<1x256xf32>
    %cst_79 = arith.constant 92.9515991 : f32
    %202 = vector.broadcast %cst_79 : f32 to vector<1x256xf32>
    %203 = arith.mulf %201, %202 : vector<1x256xf32>
    %cst_80 = arith.constant 1.000000e+01 : f32
    %204 = vector.broadcast %cst_80 : f32 to vector<1x256xf32>
    %205 = arith.addf %203, %204 : vector<1x256xf32>
    %cst_81 = arith.constant 0.333333343 : f32
    %206 = vector.broadcast %cst_81 : f32 to vector<1x256xf32>
    %207 = arith.mulf %206, %185 : vector<1x256xf32>
    %208 = arith.subf %207, %165 : vector<1x256xf32>
    %cst_82 = arith.constant 0.0166666675 : f32
    %209 = vector.broadcast %cst_82 : f32 to vector<1x256xf32>
    %210 = arith.mulf %209, %208 : vector<1x256xf32>
    %211 = arith.addf %165, %210 : vector<1x256xf32>
    %cst_83 = arith.constant 0.0333333351 : f32
    %212 = vector.broadcast %cst_83 : f32 to vector<1x256xf32>
    %213 = arith.mulf %212, %171 : vector<1x256xf32>
    %214 = arith.subf %171, %213 : vector<1x256xf32>
    %cst_84 = arith.constant 1.000000e-01 : f32
    %215 = vector.broadcast %cst_84 : f32 to vector<1x256xf32>
    %216 = arith.mulf %215, %211 : vector<1x256xf32>
    %217 = arith.addf %214, %216 : vector<1x256xf32>
    %218 = arith.truncf %217 : vector<1x256xf32> to vector<1x256xbf16>
    %c0_85 = arith.constant 0 : index
    %c0_86 = arith.constant 0 : index
    %219 = vector.load %arg1[%c0_85, %c0_86] : memref<256x256xbf16, #tpu.memory_space<vmem>>, vector<256x256xbf16>
    %cst_87 = arith.constant dense<0.000000e+00> : vector<1x256xf32>
    %220 = tpu.matmul %218, %219, %cst_87 {dimension_numbers = #tpu.dot_dimension_numbers<[1], [0], [0], [1], [0, 0, 1, 1], [], []>} : vector<1x256xbf16>, vector<256x256xbf16>, vector<1x256xf32> -> vector<1x256xf32>
    %221 = arith.addf %220, %205 : vector<1x256xf32>
    %222 = arith.addf %189, %221 : vector<1x256xf32>
    %cst_88 = arith.constant 5.000000e-01 : f32
    %223 = vector.broadcast %cst_88 : f32 to vector<1x256xf32>
    %224 = arith.mulf %222, %223 : vector<1x256xf32>
    %225 = arith.subf %224, %188 : vector<1x256xf32>
    %cst_89 = arith.constant 5.000000e-01 : f32
    %226 = vector.broadcast %cst_89 : f32 to vector<1x256xf32>
    %227 = arith.mulf %225, %226 : vector<1x256xf32>
    %228 = arith.addf %188, %227 : vector<1x256xf32>
    %229 = arith.cmpf ogt, %228, %9 : vector<1x256xf32>
    %230 = arith.extui %229 : vector<1x256xi1> to vector<1x256xi32>
    %231 = arith.sitofp %230 : vector<1x256xi32> to vector<1x256xf32>
    %cst_90 = arith.constant 1.000000e+00 : f32
    %232 = vector.broadcast %cst_90 : f32 to vector<1x256xf32>
    %233 = arith.subf %232, %231 : vector<1x256xf32>
    %234 = arith.mulf %228, %233 : vector<1x256xf32>
    %235 = arith.mulf %224, %233 : vector<1x256xf32>
    %236 = arith.index_cast %c4_i32 : i32 to index
    %c0_91 = arith.constant 0 : index
    %c0_92 = arith.constant 0 : index
    %237 = vector.load %arg4[%236, %c0_91, %c0_92] : memref<16x1x256xf32, #tpu.memory_space<vmem>>, vector<1x1x256xf32>
    %238 = vector.shape_cast %237 : vector<1x1x256xf32> to vector<1x256xf32>
    %239 = vector.shape_cast %221 : vector<1x256xf32> to vector<1x1x256xf32>
    tpu.vector_store %arg4[%236, %c0_91, %c0_92], %239 {strides = array<i32>} : memref<16x1x256xf32, #tpu.memory_space<vmem>>, vector<1x1x256xf32>,
    %c5_i32 = arith.constant 5 : i32
    %240 = arith.index_cast %c5_i32 : i32 to index
    %c0_93 = arith.constant 0 : index
    %c0_94 = arith.constant 0 : index
    %241 = vector.load %arg3[%240, %c0_93, %c0_94] : memref<16x1x256xbf16, #tpu.memory_space<vmem>>, vector<1x1x256xbf16>
    %242 = vector.shape_cast %241 : vector<1x1x256xbf16> to vector<1x256xbf16>
    %243 = arith.extf %242 : vector<1x256xbf16> to vector<1x256xf32>
    %244 = arith.subf %243, %201 : vector<1x256xf32>
    %cst_95 = arith.constant 0.0333333351 : f32
    %245 = vector.broadcast %cst_95 : f32 to vector<1x256xf32>
    %246 = arith.mulf %245, %244 : vector<1x256xf32>
    %247 = arith.addf %201, %246 : vector<1x256xf32>
    %cst_96 = arith.constant 92.9515991 : f32
    %248 = vector.broadcast %cst_96 : f32 to vector<1x256xf32>
    %249 = arith.mulf %247, %248 : vector<1x256xf32>
    %cst_97 = arith.constant 1.000000e+01 : f32
    %250 = vector.broadcast %cst_97 : f32 to vector<1x256xf32>
    %251 = arith.addf %249, %250 : vector<1x256xf32>
    %cst_98 = arith.constant 0.333333343 : f32
    %252 = vector.broadcast %cst_98 : f32 to vector<1x256xf32>
    %253 = arith.mulf %252, %231 : vector<1x256xf32>
    %254 = arith.subf %253, %211 : vector<1x256xf32>
    %cst_99 = arith.constant 0.0166666675 : f32
    %255 = vector.broadcast %cst_99 : f32 to vector<1x256xf32>
    %256 = arith.mulf %255, %254 : vector<1x256xf32>
    %257 = arith.addf %211, %256 : vector<1x256xf32>
    %cst_100 = arith.constant 0.0333333351 : f32
    %258 = vector.broadcast %cst_100 : f32 to vector<1x256xf32>
    %259 = arith.mulf %258, %217 : vector<1x256xf32>
    %260 = arith.subf %217, %259 : vector<1x256xf32>
    %cst_101 = arith.constant 1.000000e-01 : f32
    %261 = vector.broadcast %cst_101 : f32 to vector<1x256xf32>
    %262 = arith.mulf %261, %257 : vector<1x256xf32>
    %263 = arith.addf %260, %262 : vector<1x256xf32>
    %264 = arith.truncf %263 : vector<1x256xf32> to vector<1x256xbf16>
    %c0_102 = arith.constant 0 : index
    %c0_103 = arith.constant 0 : index
    %265 = vector.load %arg1[%c0_102, %c0_103] : memref<256x256xbf16, #tpu.memory_space<vmem>>, vector<256x256xbf16>
    %cst_104 = arith.constant dense<0.000000e+00> : vector<1x256xf32>
    %266 = tpu.matmul %264, %265, %cst_104 {dimension_numbers = #tpu.dot_dimension_numbers<[1], [0], [0], [1], [0, 0, 1, 1], [], []>} : vector<1x256xbf16>, vector<256x256xbf16>, vector<1x256xf32> -> vector<1x256xf32>
    %267 = arith.addf %266, %251 : vector<1x256xf32>
    %268 = arith.addf %235, %267 : vector<1x256xf32>
    %cst_105 = arith.constant 5.000000e-01 : f32
    %269 = vector.broadcast %cst_105 : f32 to vector<1x256xf32>
    %270 = arith.mulf %268, %269 : vector<1x256xf32>
    %271 = arith.subf %270, %234 : vector<1x256xf32>
    %cst_106 = arith.constant 5.000000e-01 : f32
    %272 = vector.broadcast %cst_106 : f32 to vector<1x256xf32>
    %273 = arith.mulf %271, %272 : vector<1x256xf32>
    %274 = arith.addf %234, %273 : vector<1x256xf32>
    %275 = arith.cmpf ogt, %274, %9 : vector<1x256xf32>
    %276 = arith.extui %275 : vector<1x256xi1> to vector<1x256xi32>
    %277 = arith.sitofp %276 : vector<1x256xi32> to vector<1x256xf32>
    %cst_107 = arith.constant 1.000000e+00 : f32
    %278 = vector.broadcast %cst_107 : f32 to vector<1x256xf32>
    %279 = arith.subf %278, %277 : vector<1x256xf32>
    %280 = arith.mulf %274, %279 : vector<1x256xf32>
    %281 = arith.mulf %270, %279 : vector<1x256xf32>
    %282 = arith.index_cast %c5_i32 : i32 to index
    %c0_108 = arith.constant 0 : index
    %c0_109 = arith.constant 0 : index
    %283 = vector.load %arg4[%282, %c0_108, %c0_109] : memref<16x1x256xf32, #tpu.memory_space<vmem>>, vector<1x1x256xf32>
    %284 = vector.shape_cast %283 : vector<1x1x256xf32> to vector<1x256xf32>
    %285 = vector.shape_cast %267 : vector<1x256xf32> to vector<1x1x256xf32>
    tpu.vector_store %arg4[%282, %c0_108, %c0_109], %285 {strides = array<i32>} : memref<16x1x256xf32, #tpu.memory_space<vmem>>, vector<1x1x256xf32>,
    %c6_i32 = arith.constant 6 : i32
    %286 = arith.index_cast %c6_i32 : i32 to index
    %c0_110 = arith.constant 0 : index
    %c0_111 = arith.constant 0 : index
    %287 = vector.load %arg3[%286, %c0_110, %c0_111] : memref<16x1x256xbf16, #tpu.memory_space<vmem>>, vector<1x1x256xbf16>
    %288 = vector.shape_cast %287 : vector<1x1x256xbf16> to vector<1x256xbf16>
    %289 = arith.extf %288 : vector<1x256xbf16> to vector<1x256xf32>
    %290 = arith.subf %289, %247 : vector<1x256xf32>
    %cst_112 = arith.constant 0.0333333351 : f32
    %291 = vector.broadcast %cst_112 : f32 to vector<1x256xf32>
    %292 = arith.mulf %291, %290 : vector<1x256xf32>
    %293 = arith.addf %247, %292 : vector<1x256xf32>
    %cst_113 = arith.constant 92.9515991 : f32
    %294 = vector.broadcast %cst_113 : f32 to vector<1x256xf32>
    %295 = arith.mulf %293, %294 : vector<1x256xf32>
    %cst_114 = arith.constant 1.000000e+01 : f32
    %296 = vector.broadcast %cst_114 : f32 to vector<1x256xf32>
    %297 = arith.addf %295, %296 : vector<1x256xf32>
    %cst_115 = arith.constant 0.333333343 : f32
    %298 = vector.broadcast %cst_115 : f32 to vector<1x256xf32>
    %299 = arith.mulf %298, %277 : vector<1x256xf32>
    %300 = arith.subf %299, %257 : vector<1x256xf32>
    %cst_116 = arith.constant 0.0166666675 : f32
    %301 = vector.broadcast %cst_116 : f32 to vector<1x256xf32>
    %302 = arith.mulf %301, %300 : vector<1x256xf32>
    %303 = arith.addf %257, %302 : vector<1x256xf32>
    %cst_117 = arith.constant 0.0333333351 : f32
    %304 = vector.broadcast %cst_117 : f32 to vector<1x256xf32>
    %305 = arith.mulf %304, %263 : vector<1x256xf32>
    %306 = arith.subf %263, %305 : vector<1x256xf32>
    %cst_118 = arith.constant 1.000000e-01 : f32
    %307 = vector.broadcast %cst_118 : f32 to vector<1x256xf32>
    %308 = arith.mulf %307, %303 : vector<1x256xf32>
    %309 = arith.addf %306, %308 : vector<1x256xf32>
    %310 = arith.truncf %309 : vector<1x256xf32> to vector<1x256xbf16>
    %c0_119 = arith.constant 0 : index
    %c0_120 = arith.constant 0 : index
    %311 = vector.load %arg1[%c0_119, %c0_120] : memref<256x256xbf16, #tpu.memory_space<vmem>>, vector<256x256xbf16>
    %cst_121 = arith.constant dense<0.000000e+00> : vector<1x256xf32>
    %312 = tpu.matmul %310, %311, %cst_121 {dimension_numbers = #tpu.dot_dimension_numbers<[1], [0], [0], [1], [0, 0, 1, 1], [], []>} : vector<1x256xbf16>, vector<256x256xbf16>, vector<1x256xf32> -> vector<1x256xf32>
    %313 = arith.addf %312, %297 : vector<1x256xf32>
    %314 = arith.addf %281, %313 : vector<1x256xf32>
    %cst_122 = arith.constant 5.000000e-01 : f32
    %315 = vector.broadcast %cst_122 : f32 to vector<1x256xf32>
    %316 = arith.mulf %314, %315 : vector<1x256xf32>
    %317 = arith.subf %316, %280 : vector<1x256xf32>
    %cst_123 = arith.constant 5.000000e-01 : f32
    %318 = vector.broadcast %cst_123 : f32 to vector<1x256xf32>
    %319 = arith.mulf %317, %318 : vector<1x256xf32>
    %320 = arith.addf %280, %319 : vector<1x256xf32>
    %321 = arith.cmpf ogt, %320, %9 : vector<1x256xf32>
    %322 = arith.extui %321 : vector<1x256xi1> to vector<1x256xi32>
    %323 = arith.sitofp %322 : vector<1x256xi32> to vector<1x256xf32>
    %cst_124 = arith.constant 1.000000e+00 : f32
    %324 = vector.broadcast %cst_124 : f32 to vector<1x256xf32>
    %325 = arith.subf %324, %323 : vector<1x256xf32>
    %326 = arith.mulf %320, %325 : vector<1x256xf32>
    %327 = arith.mulf %316, %325 : vector<1x256xf32>
    %328 = arith.index_cast %c6_i32 : i32 to index
    %c0_125 = arith.constant 0 : index
    %c0_126 = arith.constant 0 : index
    %329 = vector.load %arg4[%328, %c0_125, %c0_126] : memref<16x1x256xf32, #tpu.memory_space<vmem>>, vector<1x1x256xf32>
    %330 = vector.shape_cast %329 : vector<1x1x256xf32> to vector<1x256xf32>
    %331 = vector.shape_cast %313 : vector<1x256xf32> to vector<1x1x256xf32>
    tpu.vector_store %arg4[%328, %c0_125, %c0_126], %331 {strides = array<i32>} : memref<16x1x256xf32, #tpu.memory_space<vmem>>, vector<1x1x256xf32>,
    %c7_i32 = arith.constant 7 : i32
    %332 = arith.index_cast %c7_i32 : i32 to index
    %c0_127 = arith.constant 0 : index
    %c0_128 = arith.constant 0 : index
    %333 = vector.load %arg3[%332, %c0_127, %c0_128] : memref<16x1x256xbf16, #tpu.memory_space<vmem>>, vector<1x1x256xbf16>
    %334 = vector.shape_cast %333 : vector<1x1x256xbf16> to vector<1x256xbf16>
    %335 = arith.extf %334 : vector<1x256xbf16> to vector<1x256xf32>
    %336 = arith.subf %335, %293 : vector<1x256xf32>
    %cst_129 = arith.constant 0.0333333351 : f32
    %337 = vector.broadcast %cst_129 : f32 to vector<1x256xf32>
    %338 = arith.mulf %337, %336 : vector<1x256xf32>
    %339 = arith.addf %293, %338 : vector<1x256xf32>
    %cst_130 = arith.constant 92.9515991 : f32
    %340 = vector.broadcast %cst_130 : f32 to vector<1x256xf32>
    %341 = arith.mulf %339, %340 : vector<1x256xf32>
    %cst_131 = arith.constant 1.000000e+01 : f32
    %342 = vector.broadcast %cst_131 : f32 to vector<1x256xf32>
    %343 = arith.addf %341, %342 : vector<1x256xf32>
    %cst_132 = arith.constant 0.333333343 : f32
    %344 = vector.broadcast %cst_132 : f32 to vector<1x256xf32>
    %345 = arith.mulf %344, %323 : vector<1x256xf32>
    %346 = arith.subf %345, %303 : vector<1x256xf32>
    %cst_133 = arith.constant 0.0166666675 : f32
    %347 = vector.broadcast %cst_133 : f32 to vector<1x256xf32>
    %348 = arith.mulf %347, %346 : vector<1x256xf32>
    %349 = arith.addf %303, %348 : vector<1x256xf32>
    %cst_134 = arith.constant 0.0333333351 : f32
    %350 = vector.broadcast %cst_134 : f32 to vector<1x256xf32>
    %351 = arith.mulf %350, %309 : vector<1x256xf32>
    %352 = arith.subf %309, %351 : vector<1x256xf32>
    %cst_135 = arith.constant 1.000000e-01 : f32
    %353 = vector.broadcast %cst_135 : f32 to vector<1x256xf32>
    %354 = arith.mulf %353, %349 : vector<1x256xf32>
    %355 = arith.addf %352, %354 : vector<1x256xf32>
    %356 = arith.truncf %355 : vector<1x256xf32> to vector<1x256xbf16>
    %c0_136 = arith.constant 0 : index
    %c0_137 = arith.constant 0 : index
    %357 = vector.load %arg1[%c0_136, %c0_137] : memref<256x256xbf16, #tpu.memory_space<vmem>>, vector<256x256xbf16>
    %cst_138 = arith.constant dense<0.000000e+00> : vector<1x256xf32>
    %358 = tpu.matmul %356, %357, %cst_138 {dimension_numbers = #tpu.dot_dimension_numbers<[1], [0], [0], [1], [0, 0, 1, 1], [], []>} : vector<1x256xbf16>, vector<256x256xbf16>, vector<1x256xf32> -> vector<1x256xf32>
    %359 = arith.addf %358, %343 : vector<1x256xf32>
    %360 = arith.addf %327, %359 : vector<1x256xf32>
    %cst_139 = arith.constant 5.000000e-01 : f32
    %361 = vector.broadcast %cst_139 : f32 to vector<1x256xf32>
    %362 = arith.mulf %360, %361 : vector<1x256xf32>
    %363 = arith.subf %362, %326 : vector<1x256xf32>
    %cst_140 = arith.constant 5.000000e-01 : f32
    %364 = vector.broadcast %cst_140 : f32 to vector<1x256xf32>
    %365 = arith.mulf %363, %364 : vector<1x256xf32>
    %366 = arith.addf %326, %365 : vector<1x256xf32>
    %367 = arith.cmpf ogt, %366, %9 : vector<1x256xf32>
    %368 = arith.extui %367 : vector<1x256xi1> to vector<1x256xi32>
    %369 = arith.sitofp %368 : vector<1x256xi32> to vector<1x256xf32>
    %cst_141 = arith.constant 1.000000e+00 : f32
    %370 = vector.broadcast %cst_141 : f32 to vector<1x256xf32>
    %371 = arith.subf %370, %369 : vector<1x256xf32>
    %372 = arith.mulf %366, %371 : vector<1x256xf32>
    %373 = arith.mulf %362, %371 : vector<1x256xf32>
    %374 = arith.index_cast %c7_i32 : i32 to index
    %c0_142 = arith.constant 0 : index
    %c0_143 = arith.constant 0 : index
    %375 = vector.load %arg4[%374, %c0_142, %c0_143] : memref<16x1x256xf32, #tpu.memory_space<vmem>>, vector<1x1x256xf32>
    %376 = vector.shape_cast %375 : vector<1x1x256xf32> to vector<1x256xf32>
    %377 = vector.shape_cast %359 : vector<1x256xf32> to vector<1x1x256xf32>
    tpu.vector_store %arg4[%374, %c0_142, %c0_143], %377 {strides = array<i32>} : memref<16x1x256xf32, #tpu.memory_space<vmem>>, vector<1x1x256xf32>,
    %c8_i32 = arith.constant 8 : i32
    %378 = arith.index_cast %c8_i32 : i32 to index
    %c0_144 = arith.constant 0 : index
    %c0_145 = arith.constant 0 : index
    %379 = vector.load %arg3[%378, %c0_144, %c0_145] : memref<16x1x256xbf16, #tpu.memory_space<vmem>>, vector<1x1x256xbf16>
    %380 = vector.shape_cast %379 : vector<1x1x256xbf16> to vector<1x256xbf16>
    %381 = arith.extf %380 : vector<1x256xbf16> to vector<1x256xf32>
    %382 = arith.subf %381, %339 : vector<1x256xf32>
    %cst_146 = arith.constant 0.0333333351 : f32
    %383 = vector.broadcast %cst_146 : f32 to vector<1x256xf32>
    %384 = arith.mulf %383, %382 : vector<1x256xf32>
    %385 = arith.addf %339, %384 : vector<1x256xf32>
    %cst_147 = arith.constant 92.9515991 : f32
    %386 = vector.broadcast %cst_147 : f32 to vector<1x256xf32>
    %387 = arith.mulf %385, %386 : vector<1x256xf32>
    %cst_148 = arith.constant 1.000000e+01 : f32
    %388 = vector.broadcast %cst_148 : f32 to vector<1x256xf32>
    %389 = arith.addf %387, %388 : vector<1x256xf32>
    %cst_149 = arith.constant 0.333333343 : f32
    %390 = vector.broadcast %cst_149 : f32 to vector<1x256xf32>
    %391 = arith.mulf %390, %369 : vector<1x256xf32>
    %392 = arith.subf %391, %349 : vector<1x256xf32>
    %cst_150 = arith.constant 0.0166666675 : f32
    %393 = vector.broadcast %cst_150 : f32 to vector<1x256xf32>
    %394 = arith.mulf %393, %392 : vector<1x256xf32>
    %395 = arith.addf %349, %394 : vector<1x256xf32>
    %cst_151 = arith.constant 0.0333333351 : f32
    %396 = vector.broadcast %cst_151 : f32 to vector<1x256xf32>
    %397 = arith.mulf %396, %355 : vector<1x256xf32>
    %398 = arith.subf %355, %397 : vector<1x256xf32>
    %cst_152 = arith.constant 1.000000e-01 : f32
    %399 = vector.broadcast %cst_152 : f32 to vector<1x256xf32>
    %400 = arith.mulf %399, %395 : vector<1x256xf32>
    %401 = arith.addf %398, %400 : vector<1x256xf32>
    %402 = arith.truncf %401 : vector<1x256xf32> to vector<1x256xbf16>
    %c0_153 = arith.constant 0 : index
    %c0_154 = arith.constant 0 : index
    %403 = vector.load %arg1[%c0_153, %c0_154] : memref<256x256xbf16, #tpu.memory_space<vmem>>, vector<256x256xbf16>
    %cst_155 = arith.constant dense<0.000000e+00> : vector<1x256xf32>
    %404 = tpu.matmul %402, %403, %cst_155 {dimension_numbers = #tpu.dot_dimension_numbers<[1], [0], [0], [1], [0, 0, 1, 1], [], []>} : vector<1x256xbf16>, vector<256x256xbf16>, vector<1x256xf32> -> vector<1x256xf32>
    %405 = arith.addf %404, %389 : vector<1x256xf32>
    %406 = arith.addf %373, %405 : vector<1x256xf32>
    %cst_156 = arith.constant 5.000000e-01 : f32
    %407 = vector.broadcast %cst_156 : f32 to vector<1x256xf32>
    %408 = arith.mulf %406, %407 : vector<1x256xf32>
    %409 = arith.subf %408, %372 : vector<1x256xf32>
    %cst_157 = arith.constant 5.000000e-01 : f32
    %410 = vector.broadcast %cst_157 : f32 to vector<1x256xf32>
    %411 = arith.mulf %409, %410 : vector<1x256xf32>
    %412 = arith.addf %372, %411 : vector<1x256xf32>
    %413 = arith.cmpf ogt, %412, %9 : vector<1x256xf32>
    %414 = arith.extui %413 : vector<1x256xi1> to vector<1x256xi32>
    %415 = arith.sitofp %414 : vector<1x256xi32> to vector<1x256xf32>
    %cst_158 = arith.constant 1.000000e+00 : f32
    %416 = vector.broadcast %cst_158 : f32 to vector<1x256xf32>
    %417 = arith.subf %416, %415 : vector<1x256xf32>
    %418 = arith.mulf %412, %417 : vector<1x256xf32>
    %419 = arith.mulf %408, %417 : vector<1x256xf32>
    %420 = arith.index_cast %c8_i32 : i32 to index
    %c0_159 = arith.constant 0 : index
    %c0_160 = arith.constant 0 : index
    %421 = vector.load %arg4[%420, %c0_159, %c0_160] : memref<16x1x256xf32, #tpu.memory_space<vmem>>, vector<1x1x256xf32>
    %422 = vector.shape_cast %421 : vector<1x1x256xf32> to vector<1x256xf32>
    %423 = vector.shape_cast %405 : vector<1x256xf32> to vector<1x1x256xf32>
    tpu.vector_store %arg4[%420, %c0_159, %c0_160], %423 {strides = array<i32>} : memref<16x1x256xf32, #tpu.memory_space<vmem>>, vector<1x1x256xf32>,
    %c9_i32 = arith.constant 9 : i32
    %424 = arith.index_cast %c9_i32 : i32 to index
    %c0_161 = arith.constant 0 : index
    %c0_162 = arith.constant 0 : index
    %425 = vector.load %arg3[%424, %c0_161, %c0_162] : memref<16x1x256xbf16, #tpu.memory_space<vmem>>, vector<1x1x256xbf16>
    %426 = vector.shape_cast %425 : vector<1x1x256xbf16> to vector<1x256xbf16>
    %427 = arith.extf %426 : vector<1x256xbf16> to vector<1x256xf32>
    %428 = arith.subf %427, %385 : vector<1x256xf32>
    %cst_163 = arith.constant 0.0333333351 : f32
    %429 = vector.broadcast %cst_163 : f32 to vector<1x256xf32>
    %430 = arith.mulf %429, %428 : vector<1x256xf32>
    %431 = arith.addf %385, %430 : vector<1x256xf32>
    %cst_164 = arith.constant 92.9515991 : f32
    %432 = vector.broadcast %cst_164 : f32 to vector<1x256xf32>
    %433 = arith.mulf %431, %432 : vector<1x256xf32>
    %cst_165 = arith.constant 1.000000e+01 : f32
    %434 = vector.broadcast %cst_165 : f32 to vector<1x256xf32>
    %435 = arith.addf %433, %434 : vector<1x256xf32>
    %cst_166 = arith.constant 0.333333343 : f32
    %436 = vector.broadcast %cst_166 : f32 to vector<1x256xf32>
    %437 = arith.mulf %436, %415 : vector<1x256xf32>
    %438 = arith.subf %437, %395 : vector<1x256xf32>
    %cst_167 = arith.constant 0.0166666675 : f32
    %439 = vector.broadcast %cst_167 : f32 to vector<1x256xf32>
    %440 = arith.mulf %439, %438 : vector<1x256xf32>
    %441 = arith.addf %395, %440 : vector<1x256xf32>
    %cst_168 = arith.constant 0.0333333351 : f32
    %442 = vector.broadcast %cst_168 : f32 to vector<1x256xf32>
    %443 = arith.mulf %442, %401 : vector<1x256xf32>
    %444 = arith.subf %401, %443 : vector<1x256xf32>
    %cst_169 = arith.constant 1.000000e-01 : f32
    %445 = vector.broadcast %cst_169 : f32 to vector<1x256xf32>
    %446 = arith.mulf %445, %441 : vector<1x256xf32>
    %447 = arith.addf %444, %446 : vector<1x256xf32>
    %448 = arith.truncf %447 : vector<1x256xf32> to vector<1x256xbf16>
    %c0_170 = arith.constant 0 : index
    %c0_171 = arith.constant 0 : index
    %449 = vector.load %arg1[%c0_170, %c0_171] : memref<256x256xbf16, #tpu.memory_space<vmem>>, vector<256x256xbf16>
    %cst_172 = arith.constant dense<0.000000e+00> : vector<1x256xf32>
    %450 = tpu.matmul %448, %449, %cst_172 {dimension_numbers = #tpu.dot_dimension_numbers<[1], [0], [0], [1], [0, 0, 1, 1], [], []>} : vector<1x256xbf16>, vector<256x256xbf16>, vector<1x256xf32> -> vector<1x256xf32>
    %451 = arith.addf %450, %435 : vector<1x256xf32>
    %452 = arith.addf %419, %451 : vector<1x256xf32>
    %cst_173 = arith.constant 5.000000e-01 : f32
    %453 = vector.broadcast %cst_173 : f32 to vector<1x256xf32>
    %454 = arith.mulf %452, %453 : vector<1x256xf32>
    %455 = arith.subf %454, %418 : vector<1x256xf32>
    %cst_174 = arith.constant 5.000000e-01 : f32
    %456 = vector.broadcast %cst_174 : f32 to vector<1x256xf32>
    %457 = arith.mulf %455, %456 : vector<1x256xf32>
    %458 = arith.addf %418, %457 : vector<1x256xf32>
    %459 = arith.cmpf ogt, %458, %9 : vector<1x256xf32>
    %460 = arith.extui %459 : vector<1x256xi1> to vector<1x256xi32>
    %461 = arith.sitofp %460 : vector<1x256xi32> to vector<1x256xf32>
    %cst_175 = arith.constant 1.000000e+00 : f32
    %462 = vector.broadcast %cst_175 : f32 to vector<1x256xf32>
    %463 = arith.subf %462, %461 : vector<1x256xf32>
    %464 = arith.mulf %458, %463 : vector<1x256xf32>
    %465 = arith.mulf %454, %463 : vector<1x256xf32>
    %466 = arith.index_cast %c9_i32 : i32 to index
    %c0_176 = arith.constant 0 : index
    %c0_177 = arith.constant 0 : index
    %467 = vector.load %arg4[%466, %c0_176, %c0_177] : memref<16x1x256xf32, #tpu.memory_space<vmem>>, vector<1x1x256xf32>
    %468 = vector.shape_cast %467 : vector<1x1x256xf32> to vector<1x256xf32>
    %469 = vector.shape_cast %451 : vector<1x256xf32> to vector<1x1x256xf32>
    tpu.vector_store %arg4[%466, %c0_176, %c0_177], %469 {strides = array<i32>} : memref<16x1x256xf32, #tpu.memory_space<vmem>>, vector<1x1x256xf32>,
    %c10_i32 = arith.constant 10 : i32
    %470 = arith.index_cast %c10_i32 : i32 to index
    %c0_178 = arith.constant 0 : index
    %c0_179 = arith.constant 0 : index
    %471 = vector.load %arg3[%470, %c0_178, %c0_179] : memref<16x1x256xbf16, #tpu.memory_space<vmem>>, vector<1x1x256xbf16>
    %472 = vector.shape_cast %471 : vector<1x1x256xbf16> to vector<1x256xbf16>
    %473 = arith.extf %472 : vector<1x256xbf16> to vector<1x256xf32>
    %474 = arith.subf %473, %431 : vector<1x256xf32>
    %cst_180 = arith.constant 0.0333333351 : f32
    %475 = vector.broadcast %cst_180 : f32 to vector<1x256xf32>
    %476 = arith.mulf %475, %474 : vector<1x256xf32>
    %477 = arith.addf %431, %476 : vector<1x256xf32>
    %cst_181 = arith.constant 92.9515991 : f32
    %478 = vector.broadcast %cst_181 : f32 to vector<1x256xf32>
    %479 = arith.mulf %477, %478 : vector<1x256xf32>
    %cst_182 = arith.constant 1.000000e+01 : f32
    %480 = vector.broadcast %cst_182 : f32 to vector<1x256xf32>
    %481 = arith.addf %479, %480 : vector<1x256xf32>
    %cst_183 = arith.constant 0.333333343 : f32
    %482 = vector.broadcast %cst_183 : f32 to vector<1x256xf32>
    %483 = arith.mulf %482, %461 : vector<1x256xf32>
    %484 = arith.subf %483, %441 : vector<1x256xf32>
    %cst_184 = arith.constant 0.0166666675 : f32
    %485 = vector.broadcast %cst_184 : f32 to vector<1x256xf32>
    %486 = arith.mulf %485, %484 : vector<1x256xf32>
    %487 = arith.addf %441, %486 : vector<1x256xf32>
    %cst_185 = arith.constant 0.0333333351 : f32
    %488 = vector.broadcast %cst_185 : f32 to vector<1x256xf32>
    %489 = arith.mulf %488, %447 : vector<1x256xf32>
    %490 = arith.subf %447, %489 : vector<1x256xf32>
    %cst_186 = arith.constant 1.000000e-01 : f32
    %491 = vector.broadcast %cst_186 : f32 to vector<1x256xf32>
    %492 = arith.mulf %491, %487 : vector<1x256xf32>
    %493 = arith.addf %490, %492 : vector<1x256xf32>
    %494 = arith.truncf %493 : vector<1x256xf32> to vector<1x256xbf16>
    %c0_187 = arith.constant 0 : index
    %c0_188 = arith.constant 0 : index
    %495 = vector.load %arg1[%c0_187, %c0_188] : memref<256x256xbf16, #tpu.memory_space<vmem>>, vector<256x256xbf16>
    %cst_189 = arith.constant dense<0.000000e+00> : vector<1x256xf32>
    %496 = tpu.matmul %494, %495, %cst_189 {dimension_numbers = #tpu.dot_dimension_numbers<[1], [0], [0], [1], [0, 0, 1, 1], [], []>} : vector<1x256xbf16>, vector<256x256xbf16>, vector<1x256xf32> -> vector<1x256xf32>
    %497 = arith.addf %496, %481 : vector<1x256xf32>
    %498 = arith.addf %465, %497 : vector<1x256xf32>
    %cst_190 = arith.constant 5.000000e-01 : f32
    %499 = vector.broadcast %cst_190 : f32 to vector<1x256xf32>
    %500 = arith.mulf %498, %499 : vector<1x256xf32>
    %501 = arith.subf %500, %464 : vector<1x256xf32>
    %cst_191 = arith.constant 5.000000e-01 : f32
    %502 = vector.broadcast %cst_191 : f32 to vector<1x256xf32>
    %503 = arith.mulf %501, %502 : vector<1x256xf32>
    %504 = arith.addf %464, %503 : vector<1x256xf32>
    %505 = arith.cmpf ogt, %504, %9 : vector<1x256xf32>
    %506 = arith.extui %505 : vector<1x256xi1> to vector<1x256xi32>
    %507 = arith.sitofp %506 : vector<1x256xi32> to vector<1x256xf32>
    %cst_192 = arith.constant 1.000000e+00 : f32
    %508 = vector.broadcast %cst_192 : f32 to vector<1x256xf32>
    %509 = arith.subf %508, %507 : vector<1x256xf32>
    %510 = arith.mulf %504, %509 : vector<1x256xf32>
    %511 = arith.mulf %500, %509 : vector<1x256xf32>
    %512 = arith.index_cast %c10_i32 : i32 to index
    %c0_193 = arith.constant 0 : index
    %c0_194 = arith.constant 0 : index
    %513 = vector.load %arg4[%512, %c0_193, %c0_194] : memref<16x1x256xf32, #tpu.memory_space<vmem>>, vector<1x1x256xf32>
    %514 = vector.shape_cast %513 : vector<1x1x256xf32> to vector<1x256xf32>
    %515 = vector.shape_cast %497 : vector<1x256xf32> to vector<1x1x256xf32>
    tpu.vector_store %arg4[%512, %c0_193, %c0_194], %515 {strides = array<i32>} : memref<16x1x256xf32, #tpu.memory_space<vmem>>, vector<1x1x256xf32>,
    %c11_i32 = arith.constant 11 : i32
    %516 = arith.index_cast %c11_i32 : i32 to index
    %c0_195 = arith.constant 0 : index
    %c0_196 = arith.constant 0 : index
    %517 = vector.load %arg3[%516, %c0_195, %c0_196] : memref<16x1x256xbf16, #tpu.memory_space<vmem>>, vector<1x1x256xbf16>
    %518 = vector.shape_cast %517 : vector<1x1x256xbf16> to vector<1x256xbf16>
    %519 = arith.extf %518 : vector<1x256xbf16> to vector<1x256xf32>
    %520 = arith.subf %519, %477 : vector<1x256xf32>
    %cst_197 = arith.constant 0.0333333351 : f32
    %521 = vector.broadcast %cst_197 : f32 to vector<1x256xf32>
    %522 = arith.mulf %521, %520 : vector<1x256xf32>
    %523 = arith.addf %477, %522 : vector<1x256xf32>
    %cst_198 = arith.constant 92.9515991 : f32
    %524 = vector.broadcast %cst_198 : f32 to vector<1x256xf32>
    %525 = arith.mulf %523, %524 : vector<1x256xf32>
    %cst_199 = arith.constant 1.000000e+01 : f32
    %526 = vector.broadcast %cst_199 : f32 to vector<1x256xf32>
    %527 = arith.addf %525, %526 : vector<1x256xf32>
    %cst_200 = arith.constant 0.333333343 : f32
    %528 = vector.broadcast %cst_200 : f32 to vector<1x256xf32>
    %529 = arith.mulf %528, %507 : vector<1x256xf32>
    %530 = arith.subf %529, %487 : vector<1x256xf32>
    %cst_201 = arith.constant 0.0166666675 : f32
    %531 = vector.broadcast %cst_201 : f32 to vector<1x256xf32>
    %532 = arith.mulf %531, %530 : vector<1x256xf32>
    %533 = arith.addf %487, %532 : vector<1x256xf32>
    %cst_202 = arith.constant 0.0333333351 : f32
    %534 = vector.broadcast %cst_202 : f32 to vector<1x256xf32>
    %535 = arith.mulf %534, %493 : vector<1x256xf32>
    %536 = arith.subf %493, %535 : vector<1x256xf32>
    %cst_203 = arith.constant 1.000000e-01 : f32
    %537 = vector.broadcast %cst_203 : f32 to vector<1x256xf32>
    %538 = arith.mulf %537, %533 : vector<1x256xf32>
    %539 = arith.addf %536, %538 : vector<1x256xf32>
    %540 = arith.truncf %539 : vector<1x256xf32> to vector<1x256xbf16>
    %c0_204 = arith.constant 0 : index
    %c0_205 = arith.constant 0 : index
    %541 = vector.load %arg1[%c0_204, %c0_205] : memref<256x256xbf16, #tpu.memory_space<vmem>>, vector<256x256xbf16>
    %cst_206 = arith.constant dense<0.000000e+00> : vector<1x256xf32>
    %542 = tpu.matmul %540, %541, %cst_206 {dimension_numbers = #tpu.dot_dimension_numbers<[1], [0], [0], [1], [0, 0, 1, 1], [], []>} : vector<1x256xbf16>, vector<256x256xbf16>, vector<1x256xf32> -> vector<1x256xf32>
    %543 = arith.addf %542, %527 : vector<1x256xf32>
    %544 = arith.addf %511, %543 : vector<1x256xf32>
    %cst_207 = arith.constant 5.000000e-01 : f32
    %545 = vector.broadcast %cst_207 : f32 to vector<1x256xf32>
    %546 = arith.mulf %544, %545 : vector<1x256xf32>
    %547 = arith.subf %546, %510 : vector<1x256xf32>
    %cst_208 = arith.constant 5.000000e-01 : f32
    %548 = vector.broadcast %cst_208 : f32 to vector<1x256xf32>
    %549 = arith.mulf %547, %548 : vector<1x256xf32>
    %550 = arith.addf %510, %549 : vector<1x256xf32>
    %551 = arith.cmpf ogt, %550, %9 : vector<1x256xf32>
    %552 = arith.extui %551 : vector<1x256xi1> to vector<1x256xi32>
    %553 = arith.sitofp %552 : vector<1x256xi32> to vector<1x256xf32>
    %cst_209 = arith.constant 1.000000e+00 : f32
    %554 = vector.broadcast %cst_209 : f32 to vector<1x256xf32>
    %555 = arith.subf %554, %553 : vector<1x256xf32>
    %556 = arith.mulf %550, %555 : vector<1x256xf32>
    %557 = arith.mulf %546, %555 : vector<1x256xf32>
    %558 = arith.index_cast %c11_i32 : i32 to index
    %c0_210 = arith.constant 0 : index
    %c0_211 = arith.constant 0 : index
    %559 = vector.load %arg4[%558, %c0_210, %c0_211] : memref<16x1x256xf32, #tpu.memory_space<vmem>>, vector<1x1x256xf32>
    %560 = vector.shape_cast %559 : vector<1x1x256xf32> to vector<1x256xf32>
    %561 = vector.shape_cast %543 : vector<1x256xf32> to vector<1x1x256xf32>
    tpu.vector_store %arg4[%558, %c0_210, %c0_211], %561 {strides = array<i32>} : memref<16x1x256xf32, #tpu.memory_space<vmem>>, vector<1x1x256xf32>,
    %c12_i32 = arith.constant 12 : i32
    %562 = arith.index_cast %c12_i32 : i32 to index
    %c0_212 = arith.constant 0 : index
    %c0_213 = arith.constant 0 : index
    %563 = vector.load %arg3[%562, %c0_212, %c0_213] : memref<16x1x256xbf16, #tpu.memory_space<vmem>>, vector<1x1x256xbf16>
    %564 = vector.shape_cast %563 : vector<1x1x256xbf16> to vector<1x256xbf16>
    %565 = arith.extf %564 : vector<1x256xbf16> to vector<1x256xf32>
    %566 = arith.subf %565, %523 : vector<1x256xf32>
    %cst_214 = arith.constant 0.0333333351 : f32
    %567 = vector.broadcast %cst_214 : f32 to vector<1x256xf32>
    %568 = arith.mulf %567, %566 : vector<1x256xf32>
    %569 = arith.addf %523, %568 : vector<1x256xf32>
    %cst_215 = arith.constant 92.9515991 : f32
    %570 = vector.broadcast %cst_215 : f32 to vector<1x256xf32>
    %571 = arith.mulf %569, %570 : vector<1x256xf32>
    %cst_216 = arith.constant 1.000000e+01 : f32
    %572 = vector.broadcast %cst_216 : f32 to vector<1x256xf32>
    %573 = arith.addf %571, %572 : vector<1x256xf32>
    %cst_217 = arith.constant 0.333333343 : f32
    %574 = vector.broadcast %cst_217 : f32 to vector<1x256xf32>
    %575 = arith.mulf %574, %553 : vector<1x256xf32>
    %576 = arith.subf %575, %533 : vector<1x256xf32>
    %cst_218 = arith.constant 0.0166666675 : f32
    %577 = vector.broadcast %cst_218 : f32 to vector<1x256xf32>
    %578 = arith.mulf %577, %576 : vector<1x256xf32>
    %579 = arith.addf %533, %578 : vector<1x256xf32>
    %cst_219 = arith.constant 0.0333333351 : f32
    %580 = vector.broadcast %cst_219 : f32 to vector<1x256xf32>
    %581 = arith.mulf %580, %539 : vector<1x256xf32>
    %582 = arith.subf %539, %581 : vector<1x256xf32>
    %cst_220 = arith.constant 1.000000e-01 : f32
    %583 = vector.broadcast %cst_220 : f32 to vector<1x256xf32>
    %584 = arith.mulf %583, %579 : vector<1x256xf32>
    %585 = arith.addf %582, %584 : vector<1x256xf32>
    %586 = arith.truncf %585 : vector<1x256xf32> to vector<1x256xbf16>
    %c0_221 = arith.constant 0 : index
    %c0_222 = arith.constant 0 : index
    %587 = vector.load %arg1[%c0_221, %c0_222] : memref<256x256xbf16, #tpu.memory_space<vmem>>, vector<256x256xbf16>
    %cst_223 = arith.constant dense<0.000000e+00> : vector<1x256xf32>
    %588 = tpu.matmul %586, %587, %cst_223 {dimension_numbers = #tpu.dot_dimension_numbers<[1], [0], [0], [1], [0, 0, 1, 1], [], []>} : vector<1x256xbf16>, vector<256x256xbf16>, vector<1x256xf32> -> vector<1x256xf32>
    %589 = arith.addf %588, %573 : vector<1x256xf32>
    %590 = arith.addf %557, %589 : vector<1x256xf32>
    %cst_224 = arith.constant 5.000000e-01 : f32
    %591 = vector.broadcast %cst_224 : f32 to vector<1x256xf32>
    %592 = arith.mulf %590, %591 : vector<1x256xf32>
    %593 = arith.subf %592, %556 : vector<1x256xf32>
    %cst_225 = arith.constant 5.000000e-01 : f32
    %594 = vector.broadcast %cst_225 : f32 to vector<1x256xf32>
    %595 = arith.mulf %593, %594 : vector<1x256xf32>
    %596 = arith.addf %556, %595 : vector<1x256xf32>
    %597 = arith.cmpf ogt, %596, %9 : vector<1x256xf32>
    %598 = arith.extui %597 : vector<1x256xi1> to vector<1x256xi32>
    %599 = arith.sitofp %598 : vector<1x256xi32> to vector<1x256xf32>
    %cst_226 = arith.constant 1.000000e+00 : f32
    %600 = vector.broadcast %cst_226 : f32 to vector<1x256xf32>
    %601 = arith.subf %600, %599 : vector<1x256xf32>
    %602 = arith.mulf %596, %601 : vector<1x256xf32>
    %603 = arith.mulf %592, %601 : vector<1x256xf32>
    %604 = arith.index_cast %c12_i32 : i32 to index
    %c0_227 = arith.constant 0 : index
    %c0_228 = arith.constant 0 : index
    %605 = vector.load %arg4[%604, %c0_227, %c0_228] : memref<16x1x256xf32, #tpu.memory_space<vmem>>, vector<1x1x256xf32>
    %606 = vector.shape_cast %605 : vector<1x1x256xf32> to vector<1x256xf32>
    %607 = vector.shape_cast %589 : vector<1x256xf32> to vector<1x1x256xf32>
    tpu.vector_store %arg4[%604, %c0_227, %c0_228], %607 {strides = array<i32>} : memref<16x1x256xf32, #tpu.memory_space<vmem>>, vector<1x1x256xf32>,
    %c13_i32 = arith.constant 13 : i32
    %608 = arith.index_cast %c13_i32 : i32 to index
    %c0_229 = arith.constant 0 : index
    %c0_230 = arith.constant 0 : index
    %609 = vector.load %arg3[%608, %c0_229, %c0_230] : memref<16x1x256xbf16, #tpu.memory_space<vmem>>, vector<1x1x256xbf16>
    %610 = vector.shape_cast %609 : vector<1x1x256xbf16> to vector<1x256xbf16>
    %611 = arith.extf %610 : vector<1x256xbf16> to vector<1x256xf32>
    %612 = arith.subf %611, %569 : vector<1x256xf32>
    %cst_231 = arith.constant 0.0333333351 : f32
    %613 = vector.broadcast %cst_231 : f32 to vector<1x256xf32>
    %614 = arith.mulf %613, %612 : vector<1x256xf32>
    %615 = arith.addf %569, %614 : vector<1x256xf32>
    %cst_232 = arith.constant 92.9515991 : f32
    %616 = vector.broadcast %cst_232 : f32 to vector<1x256xf32>
    %617 = arith.mulf %615, %616 : vector<1x256xf32>
    %cst_233 = arith.constant 1.000000e+01 : f32
    %618 = vector.broadcast %cst_233 : f32 to vector<1x256xf32>
    %619 = arith.addf %617, %618 : vector<1x256xf32>
    %cst_234 = arith.constant 0.333333343 : f32
    %620 = vector.broadcast %cst_234 : f32 to vector<1x256xf32>
    %621 = arith.mulf %620, %599 : vector<1x256xf32>
    %622 = arith.subf %621, %579 : vector<1x256xf32>
    %cst_235 = arith.constant 0.0166666675 : f32
    %623 = vector.broadcast %cst_235 : f32 to vector<1x256xf32>
    %624 = arith.mulf %623, %622 : vector<1x256xf32>
    %625 = arith.addf %579, %624 : vector<1x256xf32>
    %cst_236 = arith.constant 0.0333333351 : f32
    %626 = vector.broadcast %cst_236 : f32 to vector<1x256xf32>
    %627 = arith.mulf %626, %585 : vector<1x256xf32>
    %628 = arith.subf %585, %627 : vector<1x256xf32>
    %cst_237 = arith.constant 1.000000e-01 : f32
    %629 = vector.broadcast %cst_237 : f32 to vector<1x256xf32>
    %630 = arith.mulf %629, %625 : vector<1x256xf32>
    %631 = arith.addf %628, %630 : vector<1x256xf32>
    %632 = arith.truncf %631 : vector<1x256xf32> to vector<1x256xbf16>
    %c0_238 = arith.constant 0 : index
    %c0_239 = arith.constant 0 : index
    %633 = vector.load %arg1[%c0_238, %c0_239] : memref<256x256xbf16, #tpu.memory_space<vmem>>, vector<256x256xbf16>
    %cst_240 = arith.constant dense<0.000000e+00> : vector<1x256xf32>
    %634 = tpu.matmul %632, %633, %cst_240 {dimension_numbers = #tpu.dot_dimension_numbers<[1], [0], [0], [1], [0, 0, 1, 1], [], []>} : vector<1x256xbf16>, vector<256x256xbf16>, vector<1x256xf32> -> vector<1x256xf32>
    %635 = arith.addf %634, %619 : vector<1x256xf32>
    %636 = arith.addf %603, %635 : vector<1x256xf32>
    %cst_241 = arith.constant 5.000000e-01 : f32
    %637 = vector.broadcast %cst_241 : f32 to vector<1x256xf32>
    %638 = arith.mulf %636, %637 : vector<1x256xf32>
    %639 = arith.subf %638, %602 : vector<1x256xf32>
    %cst_242 = arith.constant 5.000000e-01 : f32
    %640 = vector.broadcast %cst_242 : f32 to vector<1x256xf32>
    %641 = arith.mulf %639, %640 : vector<1x256xf32>
    %642 = arith.addf %602, %641 : vector<1x256xf32>
    %643 = arith.cmpf ogt, %642, %9 : vector<1x256xf32>
    %644 = arith.extui %643 : vector<1x256xi1> to vector<1x256xi32>
    %645 = arith.sitofp %644 : vector<1x256xi32> to vector<1x256xf32>
    %cst_243 = arith.constant 1.000000e+00 : f32
    %646 = vector.broadcast %cst_243 : f32 to vector<1x256xf32>
    %647 = arith.subf %646, %645 : vector<1x256xf32>
    %648 = arith.mulf %642, %647 : vector<1x256xf32>
    %649 = arith.mulf %638, %647 : vector<1x256xf32>
    %650 = arith.index_cast %c13_i32 : i32 to index
    %c0_244 = arith.constant 0 : index
    %c0_245 = arith.constant 0 : index
    %651 = vector.load %arg4[%650, %c0_244, %c0_245] : memref<16x1x256xf32, #tpu.memory_space<vmem>>, vector<1x1x256xf32>
    %652 = vector.shape_cast %651 : vector<1x1x256xf32> to vector<1x256xf32>
    %653 = vector.shape_cast %635 : vector<1x256xf32> to vector<1x1x256xf32>
    tpu.vector_store %arg4[%650, %c0_244, %c0_245], %653 {strides = array<i32>} : memref<16x1x256xf32, #tpu.memory_space<vmem>>, vector<1x1x256xf32>,
    %c14_i32 = arith.constant 14 : i32
    %654 = arith.index_cast %c14_i32 : i32 to index
    %c0_246 = arith.constant 0 : index
    %c0_247 = arith.constant 0 : index
    %655 = vector.load %arg3[%654, %c0_246, %c0_247] : memref<16x1x256xbf16, #tpu.memory_space<vmem>>, vector<1x1x256xbf16>
    %656 = vector.shape_cast %655 : vector<1x1x256xbf16> to vector<1x256xbf16>
    %657 = arith.extf %656 : vector<1x256xbf16> to vector<1x256xf32>
    %658 = arith.subf %657, %615 : vector<1x256xf32>
    %cst_248 = arith.constant 0.0333333351 : f32
    %659 = vector.broadcast %cst_248 : f32 to vector<1x256xf32>
    %660 = arith.mulf %659, %658 : vector<1x256xf32>
    %661 = arith.addf %615, %660 : vector<1x256xf32>
    %cst_249 = arith.constant 92.9515991 : f32
    %662 = vector.broadcast %cst_249 : f32 to vector<1x256xf32>
    %663 = arith.mulf %661, %662 : vector<1x256xf32>
    %cst_250 = arith.constant 1.000000e+01 : f32
    %664 = vector.broadcast %cst_250 : f32 to vector<1x256xf32>
    %665 = arith.addf %663, %664 : vector<1x256xf32>
    %cst_251 = arith.constant 0.333333343 : f32
    %666 = vector.broadcast %cst_251 : f32 to vector<1x256xf32>
    %667 = arith.mulf %666, %645 : vector<1x256xf32>
    %668 = arith.subf %667, %625 : vector<1x256xf32>
    %cst_252 = arith.constant 0.0166666675 : f32
    %669 = vector.broadcast %cst_252 : f32 to vector<1x256xf32>
    %670 = arith.mulf %669, %668 : vector<1x256xf32>
    %671 = arith.addf %625, %670 : vector<1x256xf32>
    %cst_253 = arith.constant 0.0333333351 : f32
    %672 = vector.broadcast %cst_253 : f32 to vector<1x256xf32>
    %673 = arith.mulf %672, %631 : vector<1x256xf32>
    %674 = arith.subf %631, %673 : vector<1x256xf32>
    %cst_254 = arith.constant 1.000000e-01 : f32
    %675 = vector.broadcast %cst_254 : f32 to vector<1x256xf32>
    %676 = arith.mulf %675, %671 : vector<1x256xf32>
    %677 = arith.addf %674, %676 : vector<1x256xf32>
    %678 = arith.truncf %677 : vector<1x256xf32> to vector<1x256xbf16>
    %c0_255 = arith.constant 0 : index
    %c0_256 = arith.constant 0 : index
    %679 = vector.load %arg1[%c0_255, %c0_256] : memref<256x256xbf16, #tpu.memory_space<vmem>>, vector<256x256xbf16>
    %cst_257 = arith.constant dense<0.000000e+00> : vector<1x256xf32>
    %680 = tpu.matmul %678, %679, %cst_257 {dimension_numbers = #tpu.dot_dimension_numbers<[1], [0], [0], [1], [0, 0, 1, 1], [], []>} : vector<1x256xbf16>, vector<256x256xbf16>, vector<1x256xf32> -> vector<1x256xf32>
    %681 = arith.addf %680, %665 : vector<1x256xf32>
    %682 = arith.addf %649, %681 : vector<1x256xf32>
    %cst_258 = arith.constant 5.000000e-01 : f32
    %683 = vector.broadcast %cst_258 : f32 to vector<1x256xf32>
    %684 = arith.mulf %682, %683 : vector<1x256xf32>
    %685 = arith.subf %684, %648 : vector<1x256xf32>
    %cst_259 = arith.constant 5.000000e-01 : f32
    %686 = vector.broadcast %cst_259 : f32 to vector<1x256xf32>
    %687 = arith.mulf %685, %686 : vector<1x256xf32>
    %688 = arith.addf %648, %687 : vector<1x256xf32>
    %689 = arith.cmpf ogt, %688, %9 : vector<1x256xf32>
    %690 = arith.extui %689 : vector<1x256xi1> to vector<1x256xi32>
    %691 = arith.sitofp %690 : vector<1x256xi32> to vector<1x256xf32>
    %cst_260 = arith.constant 1.000000e+00 : f32
    %692 = vector.broadcast %cst_260 : f32 to vector<1x256xf32>
    %693 = arith.subf %692, %691 : vector<1x256xf32>
    %694 = arith.mulf %688, %693 : vector<1x256xf32>
    %695 = arith.mulf %684, %693 : vector<1x256xf32>
    %696 = arith.index_cast %c14_i32 : i32 to index
    %c0_261 = arith.constant 0 : index
    %c0_262 = arith.constant 0 : index
    %697 = vector.load %arg4[%696, %c0_261, %c0_262] : memref<16x1x256xf32, #tpu.memory_space<vmem>>, vector<1x1x256xf32>
    %698 = vector.shape_cast %697 : vector<1x1x256xf32> to vector<1x256xf32>
    %699 = vector.shape_cast %681 : vector<1x256xf32> to vector<1x1x256xf32>
    tpu.vector_store %arg4[%696, %c0_261, %c0_262], %699 {strides = array<i32>} : memref<16x1x256xf32, #tpu.memory_space<vmem>>, vector<1x1x256xf32>,
    %c15_i32 = arith.constant 15 : i32
    %700 = arith.index_cast %c15_i32 : i32 to index
    %c0_263 = arith.constant 0 : index
    %c0_264 = arith.constant 0 : index
    %701 = vector.load %arg3[%700, %c0_263, %c0_264] : memref<16x1x256xbf16, #tpu.memory_space<vmem>>, vector<1x1x256xbf16>
    %702 = vector.shape_cast %701 : vector<1x1x256xbf16> to vector<1x256xbf16>
    %703 = arith.extf %702 : vector<1x256xbf16> to vector<1x256xf32>
    %704 = arith.subf %703, %661 : vector<1x256xf32>
    %cst_265 = arith.constant 0.0333333351 : f32
    %705 = vector.broadcast %cst_265 : f32 to vector<1x256xf32>
    %706 = arith.mulf %705, %704 : vector<1x256xf32>
    %707 = arith.addf %661, %706 : vector<1x256xf32>
    %cst_266 = arith.constant 92.9515991 : f32
    %708 = vector.broadcast %cst_266 : f32 to vector<1x256xf32>
    %709 = arith.mulf %707, %708 : vector<1x256xf32>
    %cst_267 = arith.constant 1.000000e+01 : f32
    %710 = vector.broadcast %cst_267 : f32 to vector<1x256xf32>
    %711 = arith.addf %709, %710 : vector<1x256xf32>
    %cst_268 = arith.constant 0.333333343 : f32
    %712 = vector.broadcast %cst_268 : f32 to vector<1x256xf32>
    %713 = arith.mulf %712, %691 : vector<1x256xf32>
    %714 = arith.subf %713, %671 : vector<1x256xf32>
    %cst_269 = arith.constant 0.0166666675 : f32
    %715 = vector.broadcast %cst_269 : f32 to vector<1x256xf32>
    %716 = arith.mulf %715, %714 : vector<1x256xf32>
    %717 = arith.addf %671, %716 : vector<1x256xf32>
    %cst_270 = arith.constant 0.0333333351 : f32
    %718 = vector.broadcast %cst_270 : f32 to vector<1x256xf32>
    %719 = arith.mulf %718, %677 : vector<1x256xf32>
    %720 = arith.subf %677, %719 : vector<1x256xf32>
    %cst_271 = arith.constant 1.000000e-01 : f32
    %721 = vector.broadcast %cst_271 : f32 to vector<1x256xf32>
    %722 = arith.mulf %721, %717 : vector<1x256xf32>
    %723 = arith.addf %720, %722 : vector<1x256xf32>
    %724 = arith.truncf %723 : vector<1x256xf32> to vector<1x256xbf16>
    %c0_272 = arith.constant 0 : index
    %c0_273 = arith.constant 0 : index
    %725 = vector.load %arg1[%c0_272, %c0_273] : memref<256x256xbf16, #tpu.memory_space<vmem>>, vector<256x256xbf16>
    %cst_274 = arith.constant dense<0.000000e+00> : vector<1x256xf32>
    %726 = tpu.matmul %724, %725, %cst_274 {dimension_numbers = #tpu.dot_dimension_numbers<[1], [0], [0], [1], [0, 0, 1, 1], [], []>} : vector<1x256xbf16>, vector<256x256xbf16>, vector<1x256xf32> -> vector<1x256xf32>
    %727 = arith.addf %726, %711 : vector<1x256xf32>
    %728 = arith.addf %695, %727 : vector<1x256xf32>
    %cst_275 = arith.constant 5.000000e-01 : f32
    %729 = vector.broadcast %cst_275 : f32 to vector<1x256xf32>
    %730 = arith.mulf %728, %729 : vector<1x256xf32>
    %731 = arith.subf %730, %694 : vector<1x256xf32>
    %cst_276 = arith.constant 5.000000e-01 : f32
    %732 = vector.broadcast %cst_276 : f32 to vector<1x256xf32>
    %733 = arith.mulf %731, %732 : vector<1x256xf32>
    %734 = arith.addf %694, %733 : vector<1x256xf32>
    %735 = arith.cmpf ogt, %734, %9 : vector<1x256xf32>
    %736 = arith.extui %735 : vector<1x256xi1> to vector<1x256xi32>
    %737 = arith.sitofp %736 : vector<1x256xi32> to vector<1x256xf32>
    %cst_277 = arith.constant 1.000000e+00 : f32
    %738 = vector.broadcast %cst_277 : f32 to vector<1x256xf32>
    %739 = arith.subf %738, %737 : vector<1x256xf32>
    %740 = arith.mulf %734, %739 : vector<1x256xf32>
    %741 = arith.mulf %730, %739 : vector<1x256xf32>
    %742 = arith.index_cast %c15_i32 : i32 to index
    %c0_278 = arith.constant 0 : index
    %c0_279 = arith.constant 0 : index
    %743 = vector.load %arg4[%742, %c0_278, %c0_279] : memref<16x1x256xf32, #tpu.memory_space<vmem>>, vector<1x1x256xf32>
    %744 = vector.shape_cast %743 : vector<1x1x256xf32> to vector<1x256xf32>
    %745 = vector.shape_cast %727 : vector<1x256xf32> to vector<1x1x256xf32>
    tpu.vector_store %arg4[%742, %c0_278, %c0_279], %745 {strides = array<i32>} : memref<16x1x256xf32, #tpu.memory_space<vmem>>, vector<1x1x256xf32>,
    %c16_i32 = arith.constant 16 : i32
    %c0_280 = arith.constant 0 : index
    %c0_281 = arith.constant 0 : index
    %746 = vector.load %arg5[%c0_280, %c0_281] : memref<8x256xf32, #tpu.memory_space<vmem>>, vector<1x256xf32>
    tpu.vector_store %arg5[%c0_280, %c0_281], %737 {strides = array<i32>} : memref<8x256xf32, #tpu.memory_space<vmem>>, vector<1x256xf32>,
    %c1_282 = arith.constant 1 : index
    %c0_283 = arith.constant 0 : index
    %747 = vector.load %arg5[%c1_282, %c0_283] : memref<8x256xf32, #tpu.memory_space<vmem>>, vector<1x256xf32>
    tpu.vector_store %arg5[%c1_282, %c0_283], %717 {strides = array<i32>} : memref<8x256xf32, #tpu.memory_space<vmem>>, vector<1x256xf32>,
    %c2_284 = arith.constant 2 : index
    %c0_285 = arith.constant 0 : index
    %748 = vector.load %arg5[%c2_284, %c0_285] : memref<8x256xf32, #tpu.memory_space<vmem>>, vector<1x256xf32>
    tpu.vector_store %arg5[%c2_284, %c0_285], %723 {strides = array<i32>} : memref<8x256xf32, #tpu.memory_space<vmem>>, vector<1x256xf32>,
    %c3_286 = arith.constant 3 : index
    %c0_287 = arith.constant 0 : index
    %749 = vector.load %arg5[%c3_286, %c0_287] : memref<8x256xf32, #tpu.memory_space<vmem>>, vector<1x256xf32>
    tpu.vector_store %arg5[%c3_286, %c0_287], %707 {strides = array<i32>} : memref<8x256xf32, #tpu.memory_space<vmem>>, vector<1x256xf32>,
    %c4_288 = arith.constant 4 : index
    %c0_289 = arith.constant 0 : index
    %750 = vector.load %arg5[%c4_288, %c0_289] : memref<8x256xf32, #tpu.memory_space<vmem>>, vector<1x256xf32>
    tpu.vector_store %arg5[%c4_288, %c0_289], %740 {strides = array<i32>} : memref<8x256xf32, #tpu.memory_space<vmem>>, vector<1x256xf32>,
    %c5_290 = arith.constant 5 : index
    %c0_291 = arith.constant 0 : index
    %751 = vector.load %arg5[%c5_290, %c0_291] : memref<8x256xf32, #tpu.memory_space<vmem>>, vector<1x256xf32>
    tpu.vector_store %arg5[%c5_290, %c0_291], %741 {strides = array<i32>} : memref<8x256xf32, #tpu.memory_space<vmem>>, vector<1x256xf32>,
    return
  }
  func.func @transform_0(%arg0: i32) -> (i32, i32) {
    %c0_i32 = arith.constant 0 : i32
    %c0_i32_0 = arith.constant 0 : i32
    %c0_i32_1 = arith.constant 0 : i32
    return %c0_i32, %c0_i32_0 : i32, i32
  }
  func.func @transform_1(%arg0: i32) -> (i32, i32) {
    %c0_i32 = arith.constant 0 : i32
    %c0_i32_0 = arith.constant 0 : i32
    %c0_i32_1 = arith.constant 0 : i32
    return %c0_i32, %c0_i32_0 : i32, i32
  }
  func.func @transform_2(%arg0: i32) -> (i32, i32, i32) {
    %c0_i32 = arith.constant 0 : i32
    %c0_i32_0 = arith.constant 0 : i32
    %c0_i32_1 = arith.constant 0 : i32
    return %arg0, %c0_i32, %c0_i32_0 : i32, i32, i32
  }
  func.func @transform_3(%arg0: i32) -> (i32, i32, i32) {
    %c0_i32 = arith.constant 0 : i32
    %c0_i32_0 = arith.constant 0 : i32
    %c0_i32_1 = arith.constant 0 : i32
    return %arg0, %c0_i32, %c0_i32_0 : i32, i32, i32
  }
  func.func @transform_4(%arg0: i32) -> (i32, i32) {
    %c0_i32 = arith.constant 0 : i32
    %c0_i32_0 = arith.constant 0 : i32
    %c0_i32_1 = arith.constant 0 : i32
    return %c0_i32, %c0_i32_0 : i32, i32
  }
}

</mosaic_0001>

<bundles_post_ra>
// kernel: brain_run.1
= control target key start
LH: loop header
LB: loop body
LE: loop exit
PB: predicated region body
PF: predicated region fallthrough
CT: control target
= control target key end

     0   :  { %10 = vsyncpa [#allocation3], 0  ;;  %s7987_s0 = inlined_call_operand.hbm [shape: bf16[256,256], index: 0, kind: input, shape index: {}]   ;;  %s7988_s1 = inlined_call_operand.vmem [shape: f32[8,256], index: 1, kind: input, shape index: {}]   ;;  %s7989_s2 = inlined_call_operand.vmem [shape: bf16[64,1,256], index: 2, kind: input, shape index: {}]   ;;  %s7990_s3 = inlined_call_operand.hbm [shape: f32[64,1,256], index: 3, kind: output, shape index: {0}]   ;;  %s7991_s4 = inlined_call_operand.hbm [shape: f32[8,256], index: 4, kind: output, shape index: {1}]  }
   0x1   :  { %11 = vsyncpa [#allocation4], 0 }
   0x2   :  { %13 = vsyncpa [#allocation4 + $0x1], 0 }
   0x3   :  { %14 = vsyncpa [#allocation7], 0  ;;  %s6502_s15 = smov 0   ;;  %s6504_s16 = smov 0  }
   0x4   :  { %s6506_s17 = smov 0   ;;  %s6508_s18 = smov 0  }
   0x5 LB: > { %s6523_s19 = sadd.s32 4294967295, %s6465_s18   ;;  %s5511_s20 = sadd.s32 4294967294, %s6465_s18   ;;  %s6465_s18 = sphi %s6508_s18, %s8007_s18   ;;  %s6461_s17 = sphi %s6506_s17, %s8006_s17   ;;  %s6457_s16 = sphi %s6504_s16, %s8005_s16   ;;  %s6453_s15 = sphi %s6502_s15, %s8004_s15  }
   0x6   : > { %s6527_s21 = sadd.s32 1, %s6465_s18   ;;  %s95_s22 = sadd.s32 1, %s6461_s17 }
   0x7   : > { %s92_s23 = ssub.s32 %s6465_s18, %s6527_s21  ;;  %p105_p0 = scmp.ne.s32.totalorder %s6461_s17, %s6457_s16 }
   0x8   : > { %p93_p1 = scmp.eq.s32.totalorder %s92_s23, 0  ;;  %p7992_p2 = scmp.eq.s32.totalorder %s6523_s19, 3 }
   0x9   : > { %p111_p3 = scmp.ne.s32.totalorder %s6457_s16, %s6453_s15  ;;  %p112_p4 = scmp.eq.s32.totalorder %s5511_s20, 3 }
   0xa   : > { %s6538_s24 = scalar_select %p93_p1, %s6461_s17, %s95_s22  }
   0xb   : > { %p6542_p5 = por %p7992_p2, %p105_p0  ;;  %p6546_p6 = por %p112_p4, %p111_p3 }
   0xc   : > { %p5512_p7 = scmp.ge.s32.totalorder %s6465_s18, 1  ;;  %p140_p8 = scmp.lt.s32.totalorder %s6465_s18, 5 }
   0xd   : > { %s7994_s26 = scalar_select %p6546_p6, 1, 0 }
   0xe   : > { %p6107_p10 = scmp.eq.s32.totalorder %s6523_s19, 0  ;;  %p6554_p11 = pnand %p5512_p7, %p140_p8 }
   0xf   : > { %s6467_s28 = smov [#allocation2]  }
  0x10   : > { %s152_s29 = sshll.u32 %s6467_s28, 4  ;;  %p6099_p12 = pneg %p6554_p11  ;;  %s153_s29 = int_to_ptr.vmem [resolvable:$true] %s152_s29 }
  0x11   : > { %s6358_s30 = scalar_lea.vmem %s153_s29, 4096  ;;  %p6366_p2 = scmp.lt.s32.totalorder %s153_s29, %s153_s29 }
  0x12   : > { %p6100_p13 = pnand %p6107_p10, %p6099_p12  ;;  %p6359_p1 = scmp.ne.s32.totalorder %s153_s29, %s6358_s30 }
  0x13   : > { %p6367_p9 = scmp.lt.s32.totalorder %s6358_s30, %s6358_s30 }
  0x14   : > { %p6349_p0 = pneg %p6100_p13 }
  0x15   : > { %p6368_p6 = por %p6367_p9, %p6366_p2 }
  0x16   : > { %p6361_p3 = pnand %p6359_p1, %p6349_p0 }
  0x18   : > { %p6362_p4 = pneg %p6361_p3 }
  0x1a   : > { %p6369_p7 = pnand %p6368_p6, %p6362_p4 }
  0x1c   : > { %6372 = shalt.err (!%p6369_p7)
}
  0x1d   : > { %s6468_s5 = smov 128   ;;  %s6469_s6 = smov 8  }
  0x1e   : > { %6102 = dma.hbm_to_vmem [thread:$0]  (!%p6100_p13), %s7987_s0, 4096, %s153_s29, [#allocation3], %s6468_s5, %s6468_s5, %s6469_s6  }
  0x1f   : > { %180 = sbr.rel (%p6554_p11) target bundleno = 3831 (0xef7), region = 32 }
  0x24   : > { %6440 = dma.done.wait (%p6107_p10), [#allocation3], 4096  }
  0x25   : > { %6442 = vsyncadd (%p6107_p10), [#allocation3], 4294963200  ;;  %s201_s9 = sand.u32 1, %s6457_s16   ;;  %s5518_s10 = sshll.u32 %s6523_s19, 4 }
  0x26   : > { %s5517_s11 = sshll.u32 %s201_s9, 5  ;;  %p207_p2 = scmp.lt.s32.totalorder %s5518_s10, 63 }
  0x27   : > { %s6580_s22 = scalar_lea.vmem [#allocation5], %s5517_s11  ;;  %p7996_p6 = scmp.ne.s32.totalorder %s6523_s19, 0 }
  0x28   : > { %s8009_s10 = smov (!%p207_p2, %s5518_s10), 63 }
  0x29   : > { %s5519_s12 = sshll.u32 %s8009_s10, 1  ;;  %216 = sbr.rel (%p7996_p6) target bundleno = 48 (0x30), region = 40 }
  0x2a   : > { %s6578_s20 = scalar_lea.vmem %s7989_s2, %s5519_s12 }
  0x2e   : > { %v217_v0 = vld [vmem:[%s7988_s1] sm:$0xff]  ;;  %v218_v1 = vld [vmem:[%s7988_s1 + $0x8] sm:$0xff] }
  0x2f   : > { %219 = vst [vmem:[#allocation6] sm:$0xff] %v217_v0  ;;  %220 = vst [vmem:[#allocation6 + $0x8] sm:$0xff] %v218_v1 }
  0x30 PF: > { %v6590_v2 = vld [vmem:[#allocation2 + $0x74] ss:$8 sps:$4 sm:$0xff]   ;;  %v6592_v3 = vld [vmem:[#allocation2 + $0x70] ss:$8 sps:$4 sm:$0xff]   ;;  %v6595_v4 = vld [vmem:[#allocation2 + $0x64] ss:$8 sps:$4 sm:$0xff]   ;;  %v240_v19 = vlaneseq }
  0x31   : > { %483 = vmatprep.subr.bf16.mxu0 %v6590_v2  ;;  %808 = vmatprep.subr.bf16.mxu1 %v6590_v2  ;;  %v6599_v5 = vld [vmem:[#allocation2 + $0x60] ss:$8 sps:$4 sm:$0xff]   ;;  %v6603_v6 = vld [vmem:[#allocation2 + $0x54] ss:$8 sps:$4 sm:$0xff]   ;;  %v6607_v7 = vld [vmem:[#allocation2 + $0x50] ss:$8 sps:$4 sm:$0xff]  }
  0x32   : > { %484 = vmatpush1.bf16.msra.mxu0 %v6592_v3  ;;  %809 = vmatpush1.bf16.msra.mxu1 %v6592_v3  ;;  %v6611_v8 = vld [vmem:[#allocation2 + $0x44] ss:$8 sps:$4 sm:$0xff]   ;;  %v6615_v9 = vld [vmem:[#allocation2 + $0x40] ss:$8 sps:$4 sm:$0xff]   ;;  %v6619_v10 = vld [vmem:[#allocation2 + $0x34] ss:$8 sps:$4 sm:$0xff]  }
  0x33   : > { %485 = vmatprep.subr.bf16.mxu0 %v6595_v4  ;;  %810 = vmatprep.subr.bf16.mxu1 %v6595_v4  ;;  %v6623_v11 = vld [vmem:[#allocation2 + $0x30] ss:$8 sps:$4 sm:$0xff]   ;;  %v6627_v12 = vld [vmem:[#allocation2 + $0x24] ss:$8 sps:$4 sm:$0xff]   ;;  %v6631_v13 = vld [vmem:[#allocation2 + $0x20] ss:$8 sps:$4 sm:$0xff]  }
  0x34   : > { %v6635_v14 = vld [vmem:[#allocation2 + $0x14] ss:$8 sps:$4 sm:$0xff]   ;;  %v6639_v18 = vld [vmem:[#allocation2 + $0x10] ss:$8 sps:$4 sm:$0xff]   ;;  %v6643_v21 = vld [vmem:[#allocation2 + $0x4] ss:$8 sps:$4 sm:$0xff]  }
  0x35   : > { %v6646_v22 = vld [vmem:[#allocation2] ss:$8 sps:$4 sm:$0xff]   ;;  %v6648_v25 = vld [vmem:[#allocation2 + $0xf4] ss:$8 sps:$4 sm:$0xff]   ;;  %v6652_v26 = vshrl.u32 %v240_v19, 7  ;;  %vm6785_vm0 = vcmp.lt.s32.totalorder %v240_v19, 256 }
  0x36   : > { %486 = vmatpush1.bf16.msra.mxu0 %v6599_v5  ;;  %811 = vmatpush1.bf16.msra.mxu1 %v6599_v5  ;;  %v221_v15 = vld [vmem:[#allocation6] ss:$8 sm:$0x3]  ;;  %v223_v16 = vld [vmem:[#allocation6 + $0x1] ss:$8 sm:$0x3] }
  0x37   : > { %487 = vmatprep.subr.bf16.mxu0 %v6603_v6  ;;  %812 = vmatprep.subr.bf16.mxu1 %v6603_v6  ;;  %v225_v17 = vld [vmem:[#allocation6 + $0x2] ss:$8 sm:$0x3]  ;;  %v259_v20 = vmul.f32 0.33333334, %v221_v15  ;;  %v6666_v33 = vsub.s32 1, %v6652_v26 }
  0x38   : > { %v263_v24 = vmul.f32 0.033333335, %v225_v17  ;;  %v6657_v28 = vld [vmem:[#allocation2 + $0xf0] ss:$8 sps:$4 sm:$0xff]   ;;  %v6661_v31 = vld [vmem:[#allocation2 + $0xe4] ss:$8 sps:$4 sm:$0xff]  }
  0x39   : > { %v260_v23 = vsub.f32 %v259_v20, %v223_v16  ;;  %v6671_v34 = vld [vmem:[#allocation2 + $0xe0] ss:$8 sps:$4 sm:$0xff]   ;;  %v6675_v36 = vld [vmem:[#allocation2 + $0xd4] ss:$8 sps:$4 sm:$0xff]   ;;  %v6683_v38 = vld [vmem:[#allocation2 + $0xd0] ss:$8 sps:$4 sm:$0xff]  }
  0x3a   : > { %488 = vmatpush1.bf16.msra.mxu0 %v6607_v7  ;;  %813 = vmatpush1.bf16.msra.mxu1 %v6607_v7  ;;  %v264_v30 = vsub.f32 %v225_v17, %v263_v24  ;;  %v6685_v40 = vld [vmem:[#allocation2 + $0xc4] ss:$8 sps:$4 sm:$0xff]   ;;  %v6690_v41 = vld [vmem:[#allocation2 + $0xc0] ss:$8 sps:$4 sm:$0xff]   ;;  %v6693_v42 = vld [vmem:[#allocation2 + $0xb4] ss:$8 sps:$4 sm:$0xff]  }
  0x3b   : > { %489 = vmatprep.subr.bf16.mxu0 %v6611_v8  ;;  %814 = vmatprep.subr.bf16.mxu1 %v6611_v8  ;;  %v261_v27 = vmul.f32 0.016666668, %v260_v23  ;;  %v6698_v43 = vld [vmem:[#allocation2 + $0xb0] ss:$8 sps:$4 sm:$0xff]   ;;  %v6701_v44 = vld [vmem:[#allocation2 + $0xa4] ss:$8 sps:$4 sm:$0xff]  }
  0x3c   : > { %v6706_v45 = vld [vmem:[#allocation2 + $0xa0] ss:$8 sps:$4 sm:$0xff]   ;;  %v6709_v46 = vld [vmem:[#allocation2 + $0x94] ss:$8 sps:$4 sm:$0xff]   ;;  %v6714_v47 = vld [vmem:[#allocation2 + $0x90] ss:$8 sps:$4 sm:$0xff]  }
  0x3d   : > { %v6659_v29 = vadd.f32 %v261_v27, %v223_v16  ;;  %v6718_v48 = vsub.s32 0, %v6652_v26  ;;  %v6722_v49 = vld [vmem:[#allocation2 + $0x84] ss:$8 sps:$4 sm:$0xff]   ;;  %v6729_v51 = vld [vmem:[#allocation2 + $0x80] ss:$8 sps:$4 sm:$0xff]   ;;  %s6088_s30 = sshll.u32 %s6523_s19, 9 }
  0x3e   : > { %490 = vmatpush1.bf16.msra.mxu0 %v6615_v9  ;;  %815 = vmatpush1.bf16.msra.mxu1 %v6615_v9  ;;  %v6470_v53 = vmov 857870592   ;;  %v227_v57 = vld [vmem:[#allocation6 + $0x3] ss:$8 sm:$0x3]  ;;  %s5415_s5 = sshll.u32 %s6580_s22, 4  ;;  %s7916_s8 = scalar_lea.hbm %s7990_s3, %s6088_s30  ;;  %s7918_s5 = int_to_ptr.vmem [resolvable:$true] %s5415_s5 }
  0x3f   : > { %491 = vmatprep.subr.bf16.mxu0 %v6619_v10  ;;  %816 = vmatprep.subr.bf16.mxu1 %v6619_v10  ;;  %v265_v32 = vmul.f32 0.1, %v6659_v29  ;;  %v238_v54 = vunpack.c.l.s4 %v6470_v53  ;;  %v234_v58 = vld [vmem:[%s6578_s20] sm:$0x3]  ;;  %v6471_v59 = vmov 1966171168  }
  0x40   : > { %v249_v60 = vunpack.c.l.s4 %v6471_v59  ;;  %v235_v61 = vunpack.c.l.bf16 %v234_v58  ;;  %v231_v53 = vld [vmem:[#allocation6 + $0x5] ss:$8 sm:$0x3]  ;;  %v229_v58 = vld [vmem:[#allocation6 + $0x4] ss:$8 sm:$0x3] }
  0x41   : > { %v6673_v35 = vadd.f32 %v265_v32, %v264_v30  ;;  %v239_v55 = vunpack.c.0.s8 %v238_v54  ;;  %s7926_s10 = scalar_lea.sflag [#allocation4], %s201_s9  ;;  %s6373_s11 = scalar_lea.vmem %s7918_s5, 512 }
  0x42   : > { %492 = vmatpush1.bf16.msra.mxu0 %v6623_v11  ;;  %817 = vmatpush1.bf16.msra.mxu1 %v6623_v11  ;;  %v250_v63 = vunpack.c.0.s8 %v249_v60  ;;  %p6374_p8 = scmp.ne.s32.totalorder %s7918_s5, %s6373_s11  ;;  %s6473_s12 = smov [#allocation5]  }
  0x43   : > { %493 = vmatprep.subr.bf16.mxu0 %v6627_v12  ;;  %818 = vmatprep.subr.bf16.mxu1 %v6627_v12  ;;  %v275_v37 = vrot.slane %v6673_v35, %v6666_v33  ;;  %v271_v50 = vrot.slane %v6673_v35, %v6718_v48  ;;  %v6770_v56 = vsub.s32 %v239_v55, %v6652_v26  ;;  %s6377_s13 = sshll.u32 %s6473_s12, 4  ;;  %s6378_s13 = int_to_ptr.vmem [resolvable:$false] %s6377_s13 }
  0x44   : > { %v6775_v1 = vsub.s32 %v250_v63, %v6652_v26  ;;  %p6375_p9 = pnand %p6374_p8, %p6542_p5  ;;  %s6379_s14 = scalar_lea.vmem %s6378_s13, 1024 }
  0x45   : > { %v279_v39 = vpack.c.bf16 %v275_v37, %v275_v37  ;;  %v278_v52 = vpack.c.bf16 %v271_v50, %v271_v50  ;;  %v243_v62 = vrot.slane %v227_v57, %v6770_v56  ;;  %p6380_p11 = scmp.lt.s32.totalorder %s7918_s5, %s6378_s13  ;;  %p6381_p12 = scmp.lt.s32.totalorder %s6379_s14, %s6373_s11 }
  0x46   : > { %494 = vmatpush1.bf16.msra.mxu0 %v6631_v13  ;;  %819 = vmatpush1.bf16.msra.mxu1 %v6631_v13  ;;  %p6376_p10 = pneg %p6375_p9 }
  0x47   : > { %495 = vmatprep.subr.bf16.mxu0 %v6635_v14  ;;  %820 = vmatprep.subr.bf16.mxu1 %v6635_v14  ;;  %v245_v0 = vsub.f32 %v235_v61, %v243_v62  ;;  %v6793_v62 = vld [vmem:[#allocation6 + $0x6] ss:$8 sm:$0x3]  ;;  %p6382_p13 = por %p6381_p12, %p6380_p11 }
  0x48   : > { %515 = vmatprep.mubr.bf16.mxu0 %v279_v39 }
  0x49   : > { %p6383_p0 = pnand %p6382_p13, %p6376_p10 }
  0x4a   : > { %496 = vmatpush1.bf16.msra.mxu0 %v6639_v18  ;;  %821 = vmatpush1.bf16.msra.mxu1 %v6639_v18 }
  0x4b   : > { %497 = vmatprep.subr.bf16.mxu0 %v6643_v21  ;;  %822 = vmatprep.subr.bf16.mxu1 %v6643_v21 }
  0x4e   : > { %498 = vmatpush1.bf16.msra.mxu0 %v6646_v22  ;;  %823 = vmatpush1.bf16.msra.mxu1 %v6646_v22 }
  0x4f   : > { %499 = vmatprep.subr.bf16.mxu0 %v6648_v25  ;;  %824 = vmatprep.subr.bf16.mxu1 %v6648_v25 }
  0x52   : > { %500 = vmatpush2.bf16.msra.mxu0 %v6657_v28  ;;  %825 = vmatpush2.bf16.msra.mxu1 %v6657_v28 }
  0x53   : > { %501 = vmatprep.subr.bf16.mxu0 %v6661_v31  ;;  %826 = vmatprep.subr.bf16.mxu1 %v6661_v31 }
  0x56   : > { %502 = vmatpush2.bf16.msra.mxu0 %v6671_v34  ;;  %827 = vmatpush2.bf16.msra.mxu1 %v6671_v34 }
  0x57   : > { %503 = vmatprep.subr.bf16.mxu0 %v6675_v36  ;;  %828 = vmatprep.subr.bf16.mxu1 %v6675_v36 }
  0x5a   : > { %504 = vmatpush2.bf16.msra.mxu0 %v6683_v38  ;;  %829 = vmatpush2.bf16.msra.mxu1 %v6683_v38 }
  0x5b   : > { %505 = vmatprep.subr.bf16.mxu0 %v6685_v40  ;;  %830 = vmatprep.subr.bf16.mxu1 %v6685_v40 }
  0x5e   : > { %506 = vmatpush2.bf16.msra.mxu0 %v6690_v41  ;;  %831 = vmatpush2.bf16.msra.mxu1 %v6690_v41 }
  0x5f   : > { %507 = vmatprep.subr.bf16.mxu0 %v6693_v42  ;;  %832 = vmatprep.subr.bf16.mxu1 %v6693_v42 }
  0x62   : > { %508 = vmatpush2.bf16.msra.mxu0 %v6698_v43  ;;  %833 = vmatpush2.bf16.msra.mxu1 %v6698_v43 }
  0x63   : > { %509 = vmatprep.subr.bf16.mxu0 %v6701_v44  ;;  %834 = vmatprep.subr.bf16.mxu1 %v6701_v44 }
  0x66   : > { %510 = vmatpush2.bf16.msra.mxu0 %v6706_v45  ;;  %835 = vmatpush2.bf16.msra.mxu1 %v6706_v45 }
  0x67   : > { %511 = vmatprep.subr.bf16.mxu0 %v6709_v46  ;;  %836 = vmatprep.subr.bf16.mxu1 %v6709_v46 }
  0x6a   : > { %512 = vmatpush2.bf16.msra.mxu0 %v6714_v47  ;;  %837 = vmatpush2.bf16.msra.mxu1 %v6714_v47 }
  0x6b   : > { %513 = vmatprep.subr.bf16.mxu0 %v6722_v49  ;;  %838 = vmatprep.subr.bf16.mxu1 %v6722_v49 }
  0x6e   : > { %514 = vmatpush2.bf16.msra.mxu0 %v6729_v51  ;;  %839 = vmatpush2.bf16.msra.mxu1 %v6729_v51 }
  0x6f   : > { %1130 = vmatprep.subr.bf16.mxu0 %v6590_v2  ;;  %1452 = vmatprep.subr.bf16.mxu1 %v6590_v2  ;;  %v246_v2 = vmul.f32 0.033333335, %v245_v0  ;;  %v6472_v0 = vmov 0.0  }
  0x71   : > { %516 = vmatmul.mubr.bf16.vlgmr.msra.gmra.mxu0 %v278_v52  ;;  %v254_v15 = vrot.slane %v246_v2, %v6775_v1 }
  0x72   : > { %1131 = vmatpush1.bf16.msra.mxu0 %v6592_v3 }
  0x73   : > { %1132 = vmatprep.subr.bf16.mxu0 %v6595_v4  ;;  %v6778_v16 = vadd.f32 %v254_v15, %v227_v57 }
  0x75   : > { %v257_v17 = vmul.f32 92.9516, %v6778_v16 }
  0x76   : > { %1133 = vmatpush1.bf16.msra.mxu0 %v6599_v5 }
  0x77   : > { %1134 = vmatprep.subr.bf16.mxu0 %v6603_v6  ;;  %v258_v20 = vadd.f32 10.0, %v257_v17 }
  0x79   : > { %v476_v23 = vrot.slane %v258_v20, %v6718_v48  ;;  %v480_v24 = vrot.slane %v258_v20, %v6666_v33  ;;  %v588_v20 = vmul.f32 0.033333335, %v6673_v35 }
  0x7a   : > { %1135 = vmatpush1.bf16.msra.mxu0 %v6607_v7 }
  0x7b   : > { %1136 = vmatprep.subr.bf16.mxu0 %v6611_v8 }
  0x7e   : > { %1137 = vmatpush1.bf16.msra.mxu0 %v6615_v9 }
  0x7f   : > { %1138 = vmatprep.subr.bf16.mxu0 %v6619_v10 }
  0x82   : > { %1139 = vmatpush1.bf16.msra.mxu0 %v6623_v11 }
  0x83   : > { %1140 = vmatprep.subr.bf16.mxu0 %v6627_v12 }
  0x86   : > { %1141 = vmatpush1.bf16.msra.mxu0 %v6631_v13 }
  0x87   : > { %1142 = vmatprep.subr.bf16.mxu0 %v6635_v14 }
  0x8a   : > { %1143 = vmatpush1.bf16.msra.mxu0 %v6639_v18 }
  0x8b   : > { %1144 = vmatprep.subr.bf16.mxu0 %v6643_v21 }
  0x8e   : > { %1145 = vmatpush1.bf16.msra.mxu0 %v6646_v22 }
  0x8f   : > { %1146 = vmatprep.subr.bf16.mxu0 %v6648_v25 }
  0x92   : > { %1147 = vmatpush2.bf16.msra.mxu0 %v6657_v28 }
  0x93   : > { %1148 = vmatprep.subr.bf16.mxu0 %v6661_v31 }
  0x96   : > { %1149 = vmatpush2.bf16.msra.mxu0 %v6671_v34 }
  0x97   : > { %1150 = vmatprep.subr.bf16.mxu0 %v6675_v36 }
  0x9a   : > { %1151 = vmatpush2.bf16.msra.mxu0 %v6683_v38 }
  0x9b   : > { %1152 = vmatprep.subr.bf16.mxu0 %v6685_v40 }
  0x9e   : > { %1153 = vmatpush2.bf16.msra.mxu0 %v6690_v41 }
  0x9f   : > { %1154 = vmatprep.subr.bf16.mxu0 %v6693_v42 }
  0xa2   : > { %1155 = vmatpush2.bf16.msra.mxu0 %v6698_v43 }
  0xa3   : > { %1156 = vmatprep.subr.bf16.mxu0 %v6701_v44 }
  0xa6   : > { %1157 = vmatpush2.bf16.msra.mxu0 %v6706_v45 }
  0xa7   : > { %1158 = vmatprep.subr.bf16.mxu0 %v6709_v46 }
  0xaa   : > { %1159 = vmatpush2.bf16.msra.mxu0 %v6714_v47 }
  0xab   : > { %1160 = vmatprep.subr.bf16.mxu0 %v6722_v49 }
  0xae   : > { %1161 = vmatpush2.bf16.msra.mxu0 %v6729_v51 }
 0x131   : > { %v517_v27 = vpop.f32.mrf.mxu0 }
 0x132   : > { %v518_v32 = vadd.f32 %v517_v27, %v476_v23 }
 0x133   : > { %v519_v30 = vpop.f32.mrf.mxu0 }
 0x134   : > { %v520_v37 = vadd.f32 %v519_v30, %v480_v24 }
 0x135   : > { %v521_v39 = vpop.f32.mrf.mxu0 }
 0x136   : > { %v526_v26 = vcombine.low %v518_v32, %v520_v37  ;;  %v589_v32 = vsub.f32 %v6673_v35, %v588_v20  ;;  %v6892_v20 = vld [vmem:[#allocation2 + $0x54] ss:$8 sps:$4 sm:$0xff]  }
 0x137   : > { %v522_v50 = vpop.f32.mrf.mxu0 }
 0x138   : > { %v533_v52 = vrot.slane %v526_v26, %v6775_v1 }
 0x13a   : > { %v540_v55 = vrot.slane %v533_v52, %v6775_v1 }
 0x13c   : > { %v542_v57 = vadd.f32 %v540_v55, %v231_v53  ;;  %557 = vst.msk [vmem:[%s6580_s22] sm:$0x3] %vm6785_vm0, %v540_v55 }
 0x13e   : > { %v543_v59 = vmul.f32 0.5, %v542_v57 }
 0x140   : > { %v544_v60 = vsub.f32 %v543_v59, %v229_v58 }
 0x142   : > { %v545_v61 = vmul.f32 0.5, %v544_v60 }
 0x144   : > { %v546_v63 = vadd.f32 %v545_v61, %v229_v58 }
 0x146   : > { %vm547_vm1 = vcmp.gt.f32.partialorder %v546_v63, %v6793_v62 }
 0x147   : > { %v5553_v19 = vsel %vm547_vm1, 1.0, %v6472_v0 }
 0x148   : > { %v584_v2 = vmul.f32 0.33333334, %v5553_v19  ;;  %v550_v15 = vsub.f32 1.0, %v5553_v19  ;;  %v6880_v19 = vld [vmem:[#allocation2 + $0x70] ss:$8 sps:$4 sm:$0xff]  }
 0x14a   : > { %v585_v17 = vsub.f32 %v584_v2, %v6659_v29  ;;  %v6799_v23 = vmul.f32 %v550_v15, %v546_v63  ;;  %v6801_v24 = vmul.f32 %v550_v15, %v543_v59  ;;  %v6882_v2 = vld [vmem:[#allocation2 + $0x74] ss:$8 sps:$4 sm:$0xff]   ;;  %v6884_v15 = vld [vmem:[#allocation2 + $0x64] ss:$8 sps:$4 sm:$0xff]  }
 0x14b   : > { %1774 = vmatprep.subr.bf16.mxu0 %v6882_v2 }
 0x14c   : > { %v586_v27 = vmul.f32 0.016666668, %v585_v17  ;;  %v6889_v17 = vld [vmem:[#allocation2 + $0x60] ss:$8 sps:$4 sm:$0xff]  }
 0x14e   : > { %v6804_v30 = vadd.f32 %v586_v27, %v6659_v29  ;;  %v6901_v27 = vld [vmem:[#allocation2 + $0x40] ss:$8 sps:$4 sm:$0xff]  }
 0x150   : > { %v590_v37 = vmul.f32 0.1, %v6804_v30 }
 0x152   : > { %v6808_v39 = vadd.f32 %v590_v37, %v589_v32  ;;  %v6907_v32 = vld [vmem:[#allocation2 + $0x30] ss:$8 sps:$4 sm:$0xff]   ;;  %v6910_v37 = vld [vmem:[#allocation2 + $0x24] ss:$8 sps:$4 sm:$0xff]  }
 0x154   : > { %v600_v26 = vrot.slane %v6808_v39, %v6666_v33  ;;  %v596_v50 = vrot.slane %v6808_v39, %v6718_v48 }
 0x156   : > { %v604_v52 = vpack.c.bf16 %v600_v26, %v600_v26  ;;  %v603_v53 = vpack.c.bf16 %v596_v50, %v596_v50  ;;  %v5589_v26 = vld [vmem:[%s6578_s20 + $0x4] sm:$0x3] }
 0x158   : > { %840 = vmatprep.mubr.bf16.mxu1 %v604_v52  ;;  %v882_v52 = vunpack.c.l.bf16 %v5589_v26  ;;  %v6980_v26 = vld [vmem:[#allocation2 + $0xf4] ss:$8 sps:$4 sm:$0xff]  }
 0x159   : > { %841 = vmatmul.mubr.bf16.vlgmr.msra.gmra.mxu1 %v603_v53 }
 0x15a   : > { %1453 = vmatpush1.bf16.msra.mxu1 %v6592_v3  ;;  %v5554_v3 = vld [vmem:[%s6578_s20 + $0x2] sm:$0x3] }
 0x15b   : > { %1454 = vmatprep.subr.bf16.mxu1 %v6595_v4  ;;  %v568_v4 = vrot.slane %v6778_v16, %v6770_v56 }
 0x15e   : > { %1455 = vmatpush1.bf16.msra.mxu1 %v6599_v5  ;;  %v560_v5 = vunpack.c.l.bf16 %v5554_v3 }
 0x15f   : > { %1456 = vmatprep.subr.bf16.mxu1 %v6603_v6 }
 0x160   : > { %v570_v6 = vsub.f32 %v560_v5, %v568_v4 }
 0x162   : > { %1457 = vmatpush1.bf16.msra.mxu1 %v6607_v7  ;;  %v571_v7 = vmul.f32 0.033333335, %v570_v6 }
 0x163   : > { %1458 = vmatprep.subr.bf16.mxu1 %v6611_v8 }
 0x164   : > { %v579_v8 = vrot.slane %v571_v7, %v6775_v1 }
 0x166   : > { %1459 = vmatpush1.bf16.msra.mxu1 %v6615_v9  ;;  %v6850_v9 = vadd.f32 %v579_v8, %v6778_v16 }
 0x167   : > { %1460 = vmatprep.subr.bf16.mxu1 %v6619_v10 }
 0x168   : > { %v582_v10 = vmul.f32 92.9516, %v6850_v9  ;;  %v890_v50 = vrot.slane %v6850_v9, %v6770_v56 }
 0x16a   : > { %1461 = vmatpush1.bf16.msra.mxu1 %v6623_v11  ;;  %v583_v11 = vadd.f32 10.0, %v582_v10  ;;  %v892_v53 = vsub.f32 %v882_v52, %v890_v50  ;;  %v6982_v50 = vld [vmem:[#allocation2 + $0xf0] ss:$8 sps:$4 sm:$0xff]   ;;  %v6988_v52 = vld [vmem:[#allocation2 + $0xe4] ss:$8 sps:$4 sm:$0xff]  }
 0x16b   : > { %1462 = vmatprep.subr.bf16.mxu1 %v6627_v12 }
 0x16c   : > { %v801_v12 = vrot.slane %v583_v11, %v6718_v48  ;;  %v893_v3 = vmul.f32 0.033333335, %v892_v53  ;;  %v6990_v53 = vld [vmem:[#allocation2 + $0xe0] ss:$8 sps:$4 sm:$0xff]  }
 0x16e   : > { %1463 = vmatpush1.bf16.msra.mxu1 %v6631_v13  ;;  %v805_v13 = vrot.slane %v583_v11, %v6666_v33  ;;  %v901_v4 = vrot.slane %v893_v3, %v6775_v1  ;;  %v6996_v3 = vld [vmem:[#allocation2 + $0xd4] ss:$8 sps:$4 sm:$0xff]  }
 0x16f   : > { %1464 = vmatprep.subr.bf16.mxu1 %v6635_v14 }
 0x170   : > { %v6922_v5 = vadd.f32 %v901_v4, %v6850_v9  ;;  %v6998_v4 = vld [vmem:[#allocation2 + $0xd0] ss:$8 sps:$4 sm:$0xff]  }
 0x172   : > { %1465 = vmatpush1.bf16.msra.mxu1 %v6639_v18  ;;  %v904_v6 = vmul.f32 92.9516, %v6922_v5 }
 0x173   : > { %1466 = vmatprep.subr.bf16.mxu1 %v6643_v21 }
 0x174   : > { %v905_v7 = vadd.f32 10.0, %v904_v6  ;;  %v7004_v6 = vld [vmem:[#allocation2 + $0xc4] ss:$8 sps:$4 sm:$0xff]  }
 0x176   : > { %1467 = vmatpush1.bf16.msra.mxu1 %v6646_v22  ;;  %v1123_v8 = vrot.slane %v905_v7, %v6718_v48  ;;  %v1127_v10 = vrot.slane %v905_v7, %v6666_v33  ;;  %v7006_v7 = vld [vmem:[#allocation2 + $0xc0] ss:$8 sps:$4 sm:$0xff]  }
 0x177   : > { %1468 = vmatprep.subr.bf16.mxu1 %v6648_v25 }
 0x17a   : > { %1469 = vmatpush2.bf16.msra.mxu1 %v6657_v28 }
 0x17b   : > { %1470 = vmatprep.subr.bf16.mxu1 %v6661_v31 }
 0x17e   : > { %1471 = vmatpush2.bf16.msra.mxu1 %v6671_v34 }
 0x17f   : > { %1472 = vmatprep.subr.bf16.mxu1 %v6675_v36 }
 0x182   : > { %1473 = vmatpush2.bf16.msra.mxu1 %v6683_v38 }
 0x183   : > { %1474 = vmatprep.subr.bf16.mxu1 %v6685_v40 }
 0x186   : > { %1475 = vmatpush2.bf16.msra.mxu1 %v6690_v41 }
 0x187   : > { %1476 = vmatprep.subr.bf16.mxu1 %v6693_v42 }
 0x18a   : > { %1477 = vmatpush2.bf16.msra.mxu1 %v6698_v43 }
 0x18b   : > { %1478 = vmatprep.subr.bf16.mxu1 %v6701_v44 }
 0x18e   : > { %1479 = vmatpush2.bf16.msra.mxu1 %v6706_v45 }
 0x18f   : > { %1480 = vmatprep.subr.bf16.mxu1 %v6709_v46 }
 0x192   : > { %1481 = vmatpush2.bf16.msra.mxu1 %v6714_v47 }
 0x193   : > { %1482 = vmatprep.subr.bf16.mxu1 %v6722_v49 }
 0x196   : > { %1483 = vmatpush2.bf16.msra.mxu1 %v6729_v51  ;;  %v910_v51 = vmul.f32 0.033333335, %v6808_v39 }
 0x197   : > { %2096 = vmatprep.subr.bf16.mxu1 %v6882_v2 }
 0x198   : > { %v911_v55 = vsub.f32 %v6808_v39, %v910_v51  ;;  %v6913_v39 = vld [vmem:[#allocation2 + $0x20] ss:$8 sps:$4 sm:$0xff]  }
 0x219   : > { %v842_v14 = vpop.f32.mrf.mxu1 }
 0x21a   : > { %v843_v21 = vadd.f32 %v842_v14, %v801_v12 }
 0x21b   : > { %v844_v18 = vpop.f32.mrf.mxu1 }
 0x21c   : > { %v845_v22 = vadd.f32 %v844_v18, %v805_v13 }
 0x21d   : > { %v846_v25 = vpop.f32.mrf.mxu1 }
 0x21e   : > { %v851_v28 = vcombine.low %v843_v21, %v845_v22 }
 0x21f   : > { %v847_v29 = vpop.f32.mrf.mxu1 }
 0x220   : > { %v858_v31 = vrot.slane %v851_v28, %v6775_v1 }
 0x222   : > { %v865_v34 = vrot.slane %v858_v31, %v6775_v1 }
 0x224   : > { %v867_v35 = vadd.f32 %v865_v34, %v6801_v24  ;;  %5588 = vst.msk [vmem:[%s6580_s22 + $0x2] sm:$0x3] %vm6785_vm0, %v865_v34  ;;  %v6898_v24 = vld [vmem:[#allocation2 + $0x44] ss:$8 sps:$4 sm:$0xff]  }
 0x226   : > { %v868_v36 = vmul.f32 0.5, %v867_v35 }
 0x228   : > { %v869_v38 = vsub.f32 %v868_v36, %v6799_v23 }
 0x22a   : > { %v870_v40 = vmul.f32 0.5, %v869_v38 }
 0x22c   : > { %v871_v41 = vadd.f32 %v870_v40, %v6799_v23  ;;  %v6895_v23 = vld [vmem:[#allocation2 + $0x50] ss:$8 sps:$4 sm:$0xff]  }
 0x22e   : > { %vm872_vm2 = vcmp.gt.f32.partialorder %v871_v41, %v6793_v62 }
 0x22f   : > { %v5587_v42 = vsel %vm872_vm2, 1.0, %v6472_v0 }
 0x230   : > { %v906_v43 = vmul.f32 0.33333334, %v5587_v42  ;;  %v875_v44 = vsub.f32 1.0, %v5587_v42 }
 0x232   : > { %v907_v45 = vsub.f32 %v906_v43, %v6804_v30  ;;  %v6866_v46 = vmul.f32 %v875_v44, %v871_v41  ;;  %v877_v47 = vmul.f32 %v875_v44, %v868_v36 }
 0x234   : > { %v908_v49 = vmul.f32 0.016666668, %v907_v45 }
 0x236   : > { %v6870_v16 = vadd.f32 %v908_v49, %v6804_v30  ;;  %v6904_v30 = vld [vmem:[#allocation2 + $0x34] ss:$8 sps:$4 sm:$0xff]  }
 0x238   : > { %v912_v57 = vmul.f32 0.1, %v6870_v16 }
 0x23a   : > { %v6874_v58 = vadd.f32 %v912_v57, %v911_v55 }
 0x23c   : > { %v922_v59 = vrot.slane %v6874_v58, %v6666_v33  ;;  %v918_v60 = vrot.slane %v6874_v58, %v6718_v48  ;;  %v1232_v45 = vmul.f32 0.033333335, %v6874_v58 }
 0x23e   : > { %v926_v61 = vpack.c.bf16 %v922_v59, %v922_v59  ;;  %v925_v63 = vpack.c.bf16 %v918_v60, %v918_v60 }
 0x240   : > { %1162 = vmatprep.mubr.bf16.mxu0 %v926_v61  ;;  %v6972_v61 = vld [vmem:[#allocation2 + $0x4] ss:$8 sps:$4 sm:$0xff]  }
 0x241   : > { %1163 = vmatmul.mubr.bf16.vlgmr.msra.gmra.mxu0 %v925_v63  ;;  %v6974_v63 = vld [vmem:[#allocation2] ss:$8 sps:$4 sm:$0xff]  }
 0x242   : > { %1775 = vmatpush1.bf16.msra.mxu0 %v6880_v19 }
 0x243   : > { %1776 = vmatprep.subr.bf16.mxu0 %v6884_v15 }
 0x246   : > { %1777 = vmatpush1.bf16.msra.mxu0 %v6889_v17 }
 0x247   : > { %1778 = vmatprep.subr.bf16.mxu0 %v6892_v20 }
 0x24a   : > { %1779 = vmatpush1.bf16.msra.mxu0 %v6895_v23 }
 0x24b   : > { %1780 = vmatprep.subr.bf16.mxu0 %v6898_v24 }
 0x24e   : > { %1781 = vmatpush1.bf16.msra.mxu0 %v6901_v27 }
 0x24f   : > { %1782 = vmatprep.subr.bf16.mxu0 %v6904_v30 }
 0x252   : > { %1783 = vmatpush1.bf16.msra.mxu0 %v6907_v32 }
 0x253   : > { %1784 = vmatprep.subr.bf16.mxu0 %v6910_v37 }
 0x256   : > { %1785 = vmatpush1.bf16.msra.mxu0 %v6913_v39 }
 0x301   : > { %v1164_v11 = vpop.f32.mrf.mxu0 }
 0x302   : > { %v1165_v13 = vadd.f32 %v1164_v11, %v1123_v8  ;;  %v7012_v8 = vld [vmem:[#allocation2 + $0xb4] ss:$8 sps:$4 sm:$0xff]   ;;  %v7020_v11 = vld [vmem:[#allocation2 + $0xa4] ss:$8 sps:$4 sm:$0xff]  }
 0x303   : > { %v1166_v12 = vpop.f32.mrf.mxu0 }
 0x304   : > { %v1167_v14 = vadd.f32 %v1166_v12, %v1127_v10  ;;  %v7014_v10 = vld [vmem:[#allocation2 + $0xb0] ss:$8 sps:$4 sm:$0xff]   ;;  %v7022_v12 = vld [vmem:[#allocation2 + $0xa0] ss:$8 sps:$4 sm:$0xff]  }
 0x305   : > { %v1168_v18 = vpop.f32.mrf.mxu0 }
 0x306   : > { %v1173_v21 = vcombine.low %v1165_v13, %v1167_v14  ;;  %v7024_v13 = vld [vmem:[#allocation2 + $0x94] ss:$8 sps:$4 sm:$0xff]   ;;  %v7029_v14 = vld [vmem:[#allocation2 + $0x90] ss:$8 sps:$4 sm:$0xff]   ;;  %v7033_v18 = vld [vmem:[#allocation2 + $0x84] ss:$8 sps:$4 sm:$0xff]  }
 0x307   : > { %v1169_v22 = vpop.f32.mrf.mxu0 }
 0x308   : > { %v1180_v25 = vrot.slane %v1173_v21, %v6775_v1  ;;  %v7037_v21 = vld [vmem:[#allocation2 + $0x80] ss:$8 sps:$4 sm:$0xff]   ;;  %v5624_v22 = vld [vmem:[%s6578_s20 + $0x6] sm:$0x3] }
 0x30a   : > { %v1187_v28 = vrot.slane %v1180_v25, %v6775_v1  ;;  %v1212_v25 = vrot.slane %v6922_v5, %v6770_v56 }
 0x30c   : > { %v1189_v9 = vadd.f32 %v1187_v28, %v877_v47  ;;  %5623 = vst.msk [vmem:[%s6580_s22 + $0x4] sm:$0x3] %vm6785_vm0, %v1187_v28  ;;  %v1204_v28 = vunpack.c.l.bf16 %v5624_v22 }
 0x30e   : > { %v1190_v29 = vmul.f32 0.5, %v1189_v9  ;;  %v1214_v9 = vsub.f32 %v1204_v28, %v1212_v25 }
 0x310   : > { %v1191_v31 = vsub.f32 %v1190_v29, %v6866_v46 }
 0x312   : > { %v1192_v34 = vmul.f32 0.5, %v1191_v31 }
 0x314   : > { %v1193_v35 = vadd.f32 %v1192_v34, %v6866_v46  ;;  %v1233_v46 = vsub.f32 %v6874_v58, %v1232_v45  ;;  %v6966_v58 = vld [vmem:[#allocation2 + $0x10] ss:$8 sps:$4 sm:$0xff]  }
 0x316   : > { %vm1194_vm3 = vcmp.gt.f32.partialorder %v1193_v35, %v6793_v62 }
 0x317   : > { %v5622_v36 = vsel %vm1194_vm3, 1.0, %v6472_v0 }
 0x318   : > { %v1228_v38 = vmul.f32 0.33333334, %v5622_v36  ;;  %v1197_v40 = vsub.f32 1.0, %v5622_v36 }
 0x31a   : > { %v1229_v41 = vsub.f32 %v1228_v38, %v6870_v16  ;;  %v6937_v42 = vmul.f32 %v1197_v40, %v1193_v35  ;;  %v6939_v43 = vmul.f32 %v1197_v40, %v1190_v29  ;;  %v1215_v29 = vmul.f32 0.033333335, %v1214_v9 }
 0x31c   : > { %v1230_v44 = vmul.f32 0.016666668, %v1229_v41  ;;  %v1223_v31 = vrot.slane %v1215_v29, %v6775_v1 }
 0x31e   : > { %v6943_v47 = vadd.f32 %v1230_v44, %v6870_v16  ;;  %v6964_v16 = vld [vmem:[#allocation2 + $0x14] ss:$8 sps:$4 sm:$0xff]   ;;  %v7051_v34 = vadd.f32 %v1223_v31, %v6922_v5 }
 0x31f   : > { %1786 = vmatprep.subr.bf16.mxu0 %v6964_v16 }
 0x320   : > { %v1234_v49 = vmul.f32 0.1, %v6943_v47  ;;  %1787 = vmatpush1.bf16.msra.mxu0 %v6966_v58  ;;  %v1226_v35 = vmul.f32 92.9516, %v7051_v34 }
 0x321   : > { %1788 = vmatprep.subr.bf16.mxu0 %v6972_v61 }
 0x322   : > { %v6947_v51 = vadd.f32 %v1234_v49, %v1233_v46  ;;  %v1227_v36 = vadd.f32 10.0, %v1226_v35 }
 0x324   : > { %v1244_v55 = vrot.slane %v6947_v51, %v6666_v33  ;;  %v1240_v57 = vrot.slane %v6947_v51, %v6718_v48  ;;  %1789 = vmatpush1.bf16.msra.mxu0 %v6974_v63  ;;  %v1445_v38 = vrot.slane %v1227_v36, %v6718_v48 }
 0x325   : > { %1790 = vmatprep.subr.bf16.mxu0 %v6980_v26 }
 0x326   : > { %v1248_v59 = vpack.c.bf16 %v1244_v55, %v1244_v55  ;;  %v1247_v60 = vpack.c.bf16 %v1240_v57, %v1240_v57 }
 0x328   : > { %1484 = vmatprep.mubr.bf16.mxu1 %v1248_v59  ;;  %1791 = vmatpush2.bf16.msra.mxu0 %v6982_v50 }
 0x329   : > { %1485 = vmatmul.mubr.bf16.vlgmr.msra.gmra.mxu1 %v1247_v60  ;;  %1792 = vmatprep.subr.bf16.mxu0 %v6988_v52 }
 0x32a   : > { %2097 = vmatpush1.bf16.msra.mxu1 %v6880_v19 }
 0x32b   : > { %2098 = vmatprep.subr.bf16.mxu1 %v6884_v15 }
 0x32c   : > { %1793 = vmatpush2.bf16.msra.mxu0 %v6990_v53 }
 0x32d   : > { %1794 = vmatprep.subr.bf16.mxu0 %v6996_v3 }
 0x32e   : > { %2099 = vmatpush1.bf16.msra.mxu1 %v6889_v17 }
 0x32f   : > { %2100 = vmatprep.subr.bf16.mxu1 %v6892_v20 }
 0x330   : > { %1795 = vmatpush2.bf16.msra.mxu0 %v6998_v4 }
 0x331   : > { %1796 = vmatprep.subr.bf16.mxu0 %v7004_v6 }
 0x332   : > { %2101 = vmatpush1.bf16.msra.mxu1 %v6895_v23 }
 0x333   : > { %2102 = vmatprep.subr.bf16.mxu1 %v6898_v24 }
 0x334   : > { %1797 = vmatpush2.bf16.msra.mxu0 %v7006_v7 }
 0x335   : > { %1798 = vmatprep.subr.bf16.mxu0 %v7012_v8 }
 0x336   : > { %2103 = vmatpush1.bf16.msra.mxu1 %v6901_v27 }
 0x337   : > { %2104 = vmatprep.subr.bf16.mxu1 %v6904_v30 }
 0x338   : > { %1799 = vmatpush2.bf16.msra.mxu0 %v7014_v10 }
 0x339   : > { %1800 = vmatprep.subr.bf16.mxu0 %v7020_v11 }
 0x33a   : > { %2105 = vmatpush1.bf16.msra.mxu1 %v6907_v32 }
 0x33b   : > { %2106 = vmatprep.subr.bf16.mxu1 %v6910_v37 }
 0x33c   : > { %1801 = vmatpush2.bf16.msra.mxu0 %v7022_v12 }
 0x33d   : > { %1802 = vmatprep.subr.bf16.mxu0 %v7024_v13 }
 0x33e   : > { %2107 = vmatpush1.bf16.msra.mxu1 %v6913_v39 }
 0x33f   : > { %2108 = vmatprep.subr.bf16.mxu1 %v6964_v16 }
 0x340   : > { %1803 = vmatpush2.bf16.msra.mxu0 %v7029_v14 }
 0x341   : > { %1804 = vmatprep.subr.bf16.mxu0 %v7033_v18 }
 0x342   : > { %2109 = vmatpush1.bf16.msra.mxu1 %v6966_v58 }
 0x343   : > { %2110 = vmatprep.subr.bf16.mxu1 %v6972_v61 }
 0x344   : > { %1805 = vmatpush2.bf16.msra.mxu0 %v7037_v21 }
 0x345   : > { %2418 = vmatprep.subr.bf16.mxu0 %v6882_v2 }
 0x346   : > { %2111 = vmatpush1.bf16.msra.mxu1 %v6974_v63 }
 0x347   : > { %2112 = vmatprep.subr.bf16.mxu1 %v6980_v26 }
 0x34a   : > { %2113 = vmatpush2.bf16.msra.mxu1 %v6982_v50 }
 0x34b   : > { %2114 = vmatprep.subr.bf16.mxu1 %v6988_v52 }
 0x34e   : > { %2115 = vmatpush2.bf16.msra.mxu1 %v6990_v53 }
 0x34f   : > { %2116 = vmatprep.subr.bf16.mxu1 %v6996_v3 }
 0x352   : > { %2117 = vmatpush2.bf16.msra.mxu1 %v6998_v4 }
 0x353   : > { %2118 = vmatprep.subr.bf16.mxu1 %v7004_v6 }
 0x356   : > { %2119 = vmatpush2.bf16.msra.mxu1 %v7006_v7 }
 0x357   : > { %2120 = vmatprep.subr.bf16.mxu1 %v7012_v8 }
 0x35a   : > { %2121 = vmatpush2.bf16.msra.mxu1 %v7014_v10 }
 0x35b   : > { %2122 = vmatprep.subr.bf16.mxu1 %v7020_v11 }
 0x35e   : > { %2123 = vmatpush2.bf16.msra.mxu1 %v7022_v12 }
 0x35f   : > { %2124 = vmatprep.subr.bf16.mxu1 %v7024_v13 }
 0x362   : > { %2125 = vmatpush2.bf16.msra.mxu1 %v7029_v14 }
 0x363   : > { %2126 = vmatprep.subr.bf16.mxu1 %v7033_v18 }
 0x366   : > { %2127 = vmatpush2.bf16.msra.mxu1 %v7037_v21 }
 0x367   : > { %2740 = vmatprep.subr.bf16.mxu1 %v6882_v2  ;;  %v1449_v2 = vrot.slane %v1227_v36, %v6666_v33 }
 0x3e9   : > { %v1486_v40 = vpop.f32.mrf.mxu1 }
 0x3ea   : > { %v1487_v44 = vadd.f32 %v1486_v40, %v1445_v38 }
 0x3eb   : > { %v1488_v41 = vpop.f32.mrf.mxu1 }
 0x3ec   : > { %v1489_v45 = vadd.f32 %v1488_v41, %v1449_v2  ;;  %v1554_v2 = vmul.f32 0.033333335, %v6947_v51 }
 0x3ed   : > { %v1490_v46 = vpop.f32.mrf.mxu1 }
 0x3ee   : > { %v1495_v49 = vcombine.low %v1487_v44, %v1489_v45 }
 0x3ef   : > { %v1491_v55 = vpop.f32.mrf.mxu1 }
 0x3f0   : > { %v1502_v57 = vrot.slane %v1495_v49, %v6775_v1 }
 0x3f2   : > { %v1509_v59 = vrot.slane %v1502_v57, %v6775_v1 }
 0x3f4   : > { %v1511_v5 = vadd.f32 %v1509_v59, %v6939_v43  ;;  %5658 = vst.msk [vmem:[%s6580_s22 + $0x6] sm:$0x3] %vm6785_vm0, %v1509_v59 }
 0x3f6   : > { %v1512_v60 = vmul.f32 0.5, %v1511_v5 }
 0x3f8   : > { %v1513_v22 = vsub.f32 %v1512_v60, %v6937_v42 }
 0x3fa   : > { %v1514_v25 = vmul.f32 0.5, %v1513_v22 }
 0x3fc   : > { %v1515_v28 = vadd.f32 %v1514_v25, %v6937_v42  ;;  %v1555_v42 = vsub.f32 %v6947_v51, %v1554_v2  ;;  %v1534_v51 = vrot.slane %v7051_v34, %v6770_v56 }
 0x3fe   : > { %vm1516_vm4 = vcmp.gt.f32.partialorder %v1515_v28, %v6793_v62 }
 0x3ff   : > { %v5657_v9 = vsel %vm1516_vm4, 1.0, %v6472_v0 }
 0x400   : > { %v1550_v29 = vmul.f32 0.33333334, %v5657_v9  ;;  %v1519_v31 = vsub.f32 1.0, %v5657_v9 }
 0x402   : > { %v1551_v35 = vsub.f32 %v1550_v29, %v6943_v47  ;;  %v7067_v36 = vmul.f32 %v1519_v31, %v1515_v28  ;;  %v7069_v43 = vmul.f32 %v1519_v31, %v1512_v60 }
 0x404   : > { %v1552_v38 = vmul.f32 0.016666668, %v1551_v35 }
 0x406   : > { %v7073_v40 = vadd.f32 %v1552_v38, %v6943_v47  ;;  %v5659_v47 = vld [vmem:[%s6578_s20 + $0x8] sm:$0x3] }
 0x407   : > { %v1526_v57 = vunpack.c.l.bf16 %v5659_v47 }
 0x408   : > { %v1556_v41 = vmul.f32 0.1, %v7073_v40 }
 0x409   : > { %v1536_v59 = vsub.f32 %v1526_v57, %v1534_v51 }
 0x40a   : > { %v7077_v44 = vadd.f32 %v1556_v41, %v1555_v42 }
 0x40b   : > { %v1537_v5 = vmul.f32 0.033333335, %v1536_v59 }
 0x40c   : > { %v1566_v45 = vrot.slane %v7077_v44, %v6666_v33  ;;  %v1562_v46 = vrot.slane %v7077_v44, %v6718_v48 }
 0x40d   : > { %v1545_v60 = vrot.slane %v1537_v5, %v6775_v1 }
 0x40e   : > { %v1570_v49 = vpack.c.bf16 %v1566_v45, %v1566_v45  ;;  %v1569_v55 = vpack.c.bf16 %v1562_v46, %v1562_v46 }
 0x40f   : > { %v7119_v22 = vadd.f32 %v1545_v60, %v7051_v34 }
 0x410   : > { %1806 = vmatprep.mubr.bf16.mxu0 %v1570_v49 }
 0x411   : > { %1807 = vmatmul.mubr.bf16.vlgmr.msra.gmra.mxu0 %v1569_v55  ;;  %v1548_v25 = vmul.f32 92.9516, %v7119_v22 }
 0x412   : > { %2419 = vmatpush1.bf16.msra.mxu0 %v6880_v19 }
 0x413   : > { %2420 = vmatprep.subr.bf16.mxu0 %v6884_v15  ;;  %v1549_v28 = vadd.f32 10.0, %v1548_v25 }
 0x415   : > { %v1767_v9 = vrot.slane %v1549_v28, %v6718_v48  ;;  %v1771_v29 = vrot.slane %v1549_v28, %v6666_v33 }
 0x416   : > { %2421 = vmatpush1.bf16.msra.mxu0 %v6889_v17 }
 0x417   : > { %2422 = vmatprep.subr.bf16.mxu0 %v6892_v20 }
 0x41a   : > { %2423 = vmatpush1.bf16.msra.mxu0 %v6895_v23 }
 0x41b   : > { %2424 = vmatprep.subr.bf16.mxu0 %v6898_v24 }
 0x41e   : > { %2425 = vmatpush1.bf16.msra.mxu0 %v6901_v27 }
 0x41f   : > { %2426 = vmatprep.subr.bf16.mxu0 %v6904_v30 }
 0x422   : > { %2427 = vmatpush1.bf16.msra.mxu0 %v6907_v32 }
 0x423   : > { %2428 = vmatprep.subr.bf16.mxu0 %v6910_v37 }
 0x426   : > { %2429 = vmatpush1.bf16.msra.mxu0 %v6913_v39 }
 0x427   : > { %2430 = vmatprep.subr.bf16.mxu0 %v6964_v16 }
 0x42a   : > { %2431 = vmatpush1.bf16.msra.mxu0 %v6966_v58 }
 0x42b   : > { %2432 = vmatprep.subr.bf16.mxu0 %v6972_v61 }
 0x42e   : > { %2433 = vmatpush1.bf16.msra.mxu0 %v6974_v63 }
 0x42f   : > { %2434 = vmatprep.subr.bf16.mxu0 %v6980_v26 }
 0x432   : > { %2435 = vmatpush2.bf16.msra.mxu0 %v6982_v50 }
 0x433   : > { %2436 = vmatprep.subr.bf16.mxu0 %v6988_v52 }
 0x436   : > { %2437 = vmatpush2.bf16.msra.mxu0 %v6990_v53 }
 0x437   : > { %2438 = vmatprep.subr.bf16.mxu0 %v6996_v3 }
 0x43a   : > { %2439 = vmatpush2.bf16.msra.mxu0 %v6998_v4 }
 0x43b   : > { %2440 = vmatprep.subr.bf16.mxu0 %v7004_v6 }
 0x43e   : > { %2441 = vmatpush2.bf16.msra.mxu0 %v7006_v7 }
 0x43f   : > { %2442 = vmatprep.subr.bf16.mxu0 %v7012_v8 }
 0x442   : > { %2443 = vmatpush2.bf16.msra.mxu0 %v7014_v10 }
 0x443   : > { %2444 = vmatprep.subr.bf16.mxu0 %v7020_v11 }
 0x446   : > { %2445 = vmatpush2.bf16.msra.mxu0 %v7022_v12 }
 0x447   : > { %2446 = vmatprep.subr.bf16.mxu0 %v7024_v13 }
 0x44a   : > { %2447 = vmatpush2.bf16.msra.mxu0 %v7029_v14 }
 0x44b   : > { %2448 = vmatprep.subr.bf16.mxu0 %v7033_v18 }
 0x44e   : > { %2449 = vmatpush2.bf16.msra.mxu0 %v7037_v21 }
 0x4d1   : > { %v1808_v31 = vpop.f32.mrf.mxu0 }
 0x4d2   : > { %v1809_v38 = vadd.f32 %v1808_v31, %v1767_v9 }
 0x4d3   : > { %v1810_v35 = vpop.f32.mrf.mxu0 }
 0x4d4   : > { %v1811_v2 = vadd.f32 %v1810_v35, %v1771_v29  ;;  %v1876_v29 = vmul.f32 0.033333335, %v7077_v44 }
 0x4d5   : > { %v1812_v42 = vpop.f32.mrf.mxu0 }
 0x4d6   : > { %v1817_v41 = vcombine.low %v1809_v38, %v1811_v2 }
 0x4d7   : > { %v1813_v45 = vpop.f32.mrf.mxu0 }
 0x4d8   : > { %v1824_v46 = vrot.slane %v1817_v41, %v6775_v1 }
 0x4da   : > { %v1831_v49 = vrot.slane %v1824_v46, %v6775_v1 }
 0x4dc   : > { %v1833_v34 = vadd.f32 %v1831_v49, %v7069_v43  ;;  %5693 = vst.msk [vmem:[%s6580_s22 + $0x8] sm:$0x3] %vm6785_vm0, %v1831_v49 }
 0x4de   : > { %v1834_v55 = vmul.f32 0.5, %v1833_v34 }
 0x4e0   : > { %v1835_v47 = vsub.f32 %v1834_v55, %v7067_v36 }
 0x4e2   : > { %v1836_v51 = vmul.f32 0.5, %v1835_v47 }
 0x4e4   : > { %v1837_v57 = vadd.f32 %v1836_v51, %v7067_v36  ;;  %v1877_v36 = vsub.f32 %v7077_v44, %v1876_v29  ;;  %v7238_v29 = vld [vmem:[#allocation2 + $0x40] ss:$8 sps:$4 sm:$0xff]  }
 0x4e6   : > { %vm1838_vm5 = vcmp.gt.f32.partialorder %v1837_v57, %v6793_v62 }
 0x4e7   : > { %v5692_v59 = vsel %vm1838_vm5, 1.0, %v6472_v0 }
 0x4e8   : > { %v1872_v5 = vmul.f32 0.33333334, %v5692_v59  ;;  %v1841_v60 = vsub.f32 1.0, %v5692_v59  ;;  %v7217_v59 = vld [vmem:[#allocation2 + $0x70] ss:$8 sps:$4 sm:$0xff]  }
 0x4ea   : > { %v1873_v25 = vsub.f32 %v1872_v5, %v7073_v40  ;;  %v7135_v28 = vmul.f32 %v1841_v60, %v1837_v57  ;;  %v7137_v43 = vmul.f32 %v1841_v60, %v1834_v55  ;;  %v7219_v5 = vld [vmem:[#allocation2 + $0x74] ss:$8 sps:$4 sm:$0xff]   ;;  %v7221_v60 = vld [vmem:[#allocation2 + $0x64] ss:$8 sps:$4 sm:$0xff]  }
 0x4eb   : > { %3062 = vmatprep.subr.bf16.mxu0 %v7219_v5 }
 0x4ec   : > { %v1874_v9 = vmul.f32 0.016666668, %v1873_v25  ;;  %v7226_v25 = vld [vmem:[#allocation2 + $0x60] ss:$8 sps:$4 sm:$0xff]  }
 0x4ee   : > { %v7141_v31 = vadd.f32 %v1874_v9, %v7073_v40  ;;  %v7235_v9 = vld [vmem:[#allocation2 + $0x44] ss:$8 sps:$4 sm:$0xff]  }
 0x4f0   : > { %v1878_v35 = vmul.f32 0.1, %v7141_v31 }
 0x4f2   : > { %v7145_v38 = vadd.f32 %v1878_v35, %v1877_v36  ;;  %v7244_v36 = vld [vmem:[#allocation2 + $0x30] ss:$8 sps:$4 sm:$0xff]   ;;  %v7247_v35 = vld [vmem:[#allocation2 + $0x24] ss:$8 sps:$4 sm:$0xff]  }
 0x4f4   : > { %v1888_v2 = vrot.slane %v7145_v38, %v6666_v33  ;;  %v1884_v42 = vrot.slane %v7145_v38, %v6718_v48  ;;  %v2198_v44 = vmul.f32 0.033333335, %v7145_v38 }
 0x4f6   : > { %v1892_v41 = vpack.c.bf16 %v1888_v2, %v1888_v2  ;;  %v1891_v45 = vpack.c.bf16 %v1884_v42, %v1884_v42  ;;  %v2199_v46 = vsub.f32 %v7145_v38, %v2198_v44  ;;  %v7250_v38 = vld [vmem:[#allocation2 + $0x20] ss:$8 sps:$4 sm:$0xff]   ;;  %v5729_v2 = vld [vmem:[%s6578_s20 + $0xc] sm:$0x3] }
 0x4f8   : > { %2128 = vmatprep.mubr.bf16.mxu1 %v1892_v41  ;;  %v2170_v41 = vunpack.c.l.bf16 %v5729_v2  ;;  %v7319_v2 = vld [vmem:[#allocation2 + $0xf0] ss:$8 sps:$4 sm:$0xff]  }
 0x4f9   : > { %2129 = vmatmul.mubr.bf16.vlgmr.msra.gmra.mxu1 %v1891_v45 }
 0x4fa   : > { %2741 = vmatpush1.bf16.msra.mxu1 %v6880_v19  ;;  %v5694_v19 = vld [vmem:[%s6578_s20 + $0xa] sm:$0x3] }
 0x4fb   : > { %2742 = vmatprep.subr.bf16.mxu1 %v6884_v15  ;;  %v1856_v15 = vrot.slane %v7119_v22, %v6770_v56 }
 0x4fe   : > { %2743 = vmatpush1.bf16.msra.mxu1 %v6889_v17  ;;  %v1848_v17 = vunpack.c.l.bf16 %v5694_v19 }
 0x4ff   : > { %2744 = vmatprep.subr.bf16.mxu1 %v6892_v20 }
 0x500   : > { %v1858_v20 = vsub.f32 %v1848_v17, %v1856_v15 }
 0x502   : > { %2745 = vmatpush1.bf16.msra.mxu1 %v6895_v23  ;;  %v1859_v23 = vmul.f32 0.033333335, %v1858_v20 }
 0x503   : > { %2746 = vmatprep.subr.bf16.mxu1 %v6898_v24 }
 0x504   : > { %v1867_v24 = vrot.slane %v1859_v23, %v6775_v1 }
 0x506   : > { %2747 = vmatpush1.bf16.msra.mxu1 %v6901_v27  ;;  %v7187_v27 = vadd.f32 %v1867_v24, %v7119_v22 }
 0x507   : > { %2748 = vmatprep.subr.bf16.mxu1 %v6904_v30 }
 0x508   : > { %v1870_v30 = vmul.f32 92.9516, %v7187_v27  ;;  %v2178_v42 = vrot.slane %v7187_v27, %v6770_v56 }
 0x50a   : > { %2749 = vmatpush1.bf16.msra.mxu1 %v6907_v32  ;;  %v1871_v32 = vadd.f32 10.0, %v1870_v30  ;;  %v2180_v45 = vsub.f32 %v2170_v41, %v2178_v42  ;;  %v7325_v42 = vld [vmem:[#allocation2 + $0xe4] ss:$8 sps:$4 sm:$0xff]   ;;  %v7327_v41 = vld [vmem:[#allocation2 + $0xe0] ss:$8 sps:$4 sm:$0xff]  }
 0x50b   : > { %2750 = vmatprep.subr.bf16.mxu1 %v6910_v37 }
 0x50c   : > { %v2089_v37 = vrot.slane %v1871_v32, %v6718_v48  ;;  %v2181_v19 = vmul.f32 0.033333335, %v2180_v45  ;;  %v7333_v45 = vld [vmem:[#allocation2 + $0xd4] ss:$8 sps:$4 sm:$0xff]  }
 0x50e   : > { %2751 = vmatpush1.bf16.msra.mxu1 %v6913_v39  ;;  %v2093_v39 = vrot.slane %v1871_v32, %v6666_v33  ;;  %v2189_v15 = vrot.slane %v2181_v19, %v6775_v1  ;;  %v7335_v19 = vld [vmem:[#allocation2 + $0xd0] ss:$8 sps:$4 sm:$0xff]  }
 0x50f   : > { %2752 = vmatprep.subr.bf16.mxu1 %v6964_v16 }
 0x510   : > { %v7259_v17 = vadd.f32 %v2189_v15, %v7187_v27  ;;  %v7341_v15 = vld [vmem:[#allocation2 + $0xc4] ss:$8 sps:$4 sm:$0xff]  }
 0x512   : > { %2753 = vmatpush1.bf16.msra.mxu1 %v6966_v58  ;;  %v2192_v20 = vmul.f32 92.9516, %v7259_v17 }
 0x513   : > { %2754 = vmatprep.subr.bf16.mxu1 %v6972_v61 }
 0x514   : > { %v2193_v23 = vadd.f32 10.0, %v2192_v20  ;;  %v7343_v20 = vld [vmem:[#allocation2 + $0xc0] ss:$8 sps:$4 sm:$0xff]  }
 0x516   : > { %2755 = vmatpush1.bf16.msra.mxu1 %v6974_v63  ;;  %v2411_v24 = vrot.slane %v2193_v23, %v6718_v48  ;;  %v2415_v30 = vrot.slane %v2193_v23, %v6666_v33  ;;  %v7349_v23 = vld [vmem:[#allocation2 + $0xb4] ss:$8 sps:$4 sm:$0xff]  }
 0x517   : > { %2756 = vmatprep.subr.bf16.mxu1 %v6980_v26 }
 0x51a   : > { %2757 = vmatpush2.bf16.msra.mxu1 %v6982_v50 }
 0x51b   : > { %2758 = vmatprep.subr.bf16.mxu1 %v6988_v52 }
 0x51e   : > { %2759 = vmatpush2.bf16.msra.mxu1 %v6990_v53 }
 0x51f   : > { %2760 = vmatprep.subr.bf16.mxu1 %v6996_v3 }
 0x522   : > { %2761 = vmatpush2.bf16.msra.mxu1 %v6998_v4 }
 0x523   : > { %2762 = vmatprep.subr.bf16.mxu1 %v7004_v6 }
 0x526   : > { %2763 = vmatpush2.bf16.msra.mxu1 %v7006_v7 }
 0x527   : > { %2764 = vmatprep.subr.bf16.mxu1 %v7012_v8 }
 0x52a   : > { %2765 = vmatpush2.bf16.msra.mxu1 %v7014_v10 }
 0x52b   : > { %2766 = vmatprep.subr.bf16.mxu1 %v7020_v11 }
 0x52e   : > { %2767 = vmatpush2.bf16.msra.mxu1 %v7022_v12 }
 0x52f   : > { %2768 = vmatprep.subr.bf16.mxu1 %v7024_v13 }
 0x532   : > { %2769 = vmatpush2.bf16.msra.mxu1 %v7029_v14 }
 0x533   : > { %2770 = vmatprep.subr.bf16.mxu1 %v7033_v18 }
 0x536   : > { %2771 = vmatpush2.bf16.msra.mxu1 %v7037_v21 }
 0x537   : > { %3384 = vmatprep.subr.bf16.mxu1 %v7219_v5 }
 0x5b9   : > { %v2130_v16 = vpop.f32.mrf.mxu1 }
 0x5ba   : > { %v2131_v61 = vadd.f32 %v2130_v16, %v2089_v37 }
 0x5bb   : > { %v2132_v58 = vpop.f32.mrf.mxu1 }
 0x5bc   : > { %v2133_v63 = vadd.f32 %v2132_v58, %v2093_v39 }
 0x5bd   : > { %v2134_v26 = vpop.f32.mrf.mxu1 }
 0x5be   : > { %v2139_v50 = vcombine.low %v2131_v61, %v2133_v63 }
 0x5bf   : > { %v2135_v52 = vpop.f32.mrf.mxu1 }
 0x5c0   : > { %v2146_v53 = vrot.slane %v2139_v50, %v6775_v1 }
 0x5c2   : > { %v2153_v3 = vrot.slane %v2146_v53, %v6775_v1 }
 0x5c4   : > { %v2155_v4 = vadd.f32 %v2153_v3, %v7137_v43  ;;  %5728 = vst.msk [vmem:[%s6580_s22 + $0xa] sm:$0x3] %vm6785_vm0, %v2153_v3  ;;  %v7232_v43 = vld [vmem:[#allocation2 + $0x50] ss:$8 sps:$4 sm:$0xff]  }
 0x5c6   : > { %v2156_v6 = vmul.f32 0.5, %v2155_v4 }
 0x5c8   : > { %v2157_v7 = vsub.f32 %v2156_v6, %v7135_v28 }
 0x5ca   : > { %v2158_v8 = vmul.f32 0.5, %v2157_v7 }
 0x5cc   : > { %v2159_v10 = vadd.f32 %v2158_v8, %v7135_v28  ;;  %v7229_v28 = vld [vmem:[#allocation2 + $0x54] ss:$8 sps:$4 sm:$0xff]  }
 0x5ce   : > { %vm2160_vm6 = vcmp.gt.f32.partialorder %v2159_v10, %v6793_v62 }
 0x5cf   : > { %v5727_v11 = vsel %vm2160_vm6, 1.0, %v6472_v0 }
 0x5d0   : > { %v2194_v12 = vmul.f32 0.33333334, %v5727_v11  ;;  %v2163_v13 = vsub.f32 1.0, %v5727_v11 }
 0x5d2   : > { %v2195_v14 = vsub.f32 %v2194_v12, %v7141_v31  ;;  %v7203_v18 = vmul.f32 %v2163_v13, %v2159_v10  ;;  %v2165_v21 = vmul.f32 %v2163_v13, %v2156_v6 }
 0x5d4   : > { %v2196_v40 = vmul.f32 0.016666668, %v2195_v14 }
 0x5d6   : > { %v7207_v22 = vadd.f32 %v2196_v40, %v7141_v31  ;;  %v7241_v31 = vld [vmem:[#allocation2 + $0x34] ss:$8 sps:$4 sm:$0xff]  }
 0x5d8   : > { %v2200_v49 = vmul.f32 0.1, %v7207_v22 }
 0x5da   : > { %v7211_v34 = vadd.f32 %v2200_v49, %v2199_v46 }
 0x5dc   : > { %v2210_v55 = vrot.slane %v7211_v34, %v6666_v33  ;;  %v2206_v47 = vrot.slane %v7211_v34, %v6718_v48  ;;  %v2520_v14 = vmul.f32 0.033333335, %v7211_v34 }
 0x5de   : > { %v2214_v51 = vpack.c.bf16 %v2210_v55, %v2210_v55  ;;  %v2213_v57 = vpack.c.bf16 %v2206_v47, %v2206_v47  ;;  %v7309_v47 = vld [vmem:[#allocation2 + $0x4] ss:$8 sps:$4 sm:$0xff]  }
 0x5e0   : > { %2450 = vmatprep.mubr.bf16.mxu0 %v2214_v51  ;;  %v7311_v51 = vld [vmem:[#allocation2] ss:$8 sps:$4 sm:$0xff]  }
 0x5e1   : > { %2451 = vmatmul.mubr.bf16.vlgmr.msra.gmra.mxu0 %v2213_v57  ;;  %v7317_v57 = vld [vmem:[#allocation2 + $0xf4] ss:$8 sps:$4 sm:$0xff]  }
 0x5e2   : > { %3063 = vmatpush1.bf16.msra.mxu0 %v7217_v59 }
 0x5e3   : > { %3064 = vmatprep.subr.bf16.mxu0 %v7221_v60 }
 0x5e6   : > { %3065 = vmatpush1.bf16.msra.mxu0 %v7226_v25 }
 0x5e7   : > { %3066 = vmatprep.subr.bf16.mxu0 %v7229_v28 }
 0x5ea   : > { %3067 = vmatpush1.bf16.msra.mxu0 %v7232_v43 }
 0x5eb   : > { %3068 = vmatprep.subr.bf16.mxu0 %v7235_v9 }
 0x5ee   : > { %3069 = vmatpush1.bf16.msra.mxu0 %v7238_v29 }
 0x5ef   : > { %3070 = vmatprep.subr.bf16.mxu0 %v7241_v31 }
 0x5f2   : > { %3071 = vmatpush1.bf16.msra.mxu0 %v7244_v36 }
 0x5f3   : > { %3072 = vmatprep.subr.bf16.mxu0 %v7247_v35 }
 0x5f6   : > { %3073 = vmatpush1.bf16.msra.mxu0 %v7250_v38 }
 0x6a1   : > { %v2452_v32 = vpop.f32.mrf.mxu0 }
 0x6a2   : > { %v2453_v39 = vadd.f32 %v2452_v32, %v2411_v24  ;;  %v7351_v24 = vld [vmem:[#allocation2 + $0xb0] ss:$8 sps:$4 sm:$0xff]   ;;  %v7359_v32 = vld [vmem:[#allocation2 + $0xa0] ss:$8 sps:$4 sm:$0xff]  }
 0x6a3   : > { %v2454_v37 = vpop.f32.mrf.mxu0 }
 0x6a4   : > { %v2455_v16 = vadd.f32 %v2454_v37, %v2415_v30  ;;  %v7357_v30 = vld [vmem:[#allocation2 + $0xa4] ss:$8 sps:$4 sm:$0xff]   ;;  %v7361_v37 = vld [vmem:[#allocation2 + $0x94] ss:$8 sps:$4 sm:$0xff]  }
 0x6a5   : > { %v2456_v58 = vpop.f32.mrf.mxu0 }
 0x6a6   : > { %v2461_v61 = vcombine.low %v2453_v39, %v2455_v16  ;;  %v7366_v39 = vld [vmem:[#allocation2 + $0x90] ss:$8 sps:$4 sm:$0xff]   ;;  %v7370_v16 = vld [vmem:[#allocation2 + $0x84] ss:$8 sps:$4 sm:$0xff]   ;;  %v7374_v58 = vld [vmem:[#allocation2 + $0x80] ss:$8 sps:$4 sm:$0xff]  }
 0x6a7   : > { %v2457_v63 = vpop.f32.mrf.mxu0 }
 0x6a8   : > { %v2468_v26 = vrot.slane %v2461_v61, %v6775_v1  ;;  %v5764_v61 = vld [vmem:[%s6578_s20 + $0xe] sm:$0x3]  ;;  %v2500_v63 = vrot.slane %v7259_v17, %v6770_v56 }
 0x6aa   : > { %v2475_v50 = vrot.slane %v2468_v26, %v6775_v1  ;;  %v2492_v26 = vunpack.c.l.bf16 %v5764_v61 }
 0x6ac   : > { %v2477_v27 = vadd.f32 %v2475_v50, %v2165_v21  ;;  %5763 = vst.msk [vmem:[%s6580_s22 + $0xc] sm:$0x3] %vm6785_vm0, %v2475_v50  ;;  %v2502_v50 = vsub.f32 %v2492_v26, %v2500_v63  ;;  %v7401_v26 = vld [vmem:[#allocation6 + $0x6] ss:$8 sm:$0x3] }
 0x6ae   : > { %v2478_v52 = vmul.f32 0.5, %v2477_v27  ;;  %v2503_v27 = vmul.f32 0.033333335, %v2502_v50 }
 0x6b0   : > { %v2479_v53 = vsub.f32 %v2478_v52, %v7203_v18 }
 0x6b2   : > { %v2480_v3 = vmul.f32 0.5, %v2479_v53 }
 0x6b4   : > { %v2481_v4 = vadd.f32 %v2480_v3, %v7203_v18  ;;  %v2521_v18 = vsub.f32 %v7211_v34, %v2520_v14  ;;  %v7303_v34 = vld [vmem:[#allocation2 + $0x10] ss:$8 sps:$4 sm:$0xff]  }
 0x6b6   : > { %vm2482_vm7 = vcmp.gt.f32.partialorder %v2481_v4, %v6793_v62 }
 0x6b7   : > { %v5762_v6 = vsel %vm2482_vm7, 1.0, %v6472_v0 }
 0x6b8   : > { %v2516_v7 = vmul.f32 0.33333334, %v5762_v6  ;;  %v2485_v8 = vsub.f32 1.0, %v5762_v6 }
 0x6ba   : > { %v2517_v10 = vsub.f32 %v2516_v7, %v7207_v22  ;;  %v7274_v11 = vmul.f32 %v2485_v8, %v2481_v4  ;;  %v7276_v12 = vmul.f32 %v2485_v8, %v2478_v52  ;;  %v2511_v52 = vrot.slane %v2503_v27, %v6775_v1 }
 0x6bc   : > { %v2518_v13 = vmul.f32 0.016666668, %v2517_v10  ;;  %v7388_v53 = vadd.f32 %v2511_v52, %v7259_v17 }
 0x6be   : > { %v7280_v21 = vadd.f32 %v2518_v13, %v7207_v22  ;;  %v7301_v22 = vld [vmem:[#allocation2 + $0x14] ss:$8 sps:$4 sm:$0xff]   ;;  %v2514_v3 = vmul.f32 92.9516, %v7388_v53 }
 0x6bf   : > { %3074 = vmatprep.subr.bf16.mxu0 %v7301_v22 }
 0x6c0   : > { %v2522_v62 = vmul.f32 0.1, %v7280_v21  ;;  %3075 = vmatpush1.bf16.msra.mxu0 %v7303_v34  ;;  %v2515_v4 = vadd.f32 10.0, %v2514_v3 }
 0x6c1   : > { %3076 = vmatprep.subr.bf16.mxu0 %v7309_v47 }
 0x6c2   : > { %v7284_v40 = vadd.f32 %v2522_v62, %v2521_v18  ;;  %v2733_v6 = vrot.slane %v2515_v4, %v6718_v48 }
 0x6c4   : > { %v2532_v44 = vrot.slane %v7284_v40, %v6666_v33  ;;  %v2528_v46 = vrot.slane %v7284_v40, %v6718_v48  ;;  %3077 = vmatpush1.bf16.msra.mxu0 %v7311_v51 }
 0x6c5   : > { %3078 = vmatprep.subr.bf16.mxu0 %v7317_v57 }
 0x6c6   : > { %v2536_v49 = vpack.c.bf16 %v2532_v44, %v2532_v44  ;;  %v2535_v55 = vpack.c.bf16 %v2528_v46, %v2528_v46 }
 0x6c8   : > { %2772 = vmatprep.mubr.bf16.mxu1 %v2536_v49  ;;  %3079 = vmatpush2.bf16.msra.mxu0 %v7319_v2 }
 0x6c9   : > { %2773 = vmatmul.mubr.bf16.vlgmr.msra.gmra.mxu1 %v2535_v55  ;;  %3080 = vmatprep.subr.bf16.mxu0 %v7325_v42 }
 0x6ca   : > { %3385 = vmatpush1.bf16.msra.mxu1 %v7217_v59 }
 0x6cb   : > { %3386 = vmatprep.subr.bf16.mxu1 %v7221_v60 }
 0x6cc   : > { %3081 = vmatpush2.bf16.msra.mxu0 %v7327_v41 }
 0x6cd   : > { %3082 = vmatprep.subr.bf16.mxu0 %v7333_v45 }
 0x6ce   : > { %3387 = vmatpush1.bf16.msra.mxu1 %v7226_v25 }
 0x6cf   : > { %3388 = vmatprep.subr.bf16.mxu1 %v7229_v28 }
 0x6d0   : > { %3083 = vmatpush2.bf16.msra.mxu0 %v7335_v19 }
 0x6d1   : > { %3084 = vmatprep.subr.bf16.mxu0 %v7341_v15 }
 0x6d2   : > { %3389 = vmatpush1.bf16.msra.mxu1 %v7232_v43 }
 0x6d3   : > { %3390 = vmatprep.subr.bf16.mxu1 %v7235_v9 }
 0x6d4   : > { %3085 = vmatpush2.bf16.msra.mxu0 %v7343_v20 }
 0x6d5   : > { %3086 = vmatprep.subr.bf16.mxu0 %v7349_v23 }
 0x6d6   : > { %3391 = vmatpush1.bf16.msra.mxu1 %v7238_v29 }
 0x6d7   : > { %3392 = vmatprep.subr.bf16.mxu1 %v7241_v31 }
 0x6d8   : > { %3087 = vmatpush2.bf16.msra.mxu0 %v7351_v24 }
 0x6d9   : > { %3088 = vmatprep.subr.bf16.mxu0 %v7357_v30 }
 0x6da   : > { %3393 = vmatpush1.bf16.msra.mxu1 %v7244_v36 }
 0x6db   : > { %3394 = vmatprep.subr.bf16.mxu1 %v7247_v35 }
 0x6dc   : > { %3089 = vmatpush2.bf16.msra.mxu0 %v7359_v32 }
 0x6dd   : > { %3090 = vmatprep.subr.bf16.mxu0 %v7361_v37 }
 0x6de   : > { %3395 = vmatpush1.bf16.msra.mxu1 %v7250_v38 }
 0x6df   : > { %3396 = vmatprep.subr.bf16.mxu1 %v7301_v22 }
 0x6e0   : > { %3091 = vmatpush2.bf16.msra.mxu0 %v7366_v39 }
 0x6e1   : > { %3092 = vmatprep.subr.bf16.mxu0 %v7370_v16 }
 0x6e2   : > { %3397 = vmatpush1.bf16.msra.mxu1 %v7303_v34 }
 0x6e3   : > { %3398 = vmatprep.subr.bf16.mxu1 %v7309_v47 }
 0x6e4   : > { %3093 = vmatpush2.bf16.msra.mxu0 %v7374_v58 }
 0x6e5   : > { %3706 = vmatprep.subr.bf16.mxu0 %v7219_v5 }
 0x6e6   : > { %3399 = vmatpush1.bf16.msra.mxu1 %v7311_v51 }
 0x6e7   : > { %3400 = vmatprep.subr.bf16.mxu1 %v7317_v57 }
 0x6ea   : > { %3401 = vmatpush2.bf16.msra.mxu1 %v7319_v2 }
 0x6eb   : > { %3402 = vmatprep.subr.bf16.mxu1 %v7325_v42 }
 0x6ee   : > { %3403 = vmatpush2.bf16.msra.mxu1 %v7327_v41 }
 0x6ef   : > { %3404 = vmatprep.subr.bf16.mxu1 %v7333_v45 }
 0x6f2   : > { %3405 = vmatpush2.bf16.msra.mxu1 %v7335_v19 }
 0x6f3   : > { %3406 = vmatprep.subr.bf16.mxu1 %v7341_v15 }
 0x6f6   : > { %3407 = vmatpush2.bf16.msra.mxu1 %v7343_v20 }
 0x6f7   : > { %3408 = vmatprep.subr.bf16.mxu1 %v7349_v23 }
 0x6fa   : > { %3409 = vmatpush2.bf16.msra.mxu1 %v7351_v24 }
 0x6fb   : > { %3410 = vmatprep.subr.bf16.mxu1 %v7357_v30 }
 0x6fe   : > { %3411 = vmatpush2.bf16.msra.mxu1 %v7359_v32 }
 0x6ff   : > { %3412 = vmatprep.subr.bf16.mxu1 %v7361_v37 }
 0x702   : > { %3413 = vmatpush2.bf16.msra.mxu1 %v7366_v39 }
 0x703   : > { %3414 = vmatprep.subr.bf16.mxu1 %v7370_v16 }
 0x706   : > { %3415 = vmatpush2.bf16.msra.mxu1 %v7374_v58 }
 0x707   : > { %4028 = vmatprep.subr.bf16.mxu1 %v7219_v5  ;;  %v2737_v5 = vrot.slane %v2515_v4, %v6666_v33 }
 0x789   : > { %v2774_v7 = vpop.f32.mrf.mxu1 }
 0x78a   : > { %v2775_v10 = vadd.f32 %v2774_v7, %v2733_v6 }
 0x78b   : > { %v2776_v8 = vpop.f32.mrf.mxu1 }
 0x78c   : > { %v2777_v13 = vadd.f32 %v2776_v8, %v2737_v5  ;;  %v2842_v5 = vmul.f32 0.033333335, %v7284_v40 }
 0x78d   : > { %v2778_v14 = vpop.f32.mrf.mxu1 }
 0x78e   : > { %v2783_v18 = vcombine.low %v2775_v10, %v2777_v13 }
 0x78f   : > { %v2779_v62 = vpop.f32.mrf.mxu1 }
 0x790   : > { %v2790_v44 = vrot.slane %v2783_v18, %v6775_v1 }
 0x792   : > { %v2797_v46 = vrot.slane %v2790_v44, %v6775_v1 }
 0x794   : > { %v2799_v17 = vadd.f32 %v2797_v46, %v7276_v12  ;;  %5798 = vst.msk [vmem:[%s6580_s22 + $0xe] sm:$0x3] %vm6785_vm0, %v2797_v46 }
 0x796   : > { %v2800_v49 = vmul.f32 0.5, %v2799_v17 }
 0x798   : > { %v2801_v55 = vsub.f32 %v2800_v49, %v7274_v11 }
 0x79a   : > { %v2802_v61 = vmul.f32 0.5, %v2801_v55 }
 0x79c   : > { %v2803_v63 = vadd.f32 %v2802_v61, %v7274_v11  ;;  %v2843_v11 = vsub.f32 %v7284_v40, %v2842_v5  ;;  %v2822_v40 = vrot.slane %v7388_v53, %v6770_v56 }
 0x79e   : > { %vm2804_vm8 = vcmp.gt.f32.partialorder %v2803_v63, %v7401_v26 }
 0x79f   : > { %v5797_v50 = vsel %vm2804_vm8, 1.0, %v6472_v0 }
 0x7a0   : > { %v2838_v27 = vmul.f32 0.33333334, %v5797_v50  ;;  %v2807_v52 = vsub.f32 1.0, %v5797_v50 }
 0x7a2   : > { %v2839_v3 = vsub.f32 %v2838_v27, %v7280_v21  ;;  %v7406_v12 = vmul.f32 %v2807_v52, %v2803_v63  ;;  %v7408_v4 = vmul.f32 %v2807_v52, %v2800_v49 }
 0x7a4   : > { %v2840_v6 = vmul.f32 0.016666668, %v2839_v3 }
 0x7a6   : > { %v7412_v7 = vadd.f32 %v2840_v6, %v7280_v21  ;;  %v5799_v21 = vld [vmem:[%s6578_s20 + $0x10] sm:$0x3] }
 0x7a7   : > { %v2814_v44 = vunpack.c.l.bf16 %v5799_v21 }
 0x7a8   : > { %v2844_v8 = vmul.f32 0.1, %v7412_v7 }
 0x7a9   : > { %v2824_v46 = vsub.f32 %v2814_v44, %v2822_v40 }
 0x7aa   : > { %v7416_v10 = vadd.f32 %v2844_v8, %v2843_v11 }
 0x7ab   : > { %v2825_v17 = vmul.f32 0.033333335, %v2824_v46 }
 0x7ac   : > { %v2854_v13 = vrot.slane %v7416_v10, %v6666_v33  ;;  %v2850_v14 = vrot.slane %v7416_v10, %v6718_v48 }
 0x7ad   : > { %v2833_v49 = vrot.slane %v2825_v17, %v6775_v1 }
 0x7ae   : > { %v2858_v18 = vpack.c.bf16 %v2854_v13, %v2854_v13  ;;  %v2857_v62 = vpack.c.bf16 %v2850_v14, %v2850_v14 }
 0x7af   : > { %v7458_v55 = vadd.f32 %v2833_v49, %v7388_v53 }
 0x7b0   : > { %3094 = vmatprep.mubr.bf16.mxu0 %v2858_v18 }
 0x7b1   : > { %3095 = vmatmul.mubr.bf16.vlgmr.msra.gmra.mxu0 %v2857_v62  ;;  %v2836_v61 = vmul.f32 92.9516, %v7458_v55 }
 0x7b2   : > { %3707 = vmatpush1.bf16.msra.mxu0 %v7217_v59 }
 0x7b3   : > { %3708 = vmatprep.subr.bf16.mxu0 %v7221_v60  ;;  %v2837_v63 = vadd.f32 10.0, %v2836_v61 }
 0x7b5   : > { %v3055_v50 = vrot.slane %v2837_v63, %v6718_v48  ;;  %v3059_v27 = vrot.slane %v2837_v63, %v6666_v33 }
 0x7b6   : > { %3709 = vmatpush1.bf16.msra.mxu0 %v7226_v25 }
 0x7b7   : > { %3710 = vmatprep.subr.bf16.mxu0 %v7229_v28 }
 0x7ba   : > { %3711 = vmatpush1.bf16.msra.mxu0 %v7232_v43 }
 0x7bb   : > { %3712 = vmatprep.subr.bf16.mxu0 %v7235_v9 }
 0x7be   : > { %3713 = vmatpush1.bf16.msra.mxu0 %v7238_v29 }
 0x7bf   : > { %3714 = vmatprep.subr.bf16.mxu0 %v7241_v31 }
 0x7c2   : > { %3715 = vmatpush1.bf16.msra.mxu0 %v7244_v36 }
 0x7c3   : > { %3716 = vmatprep.subr.bf16.mxu0 %v7247_v35 }
 0x7c6   : > { %3717 = vmatpush1.bf16.msra.mxu0 %v7250_v38 }
 0x7c7   : > { %3718 = vmatprep.subr.bf16.mxu0 %v7301_v22 }
 0x7ca   : > { %3719 = vmatpush1.bf16.msra.mxu0 %v7303_v34 }
 0x7cb   : > { %3720 = vmatprep.subr.bf16.mxu0 %v7309_v47 }
 0x7ce   : > { %3721 = vmatpush1.bf16.msra.mxu0 %v7311_v51 }
 0x7cf   : > { %3722 = vmatprep.subr.bf16.mxu0 %v7317_v57 }
 0x7d2   : > { %3723 = vmatpush2.bf16.msra.mxu0 %v7319_v2 }
 0x7d3   : > { %3724 = vmatprep.subr.bf16.mxu0 %v7325_v42 }
 0x7d6   : > { %3725 = vmatpush2.bf16.msra.mxu0 %v7327_v41 }
 0x7d7   : > { %3726 = vmatprep.subr.bf16.mxu0 %v7333_v45 }
 0x7da   : > { %3727 = vmatpush2.bf16.msra.mxu0 %v7335_v19 }
 0x7db   : > { %3728 = vmatprep.subr.bf16.mxu0 %v7341_v15 }
 0x7de   : > { %3729 = vmatpush2.bf16.msra.mxu0 %v7343_v20 }
 0x7df   : > { %3730 = vmatprep.subr.bf16.mxu0 %v7349_v23 }
 0x7e2   : > { %3731 = vmatpush2.bf16.msra.mxu0 %v7351_v24 }
 0x7e3   : > { %3732 = vmatprep.subr.bf16.mxu0 %v7357_v30 }
 0x7e6   : > { %3733 = vmatpush2.bf16.msra.mxu0 %v7359_v32 }
 0x7e7   : > { %3734 = vmatprep.subr.bf16.mxu0 %v7361_v37 }
 0x7ea   : > { %3735 = vmatpush2.bf16.msra.mxu0 %v7366_v39 }
 0x7eb   : > { %3736 = vmatprep.subr.bf16.mxu0 %v7370_v16 }
 0x7ee   : > { %3737 = vmatpush2.bf16.msra.mxu0 %v7374_v58 }
 0x871   : > { %v3096_v52 = vpop.f32.mrf.mxu0 }
 0x872   : > { %v3097_v6 = vadd.f32 %v3096_v52, %v3055_v50 }
 0x873   : > { %v3098_v3 = vpop.f32.mrf.mxu0 }
 0x874   : > { %v3099_v5 = vadd.f32 %v3098_v3, %v3059_v27  ;;  %v3164_v27 = vmul.f32 0.033333335, %v7416_v10 }
 0x875   : > { %v3100_v11 = vpop.f32.mrf.mxu0 }
 0x876   : > { %v3105_v8 = vcombine.low %v3097_v6, %v3099_v5 }
 0x877   : > { %v3101_v13 = vpop.f32.mrf.mxu0 }
 0x878   : > { %v3112_v14 = vrot.slane %v3105_v8, %v6775_v1 }
 0x87a   : > { %v3119_v18 = vrot.slane %v3112_v14, %v6775_v1 }
 0x87c   : > { %v3121_v53 = vadd.f32 %v3119_v18, %v7408_v4  ;;  %5833 = vst.msk [vmem:[%s6580_s22 + $0x10] sm:$0x3] %vm6785_vm0, %v3119_v18 }
 0x87e   : > { %v3122_v62 = vmul.f32 0.5, %v3121_v53 }
 0x880   : > { %v3123_v21 = vsub.f32 %v3122_v62, %v7406_v12 }
 0x882   : > { %v3124_v40 = vmul.f32 0.5, %v3123_v21 }
 0x884   : > { %v3125_v44 = vadd.f32 %v3124_v40, %v7406_v12  ;;  %v3165_v12 = vsub.f32 %v7416_v10, %v3164_v27  ;;  %v7577_v27 = vld [vmem:[#allocation2 + $0x40] ss:$8 sps:$4 sm:$0xff]  }
 0x886   : > { %vm3126_vm9 = vcmp.gt.f32.partialorder %v3125_v44, %v7401_v26 }
 0x887   : > { %v5832_v46 = vsel %vm3126_vm9, 1.0, %v6472_v0 }
 0x888   : > { %v3160_v17 = vmul.f32 0.33333334, %v5832_v46  ;;  %v3129_v49 = vsub.f32 1.0, %v5832_v46  ;;  %v7556_v46 = vld [vmem:[#allocation2 + $0x70] ss:$8 sps:$4 sm:$0xff]  }
 0x88a   : > { %v3161_v61 = vsub.f32 %v3160_v17, %v7412_v7  ;;  %v7474_v63 = vmul.f32 %v3129_v49, %v3125_v44  ;;  %v7476_v4 = vmul.f32 %v3129_v49, %v3122_v62  ;;  %v7558_v17 = vld [vmem:[#allocation2 + $0x74] ss:$8 sps:$4 sm:$0xff]   ;;  %v7560_v49 = vld [vmem:[#allocation2 + $0x64] ss:$8 sps:$4 sm:$0xff]  }
 0x88b   : > { %4350 = vmatprep.subr.bf16.mxu0 %v7558_v17 }
 0x88c   : > { %v3162_v50 = vmul.f32 0.016666668, %v3161_v61  ;;  %v7565_v61 = vld [vmem:[#allocation2 + $0x60] ss:$8 sps:$4 sm:$0xff]  }
 0x88e   : > { %v7480_v52 = vadd.f32 %v3162_v50, %v7412_v7  ;;  %v7574_v50 = vld [vmem:[#allocation2 + $0x44] ss:$8 sps:$4 sm:$0xff]  }
 0x890   : > { %v3166_v3 = vmul.f32 0.1, %v7480_v52 }
 0x892   : > { %v7484_v6 = vadd.f32 %v3166_v3, %v3165_v12  ;;  %v7583_v12 = vld [vmem:[#allocation2 + $0x30] ss:$8 sps:$4 sm:$0xff]   ;;  %v7586_v3 = vld [vmem:[#allocation2 + $0x24] ss:$8 sps:$4 sm:$0xff]  }
 0x894   : > { %v3176_v5 = vrot.slane %v7484_v6, %v6666_v33  ;;  %v3172_v11 = vrot.slane %v7484_v6, %v6718_v48  ;;  %v3486_v10 = vmul.f32 0.033333335, %v7484_v6 }
 0x896   : > { %v3180_v8 = vpack.c.bf16 %v3176_v5, %v3176_v5  ;;  %v3179_v13 = vpack.c.bf16 %v3172_v11, %v3172_v11  ;;  %v3487_v14 = vsub.f32 %v7484_v6, %v3486_v10  ;;  %v7589_v6 = vld [vmem:[#allocation2 + $0x20] ss:$8 sps:$4 sm:$0xff]   ;;  %v5869_v5 = vld [vmem:[%s6578_s20 + $0x14] sm:$0x3] }
 0x898   : > { %3416 = vmatprep.mubr.bf16.mxu1 %v3180_v8  ;;  %v3458_v8 = vunpack.c.l.bf16 %v5869_v5  ;;  %v7656_v5 = vld [vmem:[#allocation2 + $0xf4] ss:$8 sps:$4 sm:$0xff]  }
 0x899   : > { %3417 = vmatmul.mubr.bf16.vlgmr.msra.gmra.mxu1 %v3179_v13 }
 0x89a   : > { %4029 = vmatpush1.bf16.msra.mxu1 %v7217_v59  ;;  %v5834_v59 = vld [vmem:[%s6578_s20 + $0x12] sm:$0x3] }
 0x89b   : > { %4030 = vmatprep.subr.bf16.mxu1 %v7221_v60  ;;  %v3144_v60 = vrot.slane %v7458_v55, %v6770_v56 }
 0x89e   : > { %4031 = vmatpush1.bf16.msra.mxu1 %v7226_v25  ;;  %v3136_v25 = vunpack.c.l.bf16 %v5834_v59 }
 0x89f   : > { %4032 = vmatprep.subr.bf16.mxu1 %v7229_v28 }
 0x8a0   : > { %v3146_v28 = vsub.f32 %v3136_v25, %v3144_v60 }
 0x8a2   : > { %4033 = vmatpush1.bf16.msra.mxu1 %v7232_v43  ;;  %v3147_v43 = vmul.f32 0.033333335, %v3146_v28 }
 0x8a3   : > { %4034 = vmatprep.subr.bf16.mxu1 %v7235_v9 }
 0x8a4   : > { %v3155_v9 = vrot.slane %v3147_v43, %v6775_v1 }
 0x8a6   : > { %4035 = vmatpush1.bf16.msra.mxu1 %v7238_v29  ;;  %v7526_v29 = vadd.f32 %v3155_v9, %v7458_v55 }
 0x8a7   : > { %4036 = vmatprep.subr.bf16.mxu1 %v7241_v31 }
 0x8a8   : > { %v3158_v31 = vmul.f32 92.9516, %v7526_v29  ;;  %v3466_v11 = vrot.slane %v7526_v29, %v6770_v56 }
 0x8aa   : > { %4037 = vmatpush1.bf16.msra.mxu1 %v7244_v36  ;;  %v3159_v36 = vadd.f32 10.0, %v3158_v31  ;;  %v3468_v13 = vsub.f32 %v3458_v8, %v3466_v11  ;;  %v7658_v11 = vld [vmem:[#allocation2 + $0xf0] ss:$8 sps:$4 sm:$0xff]   ;;  %v7664_v8 = vld [vmem:[#allocation2 + $0xe4] ss:$8 sps:$4 sm:$0xff]  }
 0x8ab   : > { %4038 = vmatprep.subr.bf16.mxu1 %v7247_v35 }
 0x8ac   : > { %v3377_v35 = vrot.slane %v3159_v36, %v6718_v48  ;;  %v3469_v59 = vmul.f32 0.033333335, %v3468_v13  ;;  %v7666_v13 = vld [vmem:[#allocation2 + $0xe0] ss:$8 sps:$4 sm:$0xff]  }
 0x8ae   : > { %4039 = vmatpush1.bf16.msra.mxu1 %v7250_v38  ;;  %v3381_v38 = vrot.slane %v3159_v36, %v6666_v33  ;;  %v3477_v60 = vrot.slane %v3469_v59, %v6775_v1  ;;  %v7672_v59 = vld [vmem:[#allocation2 + $0xd4] ss:$8 sps:$4 sm:$0xff]  }
 0x8af   : > { %4040 = vmatprep.subr.bf16.mxu1 %v7301_v22 }
 0x8b0   : > { %v7598_v25 = vadd.f32 %v3477_v60, %v7526_v29  ;;  %v7674_v60 = vld [vmem:[#allocation2 + $0xd0] ss:$8 sps:$4 sm:$0xff]  }
 0x8b2   : > { %4041 = vmatpush1.bf16.msra.mxu1 %v7303_v34  ;;  %v3480_v28 = vmul.f32 92.9516, %v7598_v25 }
 0x8b3   : > { %4042 = vmatprep.subr.bf16.mxu1 %v7309_v47 }
 0x8b4   : > { %v3481_v43 = vadd.f32 10.0, %v3480_v28  ;;  %v7680_v28 = vld [vmem:[#allocation2 + $0xc4] ss:$8 sps:$4 sm:$0xff]  }
 0x8b6   : > { %4043 = vmatpush1.bf16.msra.mxu1 %v7311_v51  ;;  %v3699_v9 = vrot.slane %v3481_v43, %v6718_v48  ;;  %v3703_v31 = vrot.slane %v3481_v43, %v6666_v33  ;;  %v7682_v43 = vld [vmem:[#allocation2 + $0xc0] ss:$8 sps:$4 sm:$0xff]  }
 0x8b7   : > { %4044 = vmatprep.subr.bf16.mxu1 %v7317_v57 }
 0x8ba   : > { %4045 = vmatpush2.bf16.msra.mxu1 %v7319_v2 }
 0x8bb   : > { %4046 = vmatprep.subr.bf16.mxu1 %v7325_v42 }
 0x8be   : > { %4047 = vmatpush2.bf16.msra.mxu1 %v7327_v41 }
 0x8bf   : > { %4048 = vmatprep.subr.bf16.mxu1 %v7333_v45 }
 0x8c2   : > { %4049 = vmatpush2.bf16.msra.mxu1 %v7335_v19 }
 0x8c3   : > { %4050 = vmatprep.subr.bf16.mxu1 %v7341_v15 }
 0x8c6   : > { %4051 = vmatpush2.bf16.msra.mxu1 %v7343_v20 }
 0x8c7   : > { %4052 = vmatprep.subr.bf16.mxu1 %v7349_v23 }
 0x8ca   : > { %4053 = vmatpush2.bf16.msra.mxu1 %v7351_v24 }
 0x8cb   : > { %4054 = vmatprep.subr.bf16.mxu1 %v7357_v30 }
 0x8ce   : > { %4055 = vmatpush2.bf16.msra.mxu1 %v7359_v32 }
 0x8cf   : > { %4056 = vmatprep.subr.bf16.mxu1 %v7361_v37 }
 0x8d2   : > { %4057 = vmatpush2.bf16.msra.mxu1 %v7366_v39 }
 0x8d3   : > { %4058 = vmatprep.subr.bf16.mxu1 %v7370_v16 }
 0x8d6   : > { %4059 = vmatpush2.bf16.msra.mxu1 %v7374_v58 }
 0x8d7   : > { %4672 = vmatprep.subr.bf16.mxu1 %v7558_v17 }
 0x959   : > { %v3418_v22 = vpop.f32.mrf.mxu1 }
 0x95a   : > { %v3419_v47 = vadd.f32 %v3418_v22, %v3377_v35 }
 0x95b   : > { %v3420_v34 = vpop.f32.mrf.mxu1 }
 0x95c   : > { %v3421_v51 = vadd.f32 %v3420_v34, %v3381_v38 }
 0x95d   : > { %v3422_v57 = vpop.f32.mrf.mxu1 }
 0x95e   : > { %v3427_v2 = vcombine.low %v3419_v47, %v3421_v51 }
 0x95f   : > { %v3423_v42 = vpop.f32.mrf.mxu1 }
 0x960   : > { %v3434_v41 = vrot.slane %v3427_v2, %v6775_v1 }
 0x962   : > { %v3441_v45 = vrot.slane %v3434_v41, %v6775_v1 }
 0x964   : > { %v3443_v19 = vadd.f32 %v3441_v45, %v7476_v4  ;;  %5868 = vst.msk [vmem:[%s6580_s22 + $0x12] sm:$0x3] %vm6785_vm0, %v3441_v45  ;;  %v7571_v4 = vld [vmem:[#allocation2 + $0x50] ss:$8 sps:$4 sm:$0xff]  }
 0x966   : > { %v3444_v15 = vmul.f32 0.5, %v3443_v19 }
 0x968   : > { %v3445_v20 = vsub.f32 %v3444_v15, %v7474_v63 }
 0x96a   : > { %v3446_v23 = vmul.f32 0.5, %v3445_v20 }
 0x96c   : > { %v3447_v24 = vadd.f32 %v3446_v23, %v7474_v63  ;;  %v7568_v63 = vld [vmem:[#allocation2 + $0x54] ss:$8 sps:$4 sm:$0xff]  }
 0x96e   : > { %vm3448_vm10 = vcmp.gt.f32.partialorder %v3447_v24, %v7401_v26 }
 0x96f   : > { %v5867_v30 = vsel %vm3448_vm10, 1.0, %v6472_v0 }
 0x970   : > { %v3482_v32 = vmul.f32 0.33333334, %v5867_v30  ;;  %v3451_v37 = vsub.f32 1.0, %v5867_v30 }
 0x972   : > { %v3483_v39 = vsub.f32 %v3482_v32, %v7480_v52  ;;  %v7542_v16 = vmul.f32 %v3451_v37, %v3447_v24  ;;  %v3453_v58 = vmul.f32 %v3451_v37, %v3444_v15 }
 0x974   : > { %v3484_v7 = vmul.f32 0.016666668, %v3483_v39 }
 0x976   : > { %v7546_v55 = vadd.f32 %v3484_v7, %v7480_v52  ;;  %v7580_v52 = vld [vmem:[#allocation2 + $0x34] ss:$8 sps:$4 sm:$0xff]  }
 0x978   : > { %v3488_v18 = vmul.f32 0.1, %v7546_v55 }
 0x97a   : > { %v7550_v53 = vadd.f32 %v3488_v18, %v3487_v14 }
 0x97c   : > { %v3498_v62 = vrot.slane %v7550_v53, %v6666_v33  ;;  %v3494_v21 = vrot.slane %v7550_v53, %v6718_v48  ;;  %v3808_v39 = vmul.f32 0.033333335, %v7550_v53 }
 0x97e   : > { %v3502_v40 = vpack.c.bf16 %v3498_v62, %v3498_v62  ;;  %v3501_v44 = vpack.c.bf16 %v3494_v21, %v3494_v21 }
 0x980   : > { %3738 = vmatprep.mubr.bf16.mxu0 %v3502_v40  ;;  %v7648_v40 = vld [vmem:[#allocation2 + $0x4] ss:$8 sps:$4 sm:$0xff]  }
 0x981   : > { %3739 = vmatmul.mubr.bf16.vlgmr.msra.gmra.mxu0 %v3501_v44  ;;  %v7650_v44 = vld [vmem:[#allocation2] ss:$8 sps:$4 sm:$0xff]  }
 0x982   : > { %4351 = vmatpush1.bf16.msra.mxu0 %v7556_v46 }
 0x983   : > { %4352 = vmatprep.subr.bf16.mxu0 %v7560_v49 }
 0x986   : > { %4353 = vmatpush1.bf16.msra.mxu0 %v7565_v61 }
 0x987   : > { %4354 = vmatprep.subr.bf16.mxu0 %v7568_v63 }
 0x98a   : > { %4355 = vmatpush1.bf16.msra.mxu0 %v7571_v4 }
 0x98b   : > { %4356 = vmatprep.subr.bf16.mxu0 %v7574_v50 }
 0x98e   : > { %4357 = vmatpush1.bf16.msra.mxu0 %v7577_v27 }
 0x98f   : > { %4358 = vmatprep.subr.bf16.mxu0 %v7580_v52 }
 0x992   : > { %4359 = vmatpush1.bf16.msra.mxu0 %v7583_v12 }
 0x993   : > { %4360 = vmatprep.subr.bf16.mxu0 %v7586_v3 }
 0x996   : > { %4361 = vmatpush1.bf16.msra.mxu0 %v7589_v6 }
 0xa41   : > { %v3740_v36 = vpop.f32.mrf.mxu0 }
 0xa42   : > { %v3741_v38 = vadd.f32 %v3740_v36, %v3699_v9  ;;  %v7688_v9 = vld [vmem:[#allocation2 + $0xb4] ss:$8 sps:$4 sm:$0xff]   ;;  %v7696_v36 = vld [vmem:[#allocation2 + $0xa4] ss:$8 sps:$4 sm:$0xff]  }
 0xa43   : > { %v3742_v35 = vpop.f32.mrf.mxu0 }
 0xa44   : > { %v3743_v22 = vadd.f32 %v3742_v35, %v3703_v31  ;;  %v7690_v31 = vld [vmem:[#allocation2 + $0xb0] ss:$8 sps:$4 sm:$0xff]   ;;  %v7698_v35 = vld [vmem:[#allocation2 + $0xa0] ss:$8 sps:$4 sm:$0xff]  }
 0xa45   : > { %v3744_v34 = vpop.f32.mrf.mxu0 }
 0xa46   : > { %v3749_v47 = vcombine.low %v3741_v38, %v3743_v22  ;;  %v7700_v38 = vld [vmem:[#allocation2 + $0x94] ss:$8 sps:$4 sm:$0xff]   ;;  %v7705_v22 = vld [vmem:[#allocation2 + $0x90] ss:$8 sps:$4 sm:$0xff]   ;;  %v7709_v34 = vld [vmem:[#allocation2 + $0x84] ss:$8 sps:$4 sm:$0xff]  }
 0xa47   : > { %v3745_v51 = vpop.f32.mrf.mxu0 }
 0xa48   : > { %v3756_v57 = vrot.slane %v3749_v47, %v6775_v1  ;;  %v7713_v47 = vld [vmem:[#allocation2 + $0x80] ss:$8 sps:$4 sm:$0xff]   ;;  %v5904_v51 = vld [vmem:[%s6578_s20 + $0x16] sm:$0x3] }
 0xa4a   : > { %v3763_v2 = vrot.slane %v3756_v57, %v6775_v1  ;;  %v3788_v57 = vrot.slane %v7598_v25, %v6770_v56 }
 0xa4c   : > { %v3765_v29 = vadd.f32 %v3763_v2, %v3453_v58  ;;  %5903 = vst.msk [vmem:[%s6580_s22 + $0x14] sm:$0x3] %vm6785_vm0, %v3763_v2  ;;  %v3780_v2 = vunpack.c.l.bf16 %v5904_v51 }
 0xa4e   : > { %v3766_v42 = vmul.f32 0.5, %v3765_v29  ;;  %v3790_v29 = vsub.f32 %v3780_v2, %v3788_v57 }
 0xa50   : > { %v3767_v41 = vsub.f32 %v3766_v42, %v7542_v16 }
 0xa52   : > { %v3768_v45 = vmul.f32 0.5, %v3767_v41 }
 0xa54   : > { %v3769_v19 = vadd.f32 %v3768_v45, %v7542_v16  ;;  %v3809_v16 = vsub.f32 %v7550_v53, %v3808_v39  ;;  %v7642_v53 = vld [vmem:[#allocation2 + $0x10] ss:$8 sps:$4 sm:$0xff]  }
 0xa56   : > { %vm3770_vm11 = vcmp.gt.f32.partialorder %v3769_v19, %v7401_v26 }
 0xa57   : > { %v5902_v15 = vsel %vm3770_vm11, 1.0, %v6472_v0 }
 0xa58   : > { %v3804_v20 = vmul.f32 0.33333334, %v5902_v15  ;;  %v3773_v23 = vsub.f32 1.0, %v5902_v15 }
 0xa5a   : > { %v3805_v24 = vsub.f32 %v3804_v20, %v7546_v55  ;;  %v7613_v30 = vmul.f32 %v3773_v23, %v3769_v19  ;;  %v7615_v32 = vmul.f32 %v3773_v23, %v3766_v42  ;;  %v3791_v42 = vmul.f32 0.033333335, %v3790_v29 }
 0xa5c   : > { %v3806_v37 = vmul.f32 0.016666668, %v3805_v24  ;;  %v3799_v41 = vrot.slane %v3791_v42, %v6775_v1 }
 0xa5e   : > { %v7619_v58 = vadd.f32 %v3806_v37, %v7546_v55  ;;  %v7640_v55 = vld [vmem:[#allocation2 + $0x14] ss:$8 sps:$4 sm:$0xff]   ;;  %v7727_v45 = vadd.f32 %v3799_v41, %v7598_v25 }
 0xa5f   : > { %4362 = vmatprep.subr.bf16.mxu0 %v7640_v55 }
 0xa60   : > { %v3810_v7 = vmul.f32 0.1, %v7619_v58  ;;  %4363 = vmatpush1.bf16.msra.mxu0 %v7642_v53  ;;  %v3802_v19 = vmul.f32 92.9516, %v7727_v45 }
 0xa61   : > { %4364 = vmatprep.subr.bf16.mxu0 %v7648_v40 }
 0xa62   : > { %v7623_v10 = vadd.f32 %v3810_v7, %v3809_v16  ;;  %v3803_v15 = vadd.f32 10.0, %v3802_v19 }
 0xa64   : > { %v3820_v14 = vrot.slane %v7623_v10, %v6666_v33  ;;  %v3816_v18 = vrot.slane %v7623_v10, %v6718_v48  ;;  %4365 = vmatpush1.bf16.msra.mxu0 %v7650_v44  ;;  %v4021_v20 = vrot.slane %v3803_v15, %v6718_v48 }
 0xa65   : > { %4366 = vmatprep.subr.bf16.mxu0 %v7656_v5 }
 0xa66   : > { %v3824_v62 = vpack.c.bf16 %v3820_v14, %v3820_v14  ;;  %v3823_v21 = vpack.c.bf16 %v3816_v18, %v3816_v18 }
 0xa68   : > { %4060 = vmatprep.mubr.bf16.mxu1 %v3824_v62  ;;  %4367 = vmatpush2.bf16.msra.mxu0 %v7658_v11 }
 0xa69   : > { %4061 = vmatmul.mubr.bf16.vlgmr.msra.gmra.mxu1 %v3823_v21  ;;  %4368 = vmatprep.subr.bf16.mxu0 %v7664_v8 }
 0xa6a   : > { %4673 = vmatpush1.bf16.msra.mxu1 %v7556_v46 }
 0xa6b   : > { %4674 = vmatprep.subr.bf16.mxu1 %v7560_v49 }
 0xa6c   : > { %4369 = vmatpush2.bf16.msra.mxu0 %v7666_v13 }
 0xa6d   : > { %4370 = vmatprep.subr.bf16.mxu0 %v7672_v59 }
 0xa6e   : > { %4675 = vmatpush1.bf16.msra.mxu1 %v7565_v61 }
 0xa6f   : > { %4676 = vmatprep.subr.bf16.mxu1 %v7568_v63 }
 0xa70   : > { %4371 = vmatpush2.bf16.msra.mxu0 %v7674_v60 }
 0xa71   : > { %4372 = vmatprep.subr.bf16.mxu0 %v7680_v28 }
 0xa72   : > { %4677 = vmatpush1.bf16.msra.mxu1 %v7571_v4 }
 0xa73   : > { %4678 = vmatprep.subr.bf16.mxu1 %v7574_v50 }
 0xa74   : > { %4373 = vmatpush2.bf16.msra.mxu0 %v7682_v43 }
 0xa75   : > { %4374 = vmatprep.subr.bf16.mxu0 %v7688_v9 }
 0xa76   : > { %4679 = vmatpush1.bf16.msra.mxu1 %v7577_v27 }
 0xa77   : > { %4680 = vmatprep.subr.bf16.mxu1 %v7580_v52 }
 0xa78   : > { %4375 = vmatpush2.bf16.msra.mxu0 %v7690_v31 }
 0xa79   : > { %4376 = vmatprep.subr.bf16.mxu0 %v7696_v36 }
 0xa7a   : > { %4681 = vmatpush1.bf16.msra.mxu1 %v7583_v12 }
 0xa7b   : > { %4682 = vmatprep.subr.bf16.mxu1 %v7586_v3 }
 0xa7c   : > { %4377 = vmatpush2.bf16.msra.mxu0 %v7698_v35 }
 0xa7d   : > { %4378 = vmatprep.subr.bf16.mxu0 %v7700_v38 }
 0xa7e   : > { %4683 = vmatpush1.bf16.msra.mxu1 %v7589_v6 }
 0xa7f   : > { %4684 = vmatprep.subr.bf16.mxu1 %v7640_v55 }
 0xa80   : > { %4379 = vmatpush2.bf16.msra.mxu0 %v7705_v22 }
 0xa81   : > { %4380 = vmatprep.subr.bf16.mxu0 %v7709_v34 }
 0xa82   : > { %4685 = vmatpush1.bf16.msra.mxu1 %v7642_v53 }
 0xa83   : > { %4686 = vmatprep.subr.bf16.mxu1 %v7648_v40 }
 0xa84   : > { %4381 = vmatpush2.bf16.msra.mxu0 %v7713_v47 }
 0xa85   : > { %4994 = vmatprep.subr.bf16.mxu0 %v7558_v17 }
 0xa86   : > { %4687 = vmatpush1.bf16.msra.mxu1 %v7650_v44 }
 0xa87   : > { %4688 = vmatprep.subr.bf16.mxu1 %v7656_v5 }
 0xa8a   : > { %4689 = vmatpush2.bf16.msra.mxu1 %v7658_v11 }
 0xa8b   : > { %4690 = vmatprep.subr.bf16.mxu1 %v7664_v8 }
 0xa8e   : > { %4691 = vmatpush2.bf16.msra.mxu1 %v7666_v13 }
 0xa8f   : > { %4692 = vmatprep.subr.bf16.mxu1 %v7672_v59 }
 0xa92   : > { %4693 = vmatpush2.bf16.msra.mxu1 %v7674_v60 }
 0xa93   : > { %4694 = vmatprep.subr.bf16.mxu1 %v7680_v28 }
 0xa96   : > { %4695 = vmatpush2.bf16.msra.mxu1 %v7682_v43 }
 0xa97   : > { %4696 = vmatprep.subr.bf16.mxu1 %v7688_v9 }
 0xa9a   : > { %4697 = vmatpush2.bf16.msra.mxu1 %v7690_v31 }
 0xa9b   : > { %4698 = vmatprep.subr.bf16.mxu1 %v7696_v36 }
 0xa9e   : > { %4699 = vmatpush2.bf16.msra.mxu1 %v7698_v35 }
 0xa9f   : > { %4700 = vmatprep.subr.bf16.mxu1 %v7700_v38 }
 0xaa2   : > { %4701 = vmatpush2.bf16.msra.mxu1 %v7705_v22 }
 0xaa3   : > { %4702 = vmatprep.subr.bf16.mxu1 %v7709_v34 }
 0xaa6   : > { %4703 = vmatpush2.bf16.msra.mxu1 %v7713_v47 }
 0xaa7   : > { %5316 = vmatprep.subr.bf16.mxu1 %v7558_v17  ;;  %v4025_v17 = vrot.slane %v3803_v15, %v6666_v33 }
 0xb29   : > { %v4062_v23 = vpop.f32.mrf.mxu1 }
 0xb2a   : > { %v4063_v37 = vadd.f32 %v4062_v23, %v4021_v20 }
 0xb2b   : > { %v4064_v24 = vpop.f32.mrf.mxu1 }
 0xb2c   : > { %v4065_v39 = vadd.f32 %v4064_v24, %v4025_v17  ;;  %v4130_v17 = vmul.f32 0.033333335, %v7623_v10 }
 0xb2d   : > { %v4066_v16 = vpop.f32.mrf.mxu1 }
 0xb2e   : > { %v4071_v7 = vcombine.low %v4063_v37, %v4065_v39 }
 0xb2f   : > { %v4067_v14 = vpop.f32.mrf.mxu1 }
 0xb30   : > { %v4078_v18 = vrot.slane %v4071_v7, %v6775_v1 }
 0xb32   : > { %v4085_v62 = vrot.slane %v4078_v18, %v6775_v1 }
 0xb34   : > { %v4087_v25 = vadd.f32 %v4085_v62, %v7615_v32  ;;  %5938 = vst.msk [vmem:[%s6580_s22 + $0x16] sm:$0x3] %vm6785_vm0, %v4085_v62 }
 0xb36   : > { %v4088_v21 = vmul.f32 0.5, %v4087_v25 }
 0xb38   : > { %v4089_v51 = vsub.f32 %v4088_v21, %v7613_v30 }
 0xb3a   : > { %v4090_v57 = vmul.f32 0.5, %v4089_v51 }
 0xb3c   : > { %v4091_v2 = vadd.f32 %v4090_v57, %v7613_v30  ;;  %v4131_v30 = vsub.f32 %v7623_v10, %v4130_v17  ;;  %v4110_v10 = vrot.slane %v7727_v45, %v6770_v56 }
 0xb3e   : > { %vm4092_vm12 = vcmp.gt.f32.partialorder %v4091_v2, %v7401_v26 }
 0xb3f   : > { %v5937_v29 = vsel %vm4092_vm12, 1.0, %v6472_v0 }
 0xb40   : > { %v4126_v42 = vmul.f32 0.33333334, %v5937_v29  ;;  %v4095_v41 = vsub.f32 1.0, %v5937_v29 }
 0xb42   : > { %v4127_v19 = vsub.f32 %v4126_v42, %v7619_v58  ;;  %v7743_v15 = vmul.f32 %v4095_v41, %v4091_v2  ;;  %v7745_v32 = vmul.f32 %v4095_v41, %v4088_v21 }
 0xb44   : > { %v4128_v20 = vmul.f32 0.016666668, %v4127_v19 }
 0xb46   : > { %v7749_v23 = vadd.f32 %v4128_v20, %v7619_v58  ;;  %v5939_v58 = vld [vmem:[%s6578_s20 + $0x18] sm:$0x3] }
 0xb47   : > { %v4102_v18 = vunpack.c.l.bf16 %v5939_v58 }
 0xb48   : > { %v4132_v24 = vmul.f32 0.1, %v7749_v23 }
 0xb49   : > { %v4112_v62 = vsub.f32 %v4102_v18, %v4110_v10 }
 0xb4a   : > { %v7753_v37 = vadd.f32 %v4132_v24, %v4131_v30 }
 0xb4b   : > { %v4113_v25 = vmul.f32 0.033333335, %v4112_v62 }
 0xb4c   : > { %v4142_v39 = vrot.slane %v7753_v37, %v6666_v33  ;;  %v4138_v16 = vrot.slane %v7753_v37, %v6718_v48 }
 0xb4d   : > { %v4121_v21 = vrot.slane %v4113_v25, %v6775_v1 }
 0xb4e   : > { %v4146_v7 = vpack.c.bf16 %v4142_v39, %v4142_v39  ;;  %v4145_v14 = vpack.c.bf16 %v4138_v16, %v4138_v16 }
 0xb4f   : > { %v7795_v51 = vadd.f32 %v4121_v21, %v7727_v45 }
 0xb50   : > { %4382 = vmatprep.mubr.bf16.mxu0 %v4146_v7 }
 0xb51   : > { %4383 = vmatmul.mubr.bf16.vlgmr.msra.gmra.mxu0 %v4145_v14  ;;  %v4124_v57 = vmul.f32 92.9516, %v7795_v51 }
 0xb52   : > { %4995 = vmatpush1.bf16.msra.mxu0 %v7556_v46 }
 0xb53   : > { %4996 = vmatprep.subr.bf16.mxu0 %v7560_v49  ;;  %v4125_v2 = vadd.f32 10.0, %v4124_v57 }
 0xb55   : > { %v4343_v29 = vrot.slane %v4125_v2, %v6718_v48  ;;  %v4347_v42 = vrot.slane %v4125_v2, %v6666_v33 }
 0xb56   : > { %4997 = vmatpush1.bf16.msra.mxu0 %v7565_v61 }
 0xb57   : > { %4998 = vmatprep.subr.bf16.mxu0 %v7568_v63 }
 0xb5a   : > { %4999 = vmatpush1.bf16.msra.mxu0 %v7571_v4 }
 0xb5b   : > { %5000 = vmatprep.subr.bf16.mxu0 %v7574_v50 }
 0xb5e   : > { %5001 = vmatpush1.bf16.msra.mxu0 %v7577_v27 }
 0xb5f   : > { %5002 = vmatprep.subr.bf16.mxu0 %v7580_v52 }
 0xb62   : > { %5003 = vmatpush1.bf16.msra.mxu0 %v7583_v12 }
 0xb63   : > { %5004 = vmatprep.subr.bf16.mxu0 %v7586_v3 }
 0xb66   : > { %5005 = vmatpush1.bf16.msra.mxu0 %v7589_v6 }
 0xb67   : > { %5006 = vmatprep.subr.bf16.mxu0 %v7640_v55 }
 0xb6a   : > { %5007 = vmatpush1.bf16.msra.mxu0 %v7642_v53 }
 0xb6b   : > { %5008 = vmatprep.subr.bf16.mxu0 %v7648_v40 }
 0xb6e   : > { %5009 = vmatpush1.bf16.msra.mxu0 %v7650_v44 }
 0xb6f   : > { %5010 = vmatprep.subr.bf16.mxu0 %v7656_v5 }
 0xb72   : > { %5011 = vmatpush2.bf16.msra.mxu0 %v7658_v11 }
 0xb73   : > { %5012 = vmatprep.subr.bf16.mxu0 %v7664_v8 }
 0xb76   : > { %5013 = vmatpush2.bf16.msra.mxu0 %v7666_v13 }
 0xb77   : > { %5014 = vmatprep.subr.bf16.mxu0 %v7672_v59 }
 0xb7a   : > { %5015 = vmatpush2.bf16.msra.mxu0 %v7674_v60 }
 0xb7b   : > { %5016 = vmatprep.subr.bf16.mxu0 %v7680_v28 }
 0xb7e   : > { %5017 = vmatpush2.bf16.msra.mxu0 %v7682_v43 }
 0xb7f   : > { %5018 = vmatprep.subr.bf16.mxu0 %v7688_v9 }
 0xb82   : > { %5019 = vmatpush2.bf16.msra.mxu0 %v7690_v31 }
 0xb83   : > { %5020 = vmatprep.subr.bf16.mxu0 %v7696_v36 }
 0xb86   : > { %5021 = vmatpush2.bf16.msra.mxu0 %v7698_v35 }
 0xb87   : > { %5022 = vmatprep.subr.bf16.mxu0 %v7700_v38 }
 0xb8a   : > { %5023 = vmatpush2.bf16.msra.mxu0 %v7705_v22 }
 0xb8b   : > { %5024 = vmatprep.subr.bf16.mxu0 %v7709_v34 }
 0xb8e   : > { %5025 = vmatpush2.bf16.msra.mxu0 %v7713_v47 }
 0xc11   : > { %v4384_v41 = vpop.f32.mrf.mxu0 }
 0xc12   : > { %v4385_v20 = vadd.f32 %v4384_v41, %v4343_v29 }
 0xc13   : > { %v4386_v19 = vpop.f32.mrf.mxu0 }
 0xc14   : > { %v4387_v17 = vadd.f32 %v4386_v19, %v4347_v42  ;;  %v4452_v42 = vmul.f32 0.033333335, %v7753_v37 }
 0xc15   : > { %v4388_v30 = vpop.f32.mrf.mxu0 }
 0xc16   : > { %v4393_v24 = vcombine.low %v4385_v20, %v4387_v17 }
 0xc17   : > { %v4389_v39 = vpop.f32.mrf.mxu0 }
 0xc18   : > { %v4400_v16 = vrot.slane %v4393_v24, %v6775_v1 }
 0xc1a   : > { %v4407_v7 = vrot.slane %v4400_v16, %v6775_v1 }
 0xc1c   : > { %v4409_v45 = vadd.f32 %v4407_v7, %v7745_v32  ;;  %5973 = vst.msk [vmem:[%s6580_s22 + $0x18] sm:$0x3] %vm6785_vm0, %v4407_v7 }
 0xc1e   : > { %v4410_v14 = vmul.f32 0.5, %v4409_v45 }
 0xc20   : > { %v4411_v58 = vsub.f32 %v4410_v14, %v7743_v15 }
 0xc22   : > { %v4412_v10 = vmul.f32 0.5, %v4411_v58 }
 0xc24   : > { %v4413_v18 = vadd.f32 %v4412_v10, %v7743_v15  ;;  %v4453_v15 = vsub.f32 %v7753_v37, %v4452_v42 }
 0xc26   : > { %vm4414_vm13 = vcmp.gt.f32.partialorder %v4413_v18, %v7401_v26 }
 0xc27   : > { %v5972_v62 = vsel %vm4414_vm13, 1.0, %v6472_v0 }
 0xc28   : > { %v4448_v25 = vmul.f32 0.33333334, %v5972_v62  ;;  %v4417_v21 = vsub.f32 1.0, %v5972_v62 }
 0xc2a   : > { %v4449_v57 = vsub.f32 %v4448_v25, %v7749_v23  ;;  %v7811_v2 = vmul.f32 %v4417_v21, %v4413_v18  ;;  %v7813_v32 = vmul.f32 %v4417_v21, %v4410_v14  ;;  %v6009_v18 = vld [vmem:[%s6578_s20 + $0x1c] sm:$0x3] }
 0xc2b   : > { %v4746_v25 = vunpack.c.l.bf16 %v6009_v18 }
 0xc2c   : > { %v4450_v29 = vmul.f32 0.016666668, %v4449_v57 }
 0xc2e   : > { %v7817_v41 = vadd.f32 %v4450_v29, %v7749_v23  ;;  %v6044_v29 = vld [vmem:[%s6578_s20 + $0x1e] sm:$0x3] }
 0xc30   : > { %v4454_v19 = vmul.f32 0.1, %v7817_v41 }
 0xc32   : > { %v7821_v20 = vadd.f32 %v4454_v19, %v4453_v15 }
 0xc34   : > { %v4464_v17 = vrot.slane %v7821_v20, %v6666_v33  ;;  %v4460_v30 = vrot.slane %v7821_v20, %v6718_v48  ;;  %v4774_v37 = vmul.f32 0.033333335, %v7821_v20 }
 0xc36   : > { %v4468_v24 = vpack.c.bf16 %v4464_v17, %v4464_v17  ;;  %v4467_v39 = vpack.c.bf16 %v4460_v30, %v4460_v30  ;;  %v4775_v16 = vsub.f32 %v7821_v20, %v4774_v37 }
 0xc38   : > { %4704 = vmatprep.mubr.bf16.mxu1 %v4468_v24 }
 0xc39   : > { %4705 = vmatmul.mubr.bf16.vlgmr.msra.gmra.mxu1 %v4467_v39 }
 0xc3a   : > { %5317 = vmatpush1.bf16.msra.mxu1 %v7556_v46  ;;  %v5974_v46 = vld [vmem:[%s6578_s20 + $0x1a] sm:$0x3] }
 0xc3b   : > { %5318 = vmatprep.subr.bf16.mxu1 %v7560_v49  ;;  %v4432_v49 = vrot.slane %v7795_v51, %v6770_v56 }
 0xc3e   : > { %5319 = vmatpush1.bf16.msra.mxu1 %v7565_v61  ;;  %v4424_v61 = vunpack.c.l.bf16 %v5974_v46 }
 0xc3f   : > { %5320 = vmatprep.subr.bf16.mxu1 %v7568_v63 }
 0xc40   : > { %v4434_v63 = vsub.f32 %v4424_v61, %v4432_v49 }
 0xc42   : > { %5321 = vmatpush1.bf16.msra.mxu1 %v7571_v4  ;;  %v4435_v4 = vmul.f32 0.033333335, %v4434_v63 }
 0xc43   : > { %5322 = vmatprep.subr.bf16.mxu1 %v7574_v50 }
 0xc44   : > { %v4443_v50 = vrot.slane %v4435_v4, %v6775_v1 }
 0xc46   : > { %5323 = vmatpush1.bf16.msra.mxu1 %v7577_v27  ;;  %v4445_v27 = vadd.f32 %v4443_v50, %v7795_v51 }
 0xc47   : > { %5324 = vmatprep.subr.bf16.mxu1 %v7580_v52 }
 0xc48   : > { %v4446_v52 = vmul.f32 92.9516, %v4445_v27  ;;  %v4754_v62 = vrot.slane %v4445_v27, %v6770_v56 }
 0xc4a   : > { %5325 = vmatpush1.bf16.msra.mxu1 %v7583_v12  ;;  %v4447_v12 = vadd.f32 10.0, %v4446_v52  ;;  %v4756_v21 = vsub.f32 %v4746_v25, %v4754_v62 }
 0xc4b   : > { %5326 = vmatprep.subr.bf16.mxu1 %v7586_v3 }
 0xc4c   : > { %v4665_v3 = vrot.slane %v4447_v12, %v6718_v48  ;;  %v4757_v57 = vmul.f32 0.033333335, %v4756_v21 }
 0xc4e   : > { %5327 = vmatpush1.bf16.msra.mxu1 %v7589_v6  ;;  %v4669_v6 = vrot.slane %v4447_v12, %v6666_v33 }
 0xc4f   : > { %5328 = vmatprep.subr.bf16.mxu1 %v7640_v55 }
 0xc52   : > { %5329 = vmatpush1.bf16.msra.mxu1 %v7642_v53 }
 0xc53   : > { %5330 = vmatprep.subr.bf16.mxu1 %v7648_v40 }
 0xc56   : > { %5331 = vmatpush1.bf16.msra.mxu1 %v7650_v44 }
 0xc57   : > { %5332 = vmatprep.subr.bf16.mxu1 %v7656_v5 }
 0xc5a   : > { %5333 = vmatpush2.bf16.msra.mxu1 %v7658_v11 }
 0xc5b   : > { %5334 = vmatprep.subr.bf16.mxu1 %v7664_v8 }
 0xc5e   : > { %5335 = vmatpush2.bf16.msra.mxu1 %v7666_v13 }
 0xc5f   : > { %5336 = vmatprep.subr.bf16.mxu1 %v7672_v59 }
 0xc62   : > { %5337 = vmatpush2.bf16.msra.mxu1 %v7674_v60 }
 0xc63   : > { %5338 = vmatprep.subr.bf16.mxu1 %v7680_v28 }
 0xc66   : > { %5339 = vmatpush2.bf16.msra.mxu1 %v7682_v43 }
 0xc67   : > { %5340 = vmatprep.subr.bf16.mxu1 %v7688_v9 }
 0xc6a   : > { %5341 = vmatpush2.bf16.msra.mxu1 %v7690_v31 }
 0xc6b   : > { %5342 = vmatprep.subr.bf16.mxu1 %v7696_v36 }
 0xc6e   : > { %5343 = vmatpush2.bf16.msra.mxu1 %v7698_v35 }
 0xc6f   : > { %5344 = vmatprep.subr.bf16.mxu1 %v7700_v38 }
 0xc72   : > { %5345 = vmatpush2.bf16.msra.mxu1 %v7705_v22 }
 0xc73   : > { %5346 = vmatprep.subr.bf16.mxu1 %v7709_v34 }
 0xc76   : > { %5347 = vmatpush2.bf16.msra.mxu1 %v7713_v47 }
 0xcf9   : > { %v4706_v55 = vpop.f32.mrf.mxu1 }
 0xcfa   : > { %v4707_v40 = vadd.f32 %v4706_v55, %v4665_v3 }
 0xcfb   : > { %v4708_v53 = vpop.f32.mrf.mxu1 }
 0xcfc   : > { %v4709_v44 = vadd.f32 %v4708_v53, %v4669_v6 }
 0xcfd   : > { %v4710_v5 = vpop.f32.mrf.mxu1 }
 0xcfe   : > { %v4715_v11 = vcombine.low %v4707_v40, %v4709_v44  ;;  %v7896_v44 = vld [vmem:[#allocation6 + $0x6] ss:$8 sm:$0x3] }
 0xcff   : > { %v4711_v8 = vpop.f32.mrf.mxu1 }
 0xd00   : > { %v4722_v13 = vrot.slane %v4715_v11, %v6775_v1 }
 0xd02   : > { %v4729_v59 = vrot.slane %v4722_v13, %v6775_v1 }
 0xd04   : > { %v4731_v60 = vadd.f32 %v4729_v59, %v7813_v32  ;;  %6008 = vst.msk [vmem:[%s6580_s22 + $0x1a] sm:$0x3] %vm6785_vm0, %v4729_v59 }
 0xd06   : > { %v4732_v28 = vmul.f32 0.5, %v4731_v60 }
 0xd08   : > { %v4733_v43 = vsub.f32 %v4732_v28, %v7811_v2 }
 0xd0a   : > { %v4734_v9 = vmul.f32 0.5, %v4733_v43 }
 0xd0c   : > { %v4735_v31 = vadd.f32 %v4734_v9, %v7811_v2  ;;  %v4765_v2 = vrot.slane %v4757_v57, %v6775_v1 }
 0xd0e   : > { %vm4736_vm14 = vcmp.gt.f32.partialorder %v4735_v31, %v7401_v26  ;;  %v4767_v32 = vadd.f32 %v4765_v2, %v4445_v27 }
 0xd0f   : > { %v6007_v36 = vsel %vm4736_vm14, 1.0, %v6472_v0 }
 0xd10   : > { %v4770_v35 = vmul.f32 0.33333334, %v6007_v36  ;;  %v4739_v38 = vsub.f32 1.0, %v6007_v36  ;;  %v5076_v42 = vrot.slane %v4767_v32, %v6770_v56  ;;  %v4768_v30 = vmul.f32 92.9516, %v4767_v32 }
 0xd12   : > { %v4771_v22 = vsub.f32 %v4770_v35, %v7817_v41  ;;  %v4740_v34 = vmul.f32 %v4739_v38, %v4735_v31  ;;  %v4741_v47 = vmul.f32 %v4739_v38, %v4732_v28  ;;  %v4769_v24 = vadd.f32 10.0, %v4768_v30 }
 0xd14   : > { %v4772_v23 = vmul.f32 0.016666668, %v4771_v22  ;;  %v4987_v39 = vrot.slane %v4769_v24, %v6718_v48  ;;  %v4991_v46 = vrot.slane %v4769_v24, %v6666_v33 }
 0xd16   : > { %v4773_v51 = vadd.f32 %v4772_v23, %v7817_v41  ;;  %v5068_v41 = vunpack.c.l.bf16 %v6044_v29 }
 0xd18   : > { %v4776_v7 = vmul.f32 0.1, %v4773_v51  ;;  %v5078_v15 = vsub.f32 %v5068_v41, %v5076_v42 }
 0xd1a   : > { %v4777_v45 = vadd.f32 %v4776_v7, %v4775_v16  ;;  %v5079_v19 = vmul.f32 0.033333335, %v5078_v15 }
 0xd1c   : > { %v4786_v26 = vrot.slane %v4777_v45, %v6666_v33  ;;  %v4782_v14 = vrot.slane %v4777_v45, %v6718_v48  ;;  %v5087_v20 = vrot.slane %v5079_v19, %v6775_v1  ;;  %v5096_v43 = vmul.f32 0.033333335, %v4777_v45 }
 0xd1e   : > { %v4790_v58 = vpack.c.bf16 %v4786_v26, %v4786_v26  ;;  %v4789_v10 = vpack.c.bf16 %v4782_v14, %v4782_v14  ;;  %v5089_v17 = vadd.f32 %v5087_v20, %v4767_v32  ;;  %v5097_v31 = vsub.f32 %v4777_v45, %v5096_v43 }
 0xd20   : > { %5026 = vmatprep.mubr.bf16.mxu0 %v4790_v58  ;;  %5394 = vst.msk [vmem:[#allocation6 + $0x3] ss:$8 sm:$0x3] %vm6785_vm0, %v5089_v17  ;;  %v5090_v23 = vmul.f32 92.9516, %v5089_v17 }
 0xd21   : > { %5027 = vmatmul.mubr.bf16.vlgmr.msra.gmra.mxu0 %v4789_v10 }
 0xd22   : > { %v5091_v37 = vadd.f32 10.0, %v5090_v23 }
 0xd24   : > { %v5313_v16 = vrot.slane %v5091_v37, %v6666_v33 }
 0xde1   : > { %v5028_v49 = vpop.f32.mrf.mxu0 }
 0xde2   : > { %v5029_v63 = vadd.f32 %v5028_v49, %v4987_v39 }
 0xde3   : > { %v5030_v61 = vpop.f32.mrf.mxu0 }
 0xde4   : > { %v5031_v56 = vadd.f32 %v5030_v61, %v4991_v46 }
 0xde5   : > { %v5032_v4 = vpop.f32.mrf.mxu0 }
 0xde6   : > { %v5037_v50 = vcombine.low %v5029_v63, %v5031_v56 }
 0xde7   : > { %v5033_v27 = vpop.f32.mrf.mxu0 }
 0xde8   : > { %v5044_v52 = vrot.slane %v5037_v50, %v6775_v1 }
 0xdea   : > { %v5051_v12 = vrot.slane %v5044_v52, %v6775_v1 }
 0xdec   : > { %v5053_v3 = vadd.f32 %v5051_v12, %v4741_v47  ;;  %6043 = vst.msk [vmem:[%s6580_s22 + $0x1c] sm:$0x3] %vm6785_vm0, %v5051_v12 }
 0xdee   : > { %v5054_v6 = vmul.f32 0.5, %v5053_v3 }
 0xdf0   : > { %v5055_v55 = vsub.f32 %v5054_v6, %v4740_v34 }
 0xdf2   : > { %v5056_v53 = vmul.f32 0.5, %v5055_v55 }
 0xdf4   : > { %v5057_v40 = vadd.f32 %v5056_v53, %v4740_v34 }
 0xdf6   : > { %vm5058_vm15 = vcmp.gt.f32.partialorder %v5057_v40, %v7896_v44 }
 0xdf7   : > { %v6042_v5 = vsel %vm5058_vm15, 1.0, %v6472_v0 }
 0xdf8   : > { %v5092_v11 = vmul.f32 0.33333334, %v6042_v5  ;;  %v5061_v8 = vsub.f32 1.0, %v6042_v5 }
 0xdfa   : > { %v5093_v13 = vsub.f32 %v5092_v11, %v4773_v51  ;;  %v7900_v59 = vmul.f32 %v5061_v8, %v5057_v40  ;;  %v5063_v60 = vmul.f32 %v5061_v8, %v5054_v6 }
 0xdfc   : > { %v5094_v28 = vmul.f32 0.016666668, %v5093_v13 }
 0xdfe   : > { %v5095_v9 = vadd.f32 %v5094_v28, %v4773_v51  ;;  %v5309_v51 = vrot.slane %v5091_v37, %v6718_v48 }
 0xe00   : > { %v5098_v36 = vmul.f32 0.1, %v5095_v9  ;;  %5390 = vst.msk [vmem:[#allocation6 + $0x1] ss:$8 sm:$0x3] %vm6785_vm0, %v5095_v9 }
 0xe02   : > { %v5099_v35 = vadd.f32 %v5098_v36, %v5097_v31 }
 0xe04   : > { %v5108_v38 = vrot.slane %v5099_v35, %v6666_v33  ;;  %5392 = vst.msk [vmem:[#allocation6 + $0x2] ss:$8 sm:$0x3] %vm6785_vm0, %v5099_v35  ;;  %v5104_v22 = vrot.slane %v5099_v35, %v6718_v48 }
 0xe06   : > { %v5112_v34 = vpack.c.bf16 %v5108_v38, %v5108_v38  ;;  %v5111_v47 = vpack.c.bf16 %v5104_v22, %v5104_v22 }
 0xe08   : > { %5348 = vmatprep.mubr.bf16.mxu1 %v5112_v34 }
 0xe09   : > { %5349 = vmatmul.mubr.bf16.vlgmr.msra.gmra.mxu1 %v5111_v47 }
 0xec9   : > { %v5350_v7 = vpop.f32.mrf.mxu1 }
 0xeca   : > { %v5351_v26 = vadd.f32 %v5350_v7, %v5309_v51 }
 0xecb   : > { %v5352_v45 = vpop.f32.mrf.mxu1 }
 0xecc   : > { %v5353_v14 = vadd.f32 %v5352_v45, %v5313_v16 }
 0xecd   : > { %v5354_v58 = vpop.f32.mrf.mxu1 }
 0xece   : > { %v5359_v10 = vcombine.low %v5351_v26, %v5353_v14 }
 0xecf   : > { %v5355_v18 = vpop.f32.mrf.mxu1 }
 0xed0   : > { %v5366_v62 = vrot.slane %v5359_v10, %v6775_v1 }
 0xed2   : > { %v5373_v33 = vrot.slane %v5366_v62, %v6775_v1 }
 0xed4   : > { %v5375_v48 = vadd.f32 %v5373_v33, %v5063_v60  ;;  %6078 = vst.msk [vmem:[%s6580_s22 + $0x1e] sm:$0x3] %vm6785_vm0, %v5373_v33 }
 0xed5   : > { %6386 = shalt.err (!%p6383_p0)
}
 0xed6   : > { %s6387_s9 = scalar_lea.hbm %s7916_s8, 512  ;;  %s6391_s23 = scalar_lea.hbm %s7990_s3, 2048 }
 0xed7   : > { %p6388_p1 = scmp.ne.s32.totalorder %s7916_s8, %s6387_s9  ;;  %p6392_p7 = scmp.lt.s32.totalorder %s7916_s8, %s7990_s3 }
 0xed8   : > { %p6393_p2 = scmp.lt.s32.totalorder %s6391_s23, %s6387_s9 }
 0xed9   : > { %p6389_p3 = pnand %p6388_p1, %p6542_p5 }
 0xeda   : > { %p6394_p6 = por %p6393_p2, %p6392_p7 }
 0xedb   : > { %p6390_p4 = pneg %p6389_p3 }
 0xedd   : > { %p6395_p8 = pnand %p6394_p6, %p6390_p4 }
 0xedf   : > { %6398 = shalt.err (!%p6395_p8)
}
 0xee0   : > { %s6474_s29 = smov 32   ;;  %s6475_s30 = smov 2   ;;  %v5376_v1 = vmul.f32 0.5, %v5375_v48 }
 0xee1   : > { %6093 = dma.vmem_to_hbm [thread:$0]  (%p6542_p5), %s7918_s5, 512, %s7916_s8, %s7926_s10, %s6474_s29, %s6474_s29, %s6475_s30  }
 0xee2   : > { %v5377_v25 = vsub.f32 %v5376_v1, %v7900_v59  ;;  %s6476_s6 = smov [#allocation6]   ;;  %p7999_p9 = scmp.eq.s32.totalorder %s6523_s19, 3 }
 0xee3   : > { %s5429_s7 = sshll.u32 %s6476_s6, 4  ;;  %s5430_s7 = int_to_ptr.vmem [resolvable:$true] %s5429_s7 }
 0xee4   : > { %v5378_v21 = vmul.f32 0.5, %v5377_v25  ;;  %s6399_s25 = scalar_lea.vmem %s5430_s7, 256  ;;  %p6406_p12 = scmp.lt.s32.totalorder %s5430_s7, %s5430_s7 }
 0xee5   : > { %p6400_p5 = scmp.ne.s32.totalorder %s5430_s7, %s6399_s25  ;;  %p6407_p13 = scmp.lt.s32.totalorder %s6399_s25, %s6399_s25 }
 0xee6   : > { %v5379_v57 = vadd.f32 %v5378_v21, %v7900_v59 }
 0xee7   : > { %p6401_p10 = pnand %p6400_p5, %p7999_p9  ;;  %p6408_p0 = por %p6407_p13, %p6406_p12 }
 0xee8   : > { %vm5380_vm1 = vcmp.gt.f32.partialorder %v5379_v57, %v7896_v44 }
 0xee9   : > { %v6077_v2 = vsel %vm5380_vm1, 1.0, %v6472_v0  ;;  %p6402_p11 = pneg %p6401_p10 }
 0xeea   : > { %v5383_v32 = vsub.f32 1.0, %v6077_v2  ;;  %5388 = vst.msk [vmem:[#allocation6] ss:$8 sm:$0x3] %vm6785_vm0, %v6077_v2 }
 0xeeb   : > { %p6409_p1 = pnand %p6408_p0, %p6402_p11 }
 0xeec   : > { %v5384_v29 = vmul.f32 %v5383_v32, %v5379_v57  ;;  %v5385_v42 = vmul.f32 %v5383_v32, %v5376_v1 }
 0xeee   : > { %5396 = vst.msk [vmem:[#allocation6 + $0x4] ss:$8 sm:$0x3] %vm6785_vm0, %v5384_v29  ;;  %5398 = vst.msk [vmem:[#allocation6 + $0x5] ss:$8 sm:$0x3] %vm6785_vm0, %v5385_v42 }
 0xeef   : > { %6412 = shalt.err (!%p6409_p1)
}
 0xef0   : > { %p8000_p3 = pmov %p7999_p9 }
 0xef2   : > { %6095 = dma.vmem_to_hbm [thread:$0]  (%p8000_p3), %s5430_s7, 256, %s7991_s4, [#allocation7]  }
 0xef3   : > { %p8001_p4 = pmov %p8000_p3 }
 0xef4   : > { %p8002_p7 = pmov %p8000_p3 }
 0xef5   : > { %6444 = dma.done.wait (%p8001_p4), [#allocation7], 256  }
 0xef6   : > { %6446 = vsyncadd (%p8002_p7), [#allocation7], 4294967040 }
 0xef7 PF: > { %p6111_p2 = scmp.ge.s32.totalorder %s6465_s18, 2  ;;  %s5445_s10 = sand.u32 1, %s6453_s15  }
 0xef8   : > { %p8003_p6 = scmp.ne.s32.totalorder %s7994_s26, 0  ;;  %s5446_s11 = scalar_lea.sflag [#allocation4], %s5445_s10 }
 0xefa   : > { %p6104_p8 = pnand %p6111_p2, %p8003_p6 }
 0xefc   : > { %p6105_p5 = pneg %p6104_p8 }
 0xefe   : > { %6448 = dma.done.wait (%p6105_p5), %s5446_s11, 512  }
 0xeff   : > { %6450 = vsyncadd (%p6105_p5), %s5446_s11, 4294966784  ;;  %p17_p9 = scmp.ge.s32.totalorder %s6527_s21, 6   ;;  %s8004_s15 = smov %s6457_s16 }
 0xf00   : > { %s8005_s16 = smov %s6461_s17  ;;  %s8006_s17 = smov %s6538_s24 }
 0xf01   : > { %s8007_s18 = smov %s6527_s21  ;;  %19 = sbr.rel (!%p17_p9) target bundleno = 5 (0x5), region = 120 }
 0xf06   :  { %5451 = vsyncpa [#allocation3], 1 }
 0xf07   :  { %5453 = vsyncpa [#allocation3 + $0x1], 1 }
 0xf08   :  { %5454 = vsyncpa [#allocation4], 1 }
 0xf09   :  { %5456 = vsyncpa [#allocation4 + $0x1], 1 }
 0xf0a   :  { %5457 = vsyncpa [#allocation7], 1 }

</bundles_post_ra>
